<compile_context>
chip_gen: v7x
topology: tpu7x:2x2x1
jax: 0.10.0
libtpu: 0.0.40
codegen_flags: <defaults>
</compile_context>

<pallas_src>
import math
import functools

import jax
import jax.numpy as jnp
from jax.experimental import pallas as pl
from jax.experimental.pallas import tpu as pltpu

_SQRT2 = math.sqrt(2.0)
_BF16 = jnp.bfloat16


def _tpu_vmem_capacity():
    try:
        info = pltpu.get_tpu_info()
        cap = getattr(info, "vmem_capacity_bytes", None)
        if cap:
            return int(cap)
    except Exception:
        pass
    return 64 * 1024 * 1024          # conservative default (v7x per-core VMEM)


_VMEM_CAP = _tpu_vmem_capacity()
# ~0.75x of physical VMEM, capped: ~96 MiB on v5e/v6e (128 MiB parts), ~48 MiB on v7x.
_VMEM_LIMIT = int(min(_VMEM_CAP * 3 // 4, 100 * 1024 * 1024))
# per-kernel budget for the *streamed* (double-buffered) row blocks
_TILE_BUDGET = int(max(8 * 1024 * 1024, min(_VMEM_LIMIT // 3, 24 * 1024 * 1024)))


def _cp(n_grid_axes):
    return pltpu.CompilerParams(
        dimension_semantics=("parallel",) * n_grid_axes,
        vmem_limit_bytes=_VMEM_LIMIT)


def _round_up(x, m):
    return ((x + m - 1) // m) * m


def _pick_tile_m(M, stream_cols, desired=512, resident_bytes=0):
    """Row-tile size.  Only the streamed (double-buffered, f32) x/y blocks scale
    with tm; resident blocks (constant index_map weights) are subtracted from
    the budget once instead of being charged per row."""
    budget = max(2 * 1024 * 1024, _TILE_BUDGET - resident_bytes)
    cap = max(8, (budget // max(1, 8 * stream_cols)) // 8 * 8)   # 2 bufs * 4 B * cols
    return int(max(8, min(desired, cap, _round_up(M, 8))))


def _gelu(y):
    # exact GELU (matches nn.GELU default), f32 math
    return 0.5 * y * (1.0 + jax.lax.erf(y / _SQRT2))


# ----------------------------------------------------------------------------
# Pallas kernels
# ----------------------------------------------------------------------------
def _matmul_kernel(x_ref, w_ref, b_ref, o_ref, *, apply_gelu):
    # bf16 MXU feeds, f32 accumulation / epilogue.
    x = x_ref[...].astype(_BF16)
    w = w_ref[...].astype(_BF16)
    y = jnp.dot(x, w, preferred_element_type=jnp.float32)
    y = y + b_ref[...].astype(jnp.float32)
    if apply_gelu:
        y = _gelu(y)
    o_ref[...] = y.astype(o_ref.dtype)


def _rownorm_kernel(x_ref, *rest, eps, apply_gelu, has_residual):
    # Row normalization over the last axis, optional fused residual add before
    # and GELU after.  Always f32 math (matches Fp32GroupNorm / Fp32LayerNorm).
    if has_residual:
        r_ref, g_ref, b_ref, o_ref = rest
        x = x_ref[...].astype(jnp.float32) + r_ref[...].astype(jnp.float32)
    else:
        g_ref, b_ref, o_ref = rest
        x = x_ref[...].astype(jnp.float32)
    mean = jnp.mean(x, axis=-1, keepdims=True)
    var = jnp.mean(jnp.square(x - mean), axis=-1, keepdims=True)
    y = (x - mean) * jax.lax.rsqrt(var + eps)
    y = y * g_ref[...].astype(jnp.float32) + b_ref[...].astype(jnp.float32)
    if apply_gelu:
        y = _gelu(y)
    o_ref[...] = y.astype(o_ref.dtype)


def _attn_kernel(qkv_ref, *rest, num_heads, scale, has_bias):
    """One batch element per grid step.  qkv_ref: (1, T, 3C); out: (1, T, C).

    Per-head (T,T) scores with bf16 MXU feeds + f32 softmax; all head outputs
    are concatenated along the lane axis and written with ONE lane-dense
    (T, C) store (no masked per-head partial stores)."""
    if has_bias:
        bias_ref, o_ref = rest
    else:
        (o_ref,) = rest
    qkv = qkv_ref[0]                                 # (T, 3C) f32
    C = qkv.shape[1] // 3
    Dh = C // num_heads
    if has_bias:
        b = bias_ref[0].astype(jnp.float32)          # (1, T) additive mask
    heads = []
    for h in range(num_heads):
        qh = qkv[:, h * Dh:(h + 1) * Dh].astype(_BF16)
        kh = qkv[:, C + h * Dh:C + (h + 1) * Dh].astype(_BF16)
        vh = qkv[:, 2 * C + h * Dh:2 * C + (h + 1) * Dh].astype(_BF16)
        # contract last axes -> no materialized k.T
        s = jax.lax.dot_general(qh, kh, (((1,), (1,)), ((), ())),
                                preferred_element_type=jnp.float32) * scale
        if has_bias:
            s = s + b
        s = s - jnp.max(s, axis=-1, keepdims=True)
        p = jnp.exp(s)
        p = p / jnp.sum(p, axis=-1, keepdims=True)   # exact division (parity)
        oh = jnp.dot(p.astype(_BF16), vh, preferred_element_type=jnp.float32)
        heads.append(oh)
    out = jnp.concatenate(heads, axis=-1)            # (T, C)
    o_ref[0] = out.astype(o_ref.dtype)


def _posconv_kernel(x_ref, w_ref, b_ref, o_ref):
    """Grouped positional conv, one (batch, group) per grid step.
    x_ref: (T_pad, Cg) bf16 padded slab (resident in VMEM),
    w_ref: (k, Cg_in, Cg_out) bf16, b_ref: (1, Cg) f32, o_ref: (T_out, Cg).
    Slides the window with static slices: k accumulation matmuls, no im2col."""
    t_out = o_ref.shape[0]
    k = w_ref.shape[0]
    acc = jnp.zeros(o_ref.shape, jnp.float32)
    for tau in range(k):
        xt = x_ref[pl.ds(tau, t_out), :]
        acc = acc + jnp.dot(xt, w_ref[tau], preferred_element_type=jnp.float32)
    y = _gelu(acc + b_ref[...].astype(jnp.float32))
    o_ref[...] = y.astype(o_ref.dtype)


# ----------------------------------------------------------------------------
# Pallas wrappers
# ----------------------------------------------------------------------------
def linear(x, w, b, apply_gelu=False, tile_m=512):
    """y = x @ w + b, optional fused exact-GELU.  x:(M,K) f32, w:(K,N) bf16, b:(N,)."""
    M, K = x.shape
    N = w.shape[1]
    resident = 2 * K * N * jnp.dtype(w.dtype).itemsize   # weight block (DMA'd once)
    tm = _pick_tile_m(M, K + N, tile_m, resident_bytes=resident)
    return pl.pallas_call(
        functools.partial(_matmul_kernel, apply_gelu=apply_gelu),
        out_shape=jax.ShapeDtypeStruct((M, N), x.dtype),
        grid=(pl.cdiv(M, tm),),
        in_specs=[
            pl.BlockSpec((tm, K), lambda i: (i, 0)),
            pl.BlockSpec((K, N), lambda i: (0, 0)),     # resident weight
            pl.BlockSpec((1, N), lambda i: (0, 0)),
        ],
        out_specs=pl.BlockSpec((tm, N), lambda i: (i, 0)),
        compiler_params=_cp(1),
    )(x, w, b.reshape(1, N))


def _rownorm_call(x, residual, gamma2d, beta2d, eps, apply_gelu, tile_m, per_row):
    M, C = x.shape
    has_res = residual is not None
    tm = _pick_tile_m(M, C * (3 if has_res else 2), tile_m)
    row_spec = pl.BlockSpec((tm, C), lambda i: (i, 0))
    if per_row:
        aff_spec = pl.BlockSpec((tm, 1), lambda i: (i, 0))
    else:
        aff_spec = pl.BlockSpec((1, C), lambda i: (0, 0))
    in_specs = [row_spec]
    args = [x]
    if has_res:
        in_specs.append(row_spec)
        args.append(residual)
    in_specs += [aff_spec, aff_spec]
    args += [gamma2d, beta2d]
    return pl.pallas_call(
        functools.partial(_rownorm_kernel, eps=eps, apply_gelu=apply_gelu,
                          has_residual=has_res),
        out_shape=jax.ShapeDtypeStruct((M, C), x.dtype),
        grid=(pl.cdiv(M, tm),),
        in_specs=in_specs,
        out_specs=row_spec,
        compiler_params=_cp(1),
    )(*args)


def layer_norm(x, gamma, beta, eps=1e-5, apply_gelu=False, tile_m=512):
    return _rownorm_call(x, None, gamma.reshape(1, -1), beta.reshape(1, -1),
                         eps, apply_gelu, tile_m, per_row=False)


def add_layer_norm(x, residual, gamma, beta, eps=1e-5, tile_m=512):
    """Fused (x + residual) -> LayerNorm over last axis."""
    return _rownorm_call(x, residual, gamma.reshape(1, -1), beta.reshape(1, -1),
                         eps, False, tile_m, per_row=False)


def group_norm_rows(x, gamma_rows, beta_rows, eps=1e-5, apply_gelu=False, tile_m=512):
    """GroupNorm with num_groups == num_channels: rows (B*C, T) normalized over T."""
    return _rownorm_call(x, None, gamma_rows, beta_rows, eps, apply_gelu,
                         tile_m, per_row=True)


def attention(qkv, bias, num_heads):
    """qkv: (B, T, 3C) fused projections; bias: (B, 1, T) additive mask or None."""
    B, T, C3 = qkv.shape
    C = C3 // 3
    Dh = C // num_heads
    scale = 1.0 / math.sqrt(Dh)
    has_bias = bias is not None
    in_specs = [pl.BlockSpec((1, T, C3), lambda i: (i, 0, 0))]
    args = [qkv]
    if has_bias:
        in_specs.append(pl.BlockSpec((1, 1, T), lambda i: (i, 0, 0)))
        args.append(bias)
    return pl.pallas_call(
        functools.partial(_attn_kernel, num_heads=num_heads, scale=scale,
                          has_bias=has_bias),
        out_shape=jax.ShapeDtypeStruct((B, T, C), qkv.dtype),
        grid=(B,),
        in_specs=in_specs,
        out_specs=pl.BlockSpec((1, T, C), lambda i: (i, 0, 0)),
        compiler_params=_cp(1),
    )(*args)


# ----------------------------------------------------------------------------
# Convolutions
# ----------------------------------------------------------------------------
def conv1d(x_btc, weight, bias, k, stride, apply_gelu=False):
    """Strided 1-D conv via a stride-folded reshape (near-zero activation
    inflation instead of k-fold im2col) feeding the tiled linear kernel.
    x_btc: (B, T, Cin) f32; weight: (Cout, Cin, k); bias: (Cout,). -> (B, T_out, Cout)."""
    B, T, Cin = x_btc.shape
    Cout = weight.shape[0]
    T_out = (T - k) // stride + 1
    n_q = -(-k // stride)                       # ceil(k / stride)  (<= 2 for wav2vec2)
    k_pad = n_q * stride
    rows_needed = (T_out + n_q - 1) * stride
    if rows_needed > T:
        x_btc = jnp.pad(x_btc, ((0, 0), (0, rows_needed - T), (0, 0)))
    else:
        x_btc = x_btc[:, :rows_needed, :]
    xr = x_btc.reshape(B, T_out + n_q - 1, stride * Cin)
    # concat n_q shifted contiguous views -> columns ordered as (tau, cin)
    xcat = jnp.concatenate([xr[:, q:q + T_out, :] for q in range(n_q)], axis=-1)
    w_t = jnp.transpose(weight, (2, 1, 0))      # (k, Cin, Cout)
    if k_pad > k:
        w_t = jnp.pad(w_t, ((0, k_pad - k), (0, 0), (0, 0)))
    w2 = w_t.reshape(k_pad * Cin, Cout).astype(_BF16)
    y = linear(xcat.reshape(B * T_out, k_pad * Cin), w2, bias, apply_gelu=apply_gelu)
    return y.reshape(B, T_out, Cout)


def feature_extractor(source, conv_params, conv_layers):
    """ConvFeatureExtractionModel, mode='default' (group norm + GELU on layer 0)."""
    x = source[:, :, None]                                   # (B, T, 1)
    for i, (lp, (dim, k, stride)) in enumerate(zip(conv_params, conv_layers)):
        if i == 0:
            y = conv1d(x, lp["weight"], lp["bias"], k, stride, apply_gelu=False)
            B, T0, C = y.shape
            rows = jnp.transpose(y, (0, 2, 1)).reshape(B * C, T0)
            g_rows = jnp.tile(lp["gn_g"], B).reshape(B * C, 1)
            b_rows = jnp.tile(lp["gn_b"], B).reshape(B * C, 1)
            rows = group_norm_rows(rows, g_rows, b_rows, eps=1e-5, apply_gelu=True)
            x = jnp.transpose(rows.reshape(B, C, T0), (0, 2, 1))
        else:
            x = conv1d(x, lp["weight"], lp["bias"], k, stride, apply_gelu=True)
    return x                                                  # (B, T', C_last)


def pos_conv_embed(x, weight, bias, kernel, groups):
    """Grouped Conv1d positional embedding + GELU as a direct Pallas
    sliding-window kernel (grid = (B, G)); weight_norm folded into `weight`.
    x: (B, T, C) -> (B, T, C)."""
    B, T, C = x.shape
    Cg = C // groups
    pad = kernel // 2
    T_pad = T + 2 * pad
    T_out = T_pad - kernel + 1 - (1 if kernel % 2 == 0 else 0)   # == T
    xp = jnp.pad(x, ((0, 0), (pad, pad), (0, 0)))
    xg = jnp.transpose(xp.reshape(B, T_pad, groups, Cg), (0, 2, 1, 3)).astype(_BF16)
    # PyTorch grouped weight (C_out, Cg_in, k) -> (G, k, Cg_in, Cg_out)
    wg = jnp.transpose(weight.reshape(groups, Cg, Cg, kernel), (0, 3, 2, 1)).astype(_BF16)
    bg = bias.reshape(groups, 1, Cg).astype(jnp.float32)
    y = pl.pallas_call(
        _posconv_kernel,
        out_shape=jax.ShapeDtypeStruct((B, groups, T_out, Cg), x.dtype),
        grid=(B, groups),
        in_specs=[
            pl.BlockSpec((None, None, T_pad, Cg), lambda b, g: (b, g, 0, 0)),
            pl.BlockSpec((None, kernel, Cg, Cg), lambda b, g: (g, 0, 0, 0)),
            pl.BlockSpec((None, 1, Cg), lambda b, g: (g, 0, 0)),
        ],
        out_specs=pl.BlockSpec((None, None, T_out, Cg), lambda b, g: (b, g, 0, 0)),
        compiler_params=_cp(2),
    )(xg, wg, bg)
    return jnp.transpose(y, (0, 2, 1, 3)).reshape(B, T_out, C)


# ----------------------------------------------------------------------------
# Model blocks
# ----------------------------------------------------------------------------
def multi_head_attention(x_flat, lp, bias, num_heads, B, T, C):
    qkv = linear(x_flat, lp["wqkv"], lp["bqkv"])             # fused QKV (B*T, 3C)
    o = attention(qkv.reshape(B, T, 3 * C), bias, num_heads)
    return linear(o.reshape(B * T, C), lp["wo"], lp["bo"])


def encoder_layer(x_flat, lp, bias, num_heads, eps, B, T, C):
    # post-norm (wav2vec2-base style) with fused residual + LayerNorm
    attn = multi_head_attention(x_flat, lp, bias, num_heads, B, T, C)
    x_flat = add_layer_norm(x_flat, attn, lp["ln1_g"], lp["ln1_b"], eps=eps)
    h = linear(x_flat, lp["w1"], lp["b1"], apply_gelu=True)
    h = linear(h, lp["w2"], lp["b2"])
    x_flat = add_layer_norm(x_flat, h, lp["ln2_g"], lp["ln2_b"], eps=eps)
    return x_flat


def gumbel_quantizer(x_flat, qp, groups, num_vars, codevector_dim):
    """Eval-mode GumbelVectorQuantizer: hard argmax code selection (gather) + perplexity."""
    M, _ = x_flat.shape
    logits = linear(x_flat, qp["wp_w"], qp["wp_b"])          # (M, G*V)
    logits_g = logits.reshape(M, groups, num_vars)
    idx = jnp.argmax(logits_g, axis=-1)                      # (M, G)
    flat_idx = idx + jnp.arange(groups, dtype=idx.dtype)[None, :] * num_vars
    cvd = codevector_dim // groups
    gathered = jnp.take(qp["codevectors"], flat_idx.reshape(-1), axis=0)
    quantized = gathered.reshape(M, groups * cvd)
    probs = jax.nn.softmax(logits_g.astype(jnp.float32), axis=-1)
    avg_probs = jnp.mean(probs, axis=0)
    perplexity = jnp.sum(jnp.exp(-jnp.sum(avg_probs * jnp.log(avg_probs + 1e-7), axis=-1)))
    return quantized, perplexity


def wav2vec2_forward(params, cfg, source, mask=None):
    """Full Wav2Vec2Model.forward(source, mask, return_quantized=True) in eval mode."""
    eps = cfg["layer_norm_eps"]
    E = cfg["embed_dim"]

    # --- feature extractor ---
    feats = feature_extractor(source, params["conv"], cfg["conv_layers"])   # (B, T', C)
    B, Tp, C_last = feats.shape
    f2 = layer_norm(feats.reshape(B * Tp, C_last), params["ln_g"], params["ln_b"], eps=eps)
    x_flat = linear(f2, params["proj_w"], params["proj_b"])                 # post_extract_proj

    # --- transformer encoder: pos-conv + fused residual-add + LayerNorm ---
    pos = pos_conv_embed(x_flat.reshape(B, Tp, E), params["pos_w"], params["pos_b"],
                         cfg["pos_kernel"], cfg["pos_groups"])
    x_flat = add_layer_norm(x_flat, pos.reshape(B * Tp, E),
                            params["enc_ln_g"], params["enc_ln_b"], eps=eps)

    H = cfg["num_heads"]
    if mask is not None:
        bias = ((1.0 - mask.astype(jnp.float32)) * -10000.0).reshape(B, 1, Tp)
    else:
        bias = None                                                         # no dead bias DMA

    for lp in params["layers"]:
        x_flat = encoder_layer(x_flat, lp, bias, H, eps, B, Tp, E)

    # --- quantizer + projections ---
    quantized, perplexity = gumbel_quantizer(
        x_flat, params["quant"], cfg["quant_groups"], cfg["quant_num_vars"],
        cfg["codevector_dim"])
    quantized = linear(quantized, params["projq_w"], params["projq_b"]).reshape(B, Tp, E)
    out = linear(x_flat, params["aux_w"], params["aux_b"]).reshape(B, Tp, E)
    return out, quantized, perplexity


# ----------------------------------------------------------------------------
# Deterministic parameter initialization (matmul weights stored in bf16)
# ----------------------------------------------------------------------------
def _nrm(key, shape, std=0.02, dtype=jnp.float32):
    return (std * jax.random.normal(key, shape, dtype=jnp.float32)).astype(dtype)


def init_params(key, cfg):
    keys = iter(jax.random.split(key, 256))
    p = {}

    # feature extractor convs (conv_bias=False -> zero bias, layer 0 has GroupNorm)
    conv = []
    in_d = 1
    for i, (dim, k, _s) in enumerate(cfg["conv_layers"]):
        lp = {"weight": _nrm(next(keys), (dim, in_d, k), std=0.1, dtype=_BF16),
              "bias": jnp.zeros((dim,), jnp.float32)}
        if i == 0:
            lp["gn_g"] = jnp.ones((dim,), jnp.float32)
            lp["gn_b"] = jnp.zeros((dim,), jnp.float32)
        conv.append(lp)
        in_d = dim
    p["conv"] = conv

    C_last = cfg["conv_layers"][-1][0]
    E = cfg["embed_dim"]
    p["ln_g"] = jnp.ones((C_last,), jnp.float32)
    p["ln_b"] = jnp.zeros((C_last,), jnp.float32)
    p["proj_w"] = _nrm(next(keys), (C_last, E), dtype=_BF16)
    p["proj_b"] = jnp.zeros((E,), jnp.float32)

    # positional conv embedding (weight_norm folded, PyTorch layout (C_out, Cg_in, k))
    Cg = E // cfg["pos_groups"]
    p["pos_w"] = _nrm(next(keys), (E, Cg, cfg["pos_kernel"]), std=0.05, dtype=_BF16)
    p["pos_b"] = jnp.zeros((E,), jnp.float32)
    p["enc_ln_g"] = jnp.ones((E,), jnp.float32)
    p["enc_ln_b"] = jnp.zeros((E,), jnp.float32)

    # transformer layers (fused QKV)
    layers = []
    for _ in range(cfg["num_layers"]):
        lp = {
            "wqkv": _nrm(next(keys), (E, 3 * E), dtype=_BF16),
            "bqkv": jnp.zeros((3 * E,), jnp.float32),
            "wo": _nrm(next(keys), (E, E), dtype=_BF16),
            "bo": jnp.zeros((E,), jnp.float32),
            "ln1_g": jnp.ones((E,), jnp.float32), "ln1_b": jnp.zeros((E,), jnp.float32),
            "w1": _nrm(next(keys), (E, cfg["ff_hidden_dim"]), dtype=_BF16),
            "b1": jnp.zeros((cfg["ff_hidden_dim"],), jnp.float32),
            "w2": _nrm(next(keys), (cfg["ff_hidden_dim"], E), dtype=_BF16),
            "b2": jnp.zeros((E,), jnp.float32),
            "ln2_g": jnp.ones((E,), jnp.float32), "ln2_b": jnp.zeros((E,), jnp.float32),
        }
        layers.append(lp)
    p["layers"] = layers

    # quantizer + projections
    G, V, CV = cfg["quant_groups"], cfg["quant_num_vars"], cfg["codevector_dim"]
    p["quant"] = {
        "wp_w": _nrm(next(keys), (E, G * V), dtype=_BF16),
        "wp_b": jnp.zeros((G * V,), jnp.float32),
        "codevectors": _nrm(next(keys), (G * V, CV // G), std=0.1),   # f32 (gather only)
    }
    p["projq_w"] = _nrm(next(keys), (CV, E), dtype=_BF16)
    p["projq_b"] = jnp.zeros((E,), jnp.float32)
    p["aux_w"] = _nrm(next(keys), (E, E), dtype=_BF16)
    p["aux_b"] = jnp.zeros((E,), jnp.float32)
    return p


# ----------------------------------------------------------------------------
# main
# ----------------------------------------------------------------------------
if __name__ == "__main__":
    cfg = {
        # small, shape-consistent version of the default config
        "conv_layers": [(32, 10, 5), (32, 3, 2)],   # (dim, kernel, stride)
        "embed_dim": 64,
        "num_layers": 2,
        "num_heads": 4,
        "ff_hidden_dim": 128,
        "layer_norm_eps": 1e-5,
        "quant_groups": 2,
        "quant_num_vars": 16,
        "codevector_dim": 32,
        "pos_kernel": 8,
        "pos_groups": 4,
    }

    key = jax.random.PRNGKey(0)
    k_param, k_src = jax.random.split(key)
    params = init_params(k_param, cfg)

    B, T = 2, 400                                   # raw waveform (B, T)
    source = jax.random.normal(k_src, (B, T), dtype=jnp.float32)

    fwd = jax.jit(functools.partial(wav2vec2_forward, params, cfg))
    x, quantized, perplexity = fwd(source)          # return_quantized=True path
    jax.block_until_ready((x, quantized, perplexity))

    # T' = ((400-10)//5+1 = 79) -> ((79-3)//2+1 = 39)
    assert x.shape == (B, 39, cfg["embed_dim"])
    assert quantized.shape == (B, 39, cfg["embed_dim"])
    assert perplexity.shape == ()
    assert bool(jnp.all(jnp.isfinite(x)))
    assert bool(jnp.all(jnp.isfinite(quantized)))
    print("KERNEL_OK")
</pallas_src>

<mosaic_0001>
module attributes {stable_mosaic.version = 11 : i64} {
  func.func @_matmul_kernel(%arg0: i32, %arg1: memref<160x10xf32, #tpu.memory_space<vmem>>, %arg2: memref<10x32xbf16, #tpu.memory_space<vmem>>, %arg3: memref<1x32xf32, #tpu.memory_space<vmem>>, %arg4: memref<160x32xf32, #tpu.memory_space<vmem>>) attributes {dimension_semantics = [#tpu.dimension_semantics<parallel>], iteration_bounds = array<i64: 1>, scalar_prefetch = 0 : i64, scratch_operands = 0 : i64, tpu.core_type = #tpu.core_type<tc>, window_params = [{transform_indices = @transform_0, window_bounds = array<i64: 160, 10>}, {pipeline_mode = #tpu.pipeline_mode<synchronous>, transform_indices = @transform_1, window_bounds = array<i64: 10, 32>}, {pipeline_mode = #tpu.pipeline_mode<synchronous>, transform_indices = @transform_2, window_bounds = array<i64: 1, 32>}, {transform_indices = @transform_3, window_bounds = array<i64: 160, 32>}]} {
    %c0 = arith.constant 0 : index
    %c0_0 = arith.constant 0 : index
    %0 = vector.load %arg1[%c0, %c0_0] : memref<160x10xf32, #tpu.memory_space<vmem>>, vector<160x10xf32>
    %1 = arith.truncf %0 : vector<160x10xf32> to vector<160x10xbf16>
    %c0_1 = arith.constant 0 : index
    %c0_2 = arith.constant 0 : index
    %2 = vector.load %arg2[%c0_1, %c0_2] : memref<10x32xbf16, #tpu.memory_space<vmem>>, vector<10x32xbf16>
    %cst = arith.constant dense<0.000000e+00> : vector<160x32xf32>
    %3 = tpu.matmul %1, %2, %cst {dimension_numbers = #tpu.dot_dimension_numbers<[1], [0], [0], [1], [0, 0, 1, 1], [], []>} : vector<160x10xbf16>, vector<10x32xbf16>, vector<160x32xf32> -> vector<160x32xf32>
    %c0_3 = arith.constant 0 : index
    %c0_4 = arith.constant 0 : index
    %4 = vector.load %arg3[%c0_3, %c0_4] : memref<1x32xf32, #tpu.memory_space<vmem>>, vector<1x32xf32>
    %5 = vector.broadcast %4 : vector<1x32xf32> to vector<160x32xf32>
    %6 = arith.addf %3, %5 : vector<160x32xf32>
    %c0_5 = arith.constant 0 : index
    %c0_6 = arith.constant 0 : index
    %7 = vector.load %arg4[%c0_5, %c0_6] : memref<160x32xf32, #tpu.memory_space<vmem>>, vector<160x32xf32>
    tpu.vector_store %arg4[%c0_5, %c0_6], %6 {strides = array<i32>} : memref<160x32xf32, #tpu.memory_space<vmem>>, vector<160x32xf32>,
    return
  }
  func.func @transform_0(%arg0: i32) -> (i32, i32) {
    %c0_i32 = arith.constant 0 : i32
    %c0_i32_0 = arith.constant 0 : i32
    return %arg0, %c0_i32 : i32, i32
  }
  func.func @transform_1(%arg0: i32) -> (i32, i32) {
    %c0_i32 = arith.constant 0 : i32
    %c0_i32_0 = arith.constant 0 : i32
    %c0_i32_1 = arith.constant 0 : i32
    return %c0_i32, %c0_i32_0 : i32, i32
  }
  func.func @transform_2(%arg0: i32) -> (i32, i32) {
    %c0_i32 = arith.constant 0 : i32
    %c0_i32_0 = arith.constant 0 : i32
    %c0_i32_1 = arith.constant 0 : i32
    return %c0_i32, %c0_i32_0 : i32, i32
  }
  func.func @transform_3(%arg0: i32) -> (i32, i32) {
    %c0_i32 = arith.constant 0 : i32
    %c0_i32_0 = arith.constant 0 : i32
    return %arg0, %c0_i32 : i32, i32
  }
}

module attributes {stable_mosaic.version = 11 : i64} {
  func.func @_rownorm_kernel(%arg0: i32, %arg1: memref<64x79xf32, #tpu.memory_space<vmem>>, %arg2: memref<64x1xf32, #tpu.memory_space<vmem>>, %arg3: memref<64x1xf32, #tpu.memory_space<vmem>>, %arg4: memref<64x79xf32, #tpu.memory_space<vmem>>) attributes {dimension_semantics = [#tpu.dimension_semantics<parallel>], iteration_bounds = array<i64: 1>, scalar_prefetch = 0 : i64, scratch_operands = 0 : i64, tpu.core_type = #tpu.core_type<tc>, window_params = [{transform_indices = @transform_0, window_bounds = array<i64: 64, 79>}, {transform_indices = @transform_1, window_bounds = array<i64: 64, 1>}, {transform_indices = @transform_2, window_bounds = array<i64: 64, 1>}, {transform_indices = @transform_3, window_bounds = array<i64: 64, 79>}]} {
    %c0 = arith.constant 0 : index
    %c0_0 = arith.constant 0 : index
    %0 = vector.load %arg1[%c0, %c0_0] : memref<64x79xf32, #tpu.memory_space<vmem>>, vector<64x79xf32>
    %cst = arith.constant dense<0.000000e+00> : vector<64xf32>
    %1 = vector.multi_reduction <add>, %0, %cst [1] : vector<64x79xf32> to vector<64xf32>
    %2 = vector.shape_cast %1 : vector<64xf32> to vector<64x1xf32>
    %cst_1 = arith.constant 7.900000e+01 : f32
    %3 = vector.broadcast %cst_1 : f32 to vector<64x1xf32>
    %4 = arith.divf %2, %3 : vector<64x1xf32>
    %5 = vector.broadcast %4 : vector<64x1xf32> to vector<64x79xf32>
    %6 = arith.subf %0, %5 : vector<64x79xf32>
    %7 = arith.mulf %6, %6 : vector<64x79xf32>
    %cst_2 = arith.constant dense<0.000000e+00> : vector<64xf32>
    %8 = vector.multi_reduction <add>, %7, %cst_2 [1] : vector<64x79xf32> to vector<64xf32>
    %9 = vector.shape_cast %8 : vector<64xf32> to vector<64x1xf32>
    %cst_3 = arith.constant 7.900000e+01 : f32
    %10 = vector.broadcast %cst_3 : f32 to vector<64x1xf32>
    %11 = arith.divf %9, %10 : vector<64x1xf32>
    %12 = vector.broadcast %4 : vector<64x1xf32> to vector<64x79xf32>
    %13 = arith.subf %0, %12 : vector<64x79xf32>
    %cst_4 = arith.constant 9.99999974E-6 : f32
    %14 = vector.broadcast %cst_4 : f32 to vector<64x1xf32>
    %15 = arith.addf %11, %14 : vector<64x1xf32>
    %16 = math.rsqrt %15 : vector<64x1xf32>
    %17 = vector.broadcast %16 : vector<64x1xf32> to vector<64x79xf32>
    %18 = arith.mulf %13, %17 : vector<64x79xf32>
    %c0_5 = arith.constant 0 : index
    %c0_6 = arith.constant 0 : index
    %19 = vector.load %arg2[%c0_5, %c0_6] : memref<64x1xf32, #tpu.memory_space<vmem>>, vector<64x1xf32>
    %20 = vector.broadcast %19 : vector<64x1xf32> to vector<64x79xf32>
    %21 = arith.mulf %18, %20 : vector<64x79xf32>
    %c0_7 = arith.constant 0 : index
    %c0_8 = arith.constant 0 : index
    %22 = vector.load %arg3[%c0_7, %c0_8] : memref<64x1xf32, #tpu.memory_space<vmem>>, vector<64x1xf32>
    %23 = vector.broadcast %22 : vector<64x1xf32> to vector<64x79xf32>
    %24 = arith.addf %21, %23 : vector<64x79xf32>
    %cst_9 = arith.constant 5.000000e-01 : f32
    %25 = vector.broadcast %cst_9 : f32 to vector<64x79xf32>
    %26 = arith.mulf %25, %24 : vector<64x79xf32>
    %cst_10 = arith.constant 1.41421354 : f32
    %27 = vector.broadcast %cst_10 : f32 to vector<64x79xf32>
    %28 = arith.divf %24, %27 : vector<64x79xf32>
    %29 = math.erf %28 : vector<64x79xf32>
    %cst_11 = arith.constant 1.000000e+00 : f32
    %30 = vector.broadcast %cst_11 : f32 to vector<64x79xf32>
    %31 = arith.addf %30, %29 : vector<64x79xf32>
    %32 = arith.mulf %26, %31 : vector<64x79xf32>
    %c0_12 = arith.constant 0 : index
    %c0_13 = arith.constant 0 : index
    %33 = vector.load %arg4[%c0_12, %c0_13] : memref<64x79xf32, #tpu.memory_space<vmem>>, vector<64x79xf32>
    tpu.vector_store %arg4[%c0_12, %c0_13], %32 {strides = array<i32>} : memref<64x79xf32, #tpu.memory_space<vmem>>, vector<64x79xf32>,
    return
  }
  func.func @transform_0(%arg0: i32) -> (i32, i32) {
    %c0_i32 = arith.constant 0 : i32
    %c0_i32_0 = arith.constant 0 : i32
    return %arg0, %c0_i32 : i32, i32
  }
  func.func @transform_1(%arg0: i32) -> (i32, i32) {
    %c0_i32 = arith.constant 0 : i32
    %c0_i32_0 = arith.constant 0 : i32
    return %arg0, %c0_i32 : i32, i32
  }
  func.func @transform_2(%arg0: i32) -> (i32, i32) {
    %c0_i32 = arith.constant 0 : i32
    %c0_i32_0 = arith.constant 0 : i32
    return %arg0, %c0_i32 : i32, i32
  }
  func.func @transform_3(%arg0: i32) -> (i32, i32) {
    %c0_i32 = arith.constant 0 : i32
    %c0_i32_0 = arith.constant 0 : i32
    return %arg0, %c0_i32 : i32, i32
  }
}

module attributes {stable_mosaic.version = 11 : i64} {
  func.func @_rownorm_kernel(%arg0: i32, %arg1: memref<80x32xf32, #tpu.memory_space<vmem>>, %arg2: memref<1x32xf32, #tpu.memory_space<vmem>>, %arg3: memref<1x32xf32, #tpu.memory_space<vmem>>, %arg4: memref<80x32xf32, #tpu.memory_space<vmem>>) attributes {dimension_semantics = [#tpu.dimension_semantics<parallel>], iteration_bounds = array<i64: 1>, scalar_prefetch = 0 : i64, scratch_operands = 0 : i64, tpu.core_type = #tpu.core_type<tc>, window_params = [{transform_indices = @transform_0, window_bounds = array<i64: 80, 32>}, {pipeline_mode = #tpu.pipeline_mode<synchronous>, transform_indices = @transform_1, window_bounds = array<i64: 1, 32>}, {pipeline_mode = #tpu.pipeline_mode<synchronous>, transform_indices = @transform_2, window_bounds = array<i64: 1, 32>}, {transform_indices = @transform_3, window_bounds = array<i64: 80, 32>}]} {
    %c0 = arith.constant 0 : index
    %c0_0 = arith.constant 0 : index
    %0 = vector.load %arg1[%c0, %c0_0] : memref<80x32xf32, #tpu.memory_space<vmem>>, vector<80x32xf32>
    %cst = arith.constant dense<0.000000e+00> : vector<80xf32>
    %1 = vector.multi_reduction <add>, %0, %cst [1] : vector<80x32xf32> to vector<80xf32>
    %2 = vector.shape_cast %1 : vector<80xf32> to vector<80x1xf32>
    %cst_1 = arith.constant 3.200000e+01 : f32
    %3 = vector.broadcast %cst_1 : f32 to vector<80x1xf32>
    %4 = arith.divf %2, %3 : vector<80x1xf32>
    %5 = vector.broadcast %4 : vector<80x1xf32> to vector<80x32xf32>
    %6 = arith.subf %0, %5 : vector<80x32xf32>
    %7 = arith.mulf %6, %6 : vector<80x32xf32>
    %cst_2 = arith.constant dense<0.000000e+00> : vector<80xf32>
    %8 = vector.multi_reduction <add>, %7, %cst_2 [1] : vector<80x32xf32> to vector<80xf32>
    %9 = vector.shape_cast %8 : vector<80xf32> to vector<80x1xf32>
    %cst_3 = arith.constant 3.200000e+01 : f32
    %10 = vector.broadcast %cst_3 : f32 to vector<80x1xf32>
    %11 = arith.divf %9, %10 : vector<80x1xf32>
    %12 = vector.broadcast %4 : vector<80x1xf32> to vector<80x32xf32>
    %13 = arith.subf %0, %12 : vector<80x32xf32>
    %cst_4 = arith.constant 9.99999974E-6 : f32
    %14 = vector.broadcast %cst_4 : f32 to vector<80x1xf32>
    %15 = arith.addf %11, %14 : vector<80x1xf32>
    %16 = math.rsqrt %15 : vector<80x1xf32>
    %17 = vector.broadcast %16 : vector<80x1xf32> to vector<80x32xf32>
    %18 = arith.mulf %13, %17 : vector<80x32xf32>
    %c0_5 = arith.constant 0 : index
    %c0_6 = arith.constant 0 : index
    %19 = vector.load %arg2[%c0_5, %c0_6] : memref<1x32xf32, #tpu.memory_space<vmem>>, vector<1x32xf32>
    %20 = vector.broadcast %19 : vector<1x32xf32> to vector<80x32xf32>
    %21 = arith.mulf %18, %20 : vector<80x32xf32>
    %c0_7 = arith.constant 0 : index
    %c0_8 = arith.constant 0 : index
    %22 = vector.load %arg3[%c0_7, %c0_8] : memref<1x32xf32, #tpu.memory_space<vmem>>, vector<1x32xf32>
    %23 = vector.broadcast %22 : vector<1x32xf32> to vector<80x32xf32>
    %24 = arith.addf %21, %23 : vector<80x32xf32>
    %c0_9 = arith.constant 0 : index
    %c0_10 = arith.constant 0 : index
    %25 = vector.load %arg4[%c0_9, %c0_10] : memref<80x32xf32, #tpu.memory_space<vmem>>, vector<80x32xf32>
    tpu.vector_store %arg4[%c0_9, %c0_10], %24 {strides = array<i32>} : memref<80x32xf32, #tpu.memory_space<vmem>>, vector<80x32xf32>,
    return
  }
  func.func @transform_0(%arg0: i32) -> (i32, i32) {
    %c0_i32 = arith.constant 0 : i32
    %c0_i32_0 = arith.constant 0 : i32
    return %arg0, %c0_i32 : i32, i32
  }
  func.func @transform_1(%arg0: i32) -> (i32, i32) {
    %c0_i32 = arith.constant 0 : i32
    %c0_i32_0 = arith.constant 0 : i32
    %c0_i32_1 = arith.constant 0 : i32
    return %c0_i32, %c0_i32_0 : i32, i32
  }
  func.func @transform_2(%arg0: i32) -> (i32, i32) {
    %c0_i32 = arith.constant 0 : i32
    %c0_i32_0 = arith.constant 0 : i32
    %c0_i32_1 = arith.constant 0 : i32
    return %c0_i32, %c0_i32_0 : i32, i32
  }
  func.func @transform_3(%arg0: i32) -> (i32, i32) {
    %c0_i32 = arith.constant 0 : i32
    %c0_i32_0 = arith.constant 0 : i32
    return %arg0, %c0_i32 : i32, i32
  }
}

module attributes {stable_mosaic.version = 11 : i64} {
  func.func @_matmul_kernel(%arg0: i32, %arg1: memref<80x128xf32, #tpu.memory_space<vmem>>, %arg2: memref<128x32xbf16, #tpu.memory_space<vmem>>, %arg3: memref<1x32xf32, #tpu.memory_space<vmem>>, %arg4: memref<80x32xf32, #tpu.memory_space<vmem>>) attributes {dimension_semantics = [#tpu.dimension_semantics<parallel>], iteration_bounds = array<i64: 1>, scalar_prefetch = 0 : i64, scratch_operands = 0 : i64, tpu.core_type = #tpu.core_type<tc>, window_params = [{transform_indices = @transform_0, window_bounds = array<i64: 80, 128>}, {pipeline_mode = #tpu.pipeline_mode<synchronous>, transform_indices = @transform_1, window_bounds = array<i64: 128, 32>}, {pipeline_mode = #tpu.pipeline_mode<synchronous>, transform_indices = @transform_2, window_bounds = array<i64: 1, 32>}, {transform_indices = @transform_3, window_bounds = array<i64: 80, 32>}]} {
    %c0 = arith.constant 0 : index
    %c0_0 = arith.constant 0 : index
    %0 = vector.load %arg1[%c0, %c0_0] : memref<80x128xf32, #tpu.memory_space<vmem>>, vector<80x128xf32>
    %1 = arith.truncf %0 : vector<80x128xf32> to vector<80x128xbf16>
    %c0_1 = arith.constant 0 : index
    %c0_2 = arith.constant 0 : index
    %2 = vector.load %arg2[%c0_1, %c0_2] : memref<128x32xbf16, #tpu.memory_space<vmem>>, vector<128x32xbf16>
    %cst = arith.constant dense<0.000000e+00> : vector<80x32xf32>
    %3 = tpu.matmul %1, %2, %cst {dimension_numbers = #tpu.dot_dimension_numbers<[1], [0], [0], [1], [0, 0, 1, 1], [], []>} : vector<80x128xbf16>, vector<128x32xbf16>, vector<80x32xf32> -> vector<80x32xf32>
    %c0_3 = arith.constant 0 : index
    %c0_4 = arith.constant 0 : index
    %4 = vector.load %arg3[%c0_3, %c0_4] : memref<1x32xf32, #tpu.memory_space<vmem>>, vector<1x32xf32>
    %5 = vector.broadcast %4 : vector<1x32xf32> to vector<80x32xf32>
    %6 = arith.addf %3, %5 : vector<80x32xf32>
    %cst_5 = arith.constant 5.000000e-01 : f32
    %7 = vector.broadcast %cst_5 : f32 to vector<80x32xf32>
    %8 = arith.mulf %7, %6 : vector<80x32xf32>
    %cst_6 = arith.constant 1.41421354 : f32
    %9 = vector.broadcast %cst_6 : f32 to vector<80x32xf32>
    %10 = arith.divf %6, %9 : vector<80x32xf32>
    %11 = math.erf %10 : vector<80x32xf32>
    %cst_7 = arith.constant 1.000000e+00 : f32
    %12 = vector.broadcast %cst_7 : f32 to vector<80x32xf32>
    %13 = arith.addf %12, %11 : vector<80x32xf32>
    %14 = arith.mulf %8, %13 : vector<80x32xf32>
    %c0_8 = arith.constant 0 : index
    %c0_9 = arith.constant 0 : index
    %15 = vector.load %arg4[%c0_8, %c0_9] : memref<80x32xf32, #tpu.memory_space<vmem>>, vector<80x32xf32>
    tpu.vector_store %arg4[%c0_8, %c0_9], %14 {strides = array<i32>} : memref<80x32xf32, #tpu.memory_space<vmem>>, vector<80x32xf32>,
    return
  }
  func.func @transform_0(%arg0: i32) -> (i32, i32) {
    %c0_i32 = arith.constant 0 : i32
    %c0_i32_0 = arith.constant 0 : i32
    return %arg0, %c0_i32 : i32, i32
  }
  func.func @transform_1(%arg0: i32) -> (i32, i32) {
    %c0_i32 = arith.constant 0 : i32
    %c0_i32_0 = arith.constant 0 : i32
    %c0_i32_1 = arith.constant 0 : i32
    return %c0_i32, %c0_i32_0 : i32, i32
  }
  func.func @transform_2(%arg0: i32) -> (i32, i32) {
    %c0_i32 = arith.constant 0 : i32
    %c0_i32_0 = arith.constant 0 : i32
    %c0_i32_1 = arith.constant 0 : i32
    return %c0_i32, %c0_i32_0 : i32, i32
  }
  func.func @transform_3(%arg0: i32) -> (i32, i32) {
    %c0_i32 = arith.constant 0 : i32
    %c0_i32_0 = arith.constant 0 : i32
    return %arg0, %c0_i32 : i32, i32
  }
}

module attributes {stable_mosaic.version = 11 : i64} {
  func.func @_matmul_kernel(%arg0: i32, %arg1: memref<80x32xf32, #tpu.memory_space<vmem>>, %arg2: memref<32x64xbf16, #tpu.memory_space<vmem>>, %arg3: memref<1x64xf32, #tpu.memory_space<vmem>>, %arg4: memref<80x64xf32, #tpu.memory_space<vmem>>) attributes {dimension_semantics = [#tpu.dimension_semantics<parallel>], iteration_bounds = array<i64: 1>, scalar_prefetch = 0 : i64, scratch_operands = 0 : i64, tpu.core_type = #tpu.core_type<tc>, window_params = [{transform_indices = @transform_0, window_bounds = array<i64: 80, 32>}, {pipeline_mode = #tpu.pipeline_mode<synchronous>, transform_indices = @transform_1, window_bounds = array<i64: 32, 64>}, {pipeline_mode = #tpu.pipeline_mode<synchronous>, transform_indices = @transform_2, window_bounds = array<i64: 1, 64>}, {transform_indices = @transform_3, window_bounds = array<i64: 80, 64>}]} {
    %c0 = arith.constant 0 : index
    %c0_0 = arith.constant 0 : index
    %0 = vector.load %arg1[%c0, %c0_0] : memref<80x32xf32, #tpu.memory_space<vmem>>, vector<80x32xf32>
    %1 = arith.truncf %0 : vector<80x32xf32> to vector<80x32xbf16>
    %c0_1 = arith.constant 0 : index
    %c0_2 = arith.constant 0 : index
    %2 = vector.load %arg2[%c0_1, %c0_2] : memref<32x64xbf16, #tpu.memory_space<vmem>>, vector<32x64xbf16>
    %cst = arith.constant dense<0.000000e+00> : vector<80x64xf32>
    %3 = tpu.matmul %1, %2, %cst {dimension_numbers = #tpu.dot_dimension_numbers<[1], [0], [0], [1], [0, 0, 1, 1], [], []>} : vector<80x32xbf16>, vector<32x64xbf16>, vector<80x64xf32> -> vector<80x64xf32>
    %c0_3 = arith.constant 0 : index
    %c0_4 = arith.constant 0 : index
    %4 = vector.load %arg3[%c0_3, %c0_4] : memref<1x64xf32, #tpu.memory_space<vmem>>, vector<1x64xf32>
    %5 = vector.broadcast %4 : vector<1x64xf32> to vector<80x64xf32>
    %6 = arith.addf %3, %5 : vector<80x64xf32>
    %c0_5 = arith.constant 0 : index
    %c0_6 = arith.constant 0 : index
    %7 = vector.load %arg4[%c0_5, %c0_6] : memref<80x64xf32, #tpu.memory_space<vmem>>, vector<80x64xf32>
    tpu.vector_store %arg4[%c0_5, %c0_6], %6 {strides = array<i32>} : memref<80x64xf32, #tpu.memory_space<vmem>>, vector<80x64xf32>,
    return
  }
  func.func @transform_0(%arg0: i32) -> (i32, i32) {
    %c0_i32 = arith.constant 0 : i32
    %c0_i32_0 = arith.constant 0 : i32
    return %arg0, %c0_i32 : i32, i32
  }
  func.func @transform_1(%arg0: i32) -> (i32, i32) {
    %c0_i32 = arith.constant 0 : i32
    %c0_i32_0 = arith.constant 0 : i32
    %c0_i32_1 = arith.constant 0 : i32
    return %c0_i32, %c0_i32_0 : i32, i32
  }
  func.func @transform_2(%arg0: i32) -> (i32, i32) {
    %c0_i32 = arith.constant 0 : i32
    %c0_i32_0 = arith.constant 0 : i32
    %c0_i32_1 = arith.constant 0 : i32
    return %c0_i32, %c0_i32_0 : i32, i32
  }
  func.func @transform_3(%arg0: i32) -> (i32, i32) {
    %c0_i32 = arith.constant 0 : i32
    %c0_i32_0 = arith.constant 0 : i32
    return %arg0, %c0_i32 : i32, i32
  }
}

module attributes {stable_mosaic.version = 11 : i64} {
  func.func @_posconv_kernel(%arg0: i32, %arg1: i32, %arg2: memref<1x1x47x16xbf16, #tpu.memory_space<vmem>>, %arg3: memref<1x8x16x16xbf16, #tpu.memory_space<vmem>>, %arg4: memref<1x1x16xf32, #tpu.memory_space<vmem>>, %arg5: memref<1x1x39x16xf32, #tpu.memory_space<vmem>>) attributes {dimension_semantics = [#tpu.dimension_semantics<parallel>, #tpu.dimension_semantics<parallel>], iteration_bounds = array<i64: 2, 4>, scalar_prefetch = 0 : i64, scratch_operands = 0 : i64, tpu.core_type = #tpu.core_type<tc>, window_params = [{transform_indices = @transform_0, window_bounds = array<i64: 1, 1, 47, 16>}, {transform_indices = @transform_1, window_bounds = array<i64: 1, 8, 16, 16>}, {transform_indices = @transform_2, window_bounds = array<i64: 1, 1, 16>}, {transform_indices = @transform_3, window_bounds = array<i64: 1, 1, 39, 16>}]} {
    %cst = arith.constant 0.000000e+00 : f32
    %0 = vector.broadcast %cst : f32 to vector<39x16xf32>
    %c0 = arith.constant 0 : index
    %c0_0 = arith.constant 0 : index
    %c0_1 = arith.constant 0 : index
    %c0_2 = arith.constant 0 : index
    %1 = vector.load %arg2[%c0, %c0_0, %c0_1, %c0_2] : memref<1x1x47x16xbf16, #tpu.memory_space<vmem>>, vector<1x1x39x16xbf16>
    %2 = vector.shape_cast %1 : vector<1x1x39x16xbf16> to vector<39x16xbf16>
    %c0_3 = arith.constant 0 : index
    %c0_4 = arith.constant 0 : index
    %c0_5 = arith.constant 0 : index
    %c0_6 = arith.constant 0 : index
    %3 = vector.load %arg3[%c0_3, %c0_4, %c0_5, %c0_6] : memref<1x8x16x16xbf16, #tpu.memory_space<vmem>>, vector<1x1x16x16xbf16>
    %4 = vector.shape_cast %3 : vector<1x1x16x16xbf16> to vector<16x16xbf16>
    %cst_7 = arith.constant dense<0.000000e+00> : vector<39x16xf32>
    %5 = tpu.matmul %2, %4, %cst_7 {dimension_numbers = #tpu.dot_dimension_numbers<[1], [0], [0], [1], [0, 0, 1, 1], [], []>} : vector<39x16xbf16>, vector<16x16xbf16>, vector<39x16xf32> -> vector<39x16xf32>
    %6 = arith.addf %0, %5 : vector<39x16xf32>
    %c0_8 = arith.constant 0 : index
    %c0_9 = arith.constant 0 : index
    %c1 = arith.constant 1 : index
    %c0_10 = arith.constant 0 : index
    %7 = vector.load %arg2[%c0_8, %c0_9, %c1, %c0_10] : memref<1x1x47x16xbf16, #tpu.memory_space<vmem>>, vector<1x1x39x16xbf16>
    %8 = vector.shape_cast %7 : vector<1x1x39x16xbf16> to vector<39x16xbf16>
    %c0_11 = arith.constant 0 : index
    %c1_12 = arith.constant 1 : index
    %c0_13 = arith.constant 0 : index
    %c0_14 = arith.constant 0 : index
    %9 = vector.load %arg3[%c0_11, %c1_12, %c0_13, %c0_14] : memref<1x8x16x16xbf16, #tpu.memory_space<vmem>>, vector<1x1x16x16xbf16>
    %10 = vector.shape_cast %9 : vector<1x1x16x16xbf16> to vector<16x16xbf16>
    %cst_15 = arith.constant dense<0.000000e+00> : vector<39x16xf32>
    %11 = tpu.matmul %8, %10, %cst_15 {dimension_numbers = #tpu.dot_dimension_numbers<[1], [0], [0], [1], [0, 0, 1, 1], [], []>} : vector<39x16xbf16>, vector<16x16xbf16>, vector<39x16xf32> -> vector<39x16xf32>
    %12 = arith.addf %6, %11 : vector<39x16xf32>
    %c0_16 = arith.constant 0 : index
    %c0_17 = arith.constant 0 : index
    %c2 = arith.constant 2 : index
    %c0_18 = arith.constant 0 : index
    %13 = vector.load %arg2[%c0_16, %c0_17, %c2, %c0_18] : memref<1x1x47x16xbf16, #tpu.memory_space<vmem>>, vector<1x1x39x16xbf16>
    %14 = vector.shape_cast %13 : vector<1x1x39x16xbf16> to vector<39x16xbf16>
    %c0_19 = arith.constant 0 : index
    %c2_20 = arith.constant 2 : index
    %c0_21 = arith.constant 0 : index
    %c0_22 = arith.constant 0 : index
    %15 = vector.load %arg3[%c0_19, %c2_20, %c0_21, %c0_22] : memref<1x8x16x16xbf16, #tpu.memory_space<vmem>>, vector<1x1x16x16xbf16>
    %16 = vector.shape_cast %15 : vector<1x1x16x16xbf16> to vector<16x16xbf16>
    %cst_23 = arith.constant dense<0.000000e+00> : vector<39x16xf32>
    %17 = tpu.matmul %14, %16, %cst_23 {dimension_numbers = #tpu.dot_dimension_numbers<[1], [0], [0], [1], [0, 0, 1, 1], [], []>} : vector<39x16xbf16>, vector<16x16xbf16>, vector<39x16xf32> -> vector<39x16xf32>
    %18 = arith.addf %12, %17 : vector<39x16xf32>
    %c0_24 = arith.constant 0 : index
    %c0_25 = arith.constant 0 : index
    %c3 = arith.constant 3 : index
    %c0_26 = arith.constant 0 : index
    %19 = vector.load %arg2[%c0_24, %c0_25, %c3, %c0_26] : memref<1x1x47x16xbf16, #tpu.memory_space<vmem>>, vector<1x1x39x16xbf16>
    %20 = vector.shape_cast %19 : vector<1x1x39x16xbf16> to vector<39x16xbf16>
    %c0_27 = arith.constant 0 : index
    %c3_28 = arith.constant 3 : index
    %c0_29 = arith.constant 0 : index
    %c0_30 = arith.constant 0 : index
    %21 = vector.load %arg3[%c0_27, %c3_28, %c0_29, %c0_30] : memref<1x8x16x16xbf16, #tpu.memory_space<vmem>>, vector<1x1x16x16xbf16>
    %22 = vector.shape_cast %21 : vector<1x1x16x16xbf16> to vector<16x16xbf16>
    %cst_31 = arith.constant dense<0.000000e+00> : vector<39x16xf32>
    %23 = tpu.matmul %20, %22, %cst_31 {dimension_numbers = #tpu.dot_dimension_numbers<[1], [0], [0], [1], [0, 0, 1, 1], [], []>} : vector<39x16xbf16>, vector<16x16xbf16>, vector<39x16xf32> -> vector<39x16xf32>
    %24 = arith.addf %18, %23 : vector<39x16xf32>
    %c0_32 = arith.constant 0 : index
    %c0_33 = arith.constant 0 : index
    %c4 = arith.constant 4 : index
    %c0_34 = arith.constant 0 : index
    %25 = vector.load %arg2[%c0_32, %c0_33, %c4, %c0_34] : memref<1x1x47x16xbf16, #tpu.memory_space<vmem>>, vector<1x1x39x16xbf16>
    %26 = vector.shape_cast %25 : vector<1x1x39x16xbf16> to vector<39x16xbf16>
    %c0_35 = arith.constant 0 : index
    %c4_36 = arith.constant 4 : index
    %c0_37 = arith.constant 0 : index
    %c0_38 = arith.constant 0 : index
    %27 = vector.load %arg3[%c0_35, %c4_36, %c0_37, %c0_38] : memref<1x8x16x16xbf16, #tpu.memory_space<vmem>>, vector<1x1x16x16xbf16>
    %28 = vector.shape_cast %27 : vector<1x1x16x16xbf16> to vector<16x16xbf16>
    %cst_39 = arith.constant dense<0.000000e+00> : vector<39x16xf32>
    %29 = tpu.matmul %26, %28, %cst_39 {dimension_numbers = #tpu.dot_dimension_numbers<[1], [0], [0], [1], [0, 0, 1, 1], [], []>} : vector<39x16xbf16>, vector<16x16xbf16>, vector<39x16xf32> -> vector<39x16xf32>
    %30 = arith.addf %24, %29 : vector<39x16xf32>
    %c0_40 = arith.constant 0 : index
    %c0_41 = arith.constant 0 : index
    %c5 = arith.constant 5 : index
    %c0_42 = arith.constant 0 : index
    %31 = vector.load %arg2[%c0_40, %c0_41, %c5, %c0_42] : memref<1x1x47x16xbf16, #tpu.memory_space<vmem>>, vector<1x1x39x16xbf16>
    %32 = vector.shape_cast %31 : vector<1x1x39x16xbf16> to vector<39x16xbf16>
    %c0_43 = arith.constant 0 : index
    %c5_44 = arith.constant 5 : index
    %c0_45 = arith.constant 0 : index
    %c0_46 = arith.constant 0 : index
    %33 = vector.load %arg3[%c0_43, %c5_44, %c0_45, %c0_46] : memref<1x8x16x16xbf16, #tpu.memory_space<vmem>>, vector<1x1x16x16xbf16>
    %34 = vector.shape_cast %33 : vector<1x1x16x16xbf16> to vector<16x16xbf16>
    %cst_47 = arith.constant dense<0.000000e+00> : vector<39x16xf32>
    %35 = tpu.matmul %32, %34, %cst_47 {dimension_numbers = #tpu.dot_dimension_numbers<[1], [0], [0], [1], [0, 0, 1, 1], [], []>} : vector<39x16xbf16>, vector<16x16xbf16>, vector<39x16xf32> -> vector<39x16xf32>
    %36 = arith.addf %30, %35 : vector<39x16xf32>
    %c0_48 = arith.constant 0 : index
    %c0_49 = arith.constant 0 : index
    %c6 = arith.constant 6 : index
    %c0_50 = arith.constant 0 : index
    %37 = vector.load %arg2[%c0_48, %c0_49, %c6, %c0_50] : memref<1x1x47x16xbf16, #tpu.memory_space<vmem>>, vector<1x1x39x16xbf16>
    %38 = vector.shape_cast %37 : vector<1x1x39x16xbf16> to vector<39x16xbf16>
    %c0_51 = arith.constant 0 : index
    %c6_52 = arith.constant 6 : index
    %c0_53 = arith.constant 0 : index
    %c0_54 = arith.constant 0 : index
    %39 = vector.load %arg3[%c0_51, %c6_52, %c0_53, %c0_54] : memref<1x8x16x16xbf16, #tpu.memory_space<vmem>>, vector<1x1x16x16xbf16>
    %40 = vector.shape_cast %39 : vector<1x1x16x16xbf16> to vector<16x16xbf16>
    %cst_55 = arith.constant dense<0.000000e+00> : vector<39x16xf32>
    %41 = tpu.matmul %38, %40, %cst_55 {dimension_numbers = #tpu.dot_dimension_numbers<[1], [0], [0], [1], [0, 0, 1, 1], [], []>} : vector<39x16xbf16>, vector<16x16xbf16>, vector<39x16xf32> -> vector<39x16xf32>
    %42 = arith.addf %36, %41 : vector<39x16xf32>
    %c0_56 = arith.constant 0 : index
    %c0_57 = arith.constant 0 : index
    %c7 = arith.constant 7 : index
    %c0_58 = arith.constant 0 : index
    %43 = vector.load %arg2[%c0_56, %c0_57, %c7, %c0_58] : memref<1x1x47x16xbf16, #tpu.memory_space<vmem>>, vector<1x1x39x16xbf16>
    %44 = vector.shape_cast %43 : vector<1x1x39x16xbf16> to vector<39x16xbf16>
    %c0_59 = arith.constant 0 : index
    %c7_60 = arith.constant 7 : index
    %c0_61 = arith.constant 0 : index
    %c0_62 = arith.constant 0 : index
    %45 = vector.load %arg3[%c0_59, %c7_60, %c0_61, %c0_62] : memref<1x8x16x16xbf16, #tpu.memory_space<vmem>>, vector<1x1x16x16xbf16>
    %46 = vector.shape_cast %45 : vector<1x1x16x16xbf16> to vector<16x16xbf16>
    %cst_63 = arith.constant dense<0.000000e+00> : vector<39x16xf32>
    %47 = tpu.matmul %44, %46, %cst_63 {dimension_numbers = #tpu.dot_dimension_numbers<[1], [0], [0], [1], [0, 0, 1, 1], [], []>} : vector<39x16xbf16>, vector<16x16xbf16>, vector<39x16xf32> -> vector<39x16xf32>
    %48 = arith.addf %42, %47 : vector<39x16xf32>
    %c0_64 = arith.constant 0 : index
    %c0_65 = arith.constant 0 : index
    %c0_66 = arith.constant 0 : index
    %49 = vector.load %arg4[%c0_64, %c0_65, %c0_66] : memref<1x1x16xf32, #tpu.memory_space<vmem>>, vector<1x1x16xf32>
    %50 = vector.shape_cast %49 : vector<1x1x16xf32> to vector<1x16xf32>
    %51 = vector.broadcast %50 : vector<1x16xf32> to vector<39x16xf32>
    %52 = arith.addf %48, %51 : vector<39x16xf32>
    %cst_67 = arith.constant 5.000000e-01 : f32
    %53 = vector.broadcast %cst_67 : f32 to vector<39x16xf32>
    %54 = arith.mulf %53, %52 : vector<39x16xf32>
    %cst_68 = arith.constant 1.41421354 : f32
    %55 = vector.broadcast %cst_68 : f32 to vector<39x16xf32>
    %56 = arith.divf %52, %55 : vector<39x16xf32>
    %57 = math.erf %56 : vector<39x16xf32>
    %cst_69 = arith.constant 1.000000e+00 : f32
    %58 = vector.broadcast %cst_69 : f32 to vector<39x16xf32>
    %59 = arith.addf %58, %57 : vector<39x16xf32>
    %60 = arith.mulf %54, %59 : vector<39x16xf32>
    %c0_70 = arith.constant 0 : index
    %c0_71 = arith.constant 0 : index
    %c0_72 = arith.constant 0 : index
    %c0_73 = arith.constant 0 : index
    %61 = vector.load %arg5[%c0_70, %c0_71, %c0_72, %c0_73] : memref<1x1x39x16xf32, #tpu.memory_space<vmem>>, vector<1x1x39x16xf32>
    %62 = vector.shape_cast %61 : vector<1x1x39x16xf32> to vector<39x16xf32>
    %63 = vector.shape_cast %60 : vector<39x16xf32> to vector<1x1x39x16xf32>
    tpu.vector_store %arg5[%c0_70, %c0_71, %c0_72, %c0_73], %63 {strides = array<i32>} : memref<1x1x39x16xf32, #tpu.memory_space<vmem>>, vector<1x1x39x16xf32>,
    return
  }
  func.func @transform_0(%arg0: i32, %arg1: i32) -> (i32, i32, i32, i32) {
    %c0_i32 = arith.constant 0 : i32
    %c0_i32_0 = arith.constant 0 : i32
    %c0_i32_1 = arith.constant 0 : i32
    return %arg0, %arg1, %c0_i32, %c0_i32_0 : i32, i32, i32, i32
  }
  func.func @transform_1(%arg0: i32, %arg1: i32) -> (i32, i32, i32, i32) {
    %c0_i32 = arith.constant 0 : i32
    %c0_i32_0 = arith.constant 0 : i32
    %c0_i32_1 = arith.constant 0 : i32
    %c0_i32_2 = arith.constant 0 : i32
    return %arg1, %c0_i32, %c0_i32_0, %c0_i32_1 : i32, i32, i32, i32
  }
  func.func @transform_2(%arg0: i32, %arg1: i32) -> (i32, i32, i32) {
    %c0_i32 = arith.constant 0 : i32
    %c0_i32_0 = arith.constant 0 : i32
    %c0_i32_1 = arith.constant 0 : i32
    return %arg1, %c0_i32, %c0_i32_0 : i32, i32, i32
  }
  func.func @transform_3(%arg0: i32, %arg1: i32) -> (i32, i32, i32, i32) {
    %c0_i32 = arith.constant 0 : i32
    %c0_i32_0 = arith.constant 0 : i32
    %c0_i32_1 = arith.constant 0 : i32
    return %arg0, %arg1, %c0_i32, %c0_i32_0 : i32, i32, i32, i32
  }
}

module attributes {stable_mosaic.version = 11 : i64} {
  func.func @_matmul_kernel(%arg0: i32, %arg1: memref<80x64xf32, #tpu.memory_space<vmem>>, %arg2: memref<64x192xbf16, #tpu.memory_space<vmem>>, %arg3: memref<1x192xf32, #tpu.memory_space<vmem>>, %arg4: memref<80x192xf32, #tpu.memory_space<vmem>>) attributes {dimension_semantics = [#tpu.dimension_semantics<parallel>], iteration_bounds = array<i64: 1>, scalar_prefetch = 0 : i64, scratch_operands = 0 : i64, tpu.core_type = #tpu.core_type<tc>, window_params = [{transform_indices = @transform_0, window_bounds = array<i64: 80, 64>}, {pipeline_mode = #tpu.pipeline_mode<synchronous>, transform_indices = @transform_1, window_bounds = array<i64: 64, 192>}, {pipeline_mode = #tpu.pipeline_mode<synchronous>, transform_indices = @transform_2, window_bounds = array<i64: 1, 192>}, {transform_indices = @transform_3, window_bounds = array<i64: 80, 192>}]} {
    %c0 = arith.constant 0 : index
    %c0_0 = arith.constant 0 : index
    %0 = vector.load %arg1[%c0, %c0_0] : memref<80x64xf32, #tpu.memory_space<vmem>>, vector<80x64xf32>
    %1 = arith.truncf %0 : vector<80x64xf32> to vector<80x64xbf16>
    %c0_1 = arith.constant 0 : index
    %c0_2 = arith.constant 0 : index
    %2 = vector.load %arg2[%c0_1, %c0_2] : memref<64x192xbf16, #tpu.memory_space<vmem>>, vector<64x192xbf16>
    %cst = arith.constant dense<0.000000e+00> : vector<80x192xf32>
    %3 = tpu.matmul %1, %2, %cst {dimension_numbers = #tpu.dot_dimension_numbers<[1], [0], [0], [1], [0, 0, 1, 1], [], []>} : vector<80x64xbf16>, vector<64x192xbf16>, vector<80x192xf32> -> vector<80x192xf32>
    %c0_3 = arith.constant 0 : index
    %c0_4 = arith.constant 0 : index
    %4 = vector.load %arg3[%c0_3, %c0_4] : memref<1x192xf32, #tpu.memory_space<vmem>>, vector<1x192xf32>
    %5 = vector.broadcast %4 : vector<1x192xf32> to vector<80x192xf32>
    %6 = arith.addf %3, %5 : vector<80x192xf32>
    %c0_5 = arith.constant 0 : index
    %c0_6 = arith.constant 0 : index
    %7 = vector.load %arg4[%c0_5, %c0_6] : memref<80x192xf32, #tpu.memory_space<vmem>>, vector<80x192xf32>
    tpu.vector_store %arg4[%c0_5, %c0_6], %6 {strides = array<i32>} : memref<80x192xf32, #tpu.memory_space<vmem>>, vector<80x192xf32>,
    return
  }
  func.func @transform_0(%arg0: i32) -> (i32, i32) {
    %c0_i32 = arith.constant 0 : i32
    %c0_i32_0 = arith.constant 0 : i32
    return %arg0, %c0_i32 : i32, i32
  }
  func.func @transform_1(%arg0: i32) -> (i32, i32) {
    %c0_i32 = arith.constant 0 : i32
    %c0_i32_0 = arith.constant 0 : i32
    %c0_i32_1 = arith.constant 0 : i32
    return %c0_i32, %c0_i32_0 : i32, i32
  }
  func.func @transform_2(%arg0: i32) -> (i32, i32) {
    %c0_i32 = arith.constant 0 : i32
    %c0_i32_0 = arith.constant 0 : i32
    %c0_i32_1 = arith.constant 0 : i32
    return %c0_i32, %c0_i32_0 : i32, i32
  }
  func.func @transform_3(%arg0: i32) -> (i32, i32) {
    %c0_i32 = arith.constant 0 : i32
    %c0_i32_0 = arith.constant 0 : i32
    return %arg0, %c0_i32 : i32, i32
  }
}

module attributes {stable_mosaic.version = 11 : i64} {
  func.func @_rownorm_kernel(%arg0: i32, %arg1: memref<80x64xf32, #tpu.memory_space<vmem>>, %arg2: memref<80x64xf32, #tpu.memory_space<vmem>>, %arg3: memref<1x64xf32, #tpu.memory_space<vmem>>, %arg4: memref<1x64xf32, #tpu.memory_space<vmem>>, %arg5: memref<80x64xf32, #tpu.memory_space<vmem>>) attributes {dimension_semantics = [#tpu.dimension_semantics<parallel>], iteration_bounds = array<i64: 1>, scalar_prefetch = 0 : i64, scratch_operands = 0 : i64, tpu.core_type = #tpu.core_type<tc>, window_params = [{transform_indices = @transform_0, window_bounds = array<i64: 80, 64>}, {transform_indices = @transform_1, window_bounds = array<i64: 80, 64>}, {pipeline_mode = #tpu.pipeline_mode<synchronous>, transform_indices = @transform_2, window_bounds = array<i64: 1, 64>}, {pipeline_mode = #tpu.pipeline_mode<synchronous>, transform_indices = @transform_3, window_bounds = array<i64: 1, 64>}, {transform_indices = @transform_4, window_bounds = array<i64: 80, 64>}]} {
    %c0 = arith.constant 0 : index
    %c0_0 = arith.constant 0 : index
    %0 = vector.load %arg1[%c0, %c0_0] : memref<80x64xf32, #tpu.memory_space<vmem>>, vector<80x64xf32>
    %c0_1 = arith.constant 0 : index
    %c0_2 = arith.constant 0 : index
    %1 = vector.load %arg2[%c0_1, %c0_2] : memref<80x64xf32, #tpu.memory_space<vmem>>, vector<80x64xf32>
    %2 = arith.addf %0, %1 : vector<80x64xf32>
    %cst = arith.constant dense<0.000000e+00> : vector<80xf32>
    %3 = vector.multi_reduction <add>, %2, %cst [1] : vector<80x64xf32> to vector<80xf32>
    %4 = vector.shape_cast %3 : vector<80xf32> to vector<80x1xf32>
    %cst_3 = arith.constant 6.400000e+01 : f32
    %5 = vector.broadcast %cst_3 : f32 to vector<80x1xf32>
    %6 = arith.divf %4, %5 : vector<80x1xf32>
    %7 = vector.broadcast %6 : vector<80x1xf32> to vector<80x64xf32>
    %8 = arith.subf %2, %7 : vector<80x64xf32>
    %9 = arith.mulf %8, %8 : vector<80x64xf32>
    %cst_4 = arith.constant dense<0.000000e+00> : vector<80xf32>
    %10 = vector.multi_reduction <add>, %9, %cst_4 [1] : vector<80x64xf32> to vector<80xf32>
    %11 = vector.shape_cast %10 : vector<80xf32> to vector<80x1xf32>
    %cst_5 = arith.constant 6.400000e+01 : f32
    %12 = vector.broadcast %cst_5 : f32 to vector<80x1xf32>
    %13 = arith.divf %11, %12 : vector<80x1xf32>
    %14 = vector.broadcast %6 : vector<80x1xf32> to vector<80x64xf32>
    %15 = arith.subf %2, %14 : vector<80x64xf32>
    %cst_6 = arith.constant 9.99999974E-6 : f32
    %16 = vector.broadcast %cst_6 : f32 to vector<80x1xf32>
    %17 = arith.addf %13, %16 : vector<80x1xf32>
    %18 = math.rsqrt %17 : vector<80x1xf32>
    %19 = vector.broadcast %18 : vector<80x1xf32> to vector<80x64xf32>
    %20 = arith.mulf %15, %19 : vector<80x64xf32>
    %c0_7 = arith.constant 0 : index
    %c0_8 = arith.constant 0 : index
    %21 = vector.load %arg3[%c0_7, %c0_8] : memref<1x64xf32, #tpu.memory_space<vmem>>, vector<1x64xf32>
    %22 = vector.broadcast %21 : vector<1x64xf32> to vector<80x64xf32>
    %23 = arith.mulf %20, %22 : vector<80x64xf32>
    %c0_9 = arith.constant 0 : index
    %c0_10 = arith.constant 0 : index
    %24 = vector.load %arg4[%c0_9, %c0_10] : memref<1x64xf32, #tpu.memory_space<vmem>>, vector<1x64xf32>
    %25 = vector.broadcast %24 : vector<1x64xf32> to vector<80x64xf32>
    %26 = arith.addf %23, %25 : vector<80x64xf32>
    %c0_11 = arith.constant 0 : index
    %c0_12 = arith.constant 0 : index
    %27 = vector.load %arg5[%c0_11, %c0_12] : memref<80x64xf32, #tpu.memory_space<vmem>>, vector<80x64xf32>
    tpu.vector_store %arg5[%c0_11, %c0_12], %26 {strides = array<i32>} : memref<80x64xf32, #tpu.memory_space<vmem>>, vector<80x64xf32>,
    return
  }
  func.func @transform_0(%arg0: i32) -> (i32, i32) {
    %c0_i32 = arith.constant 0 : i32
    %c0_i32_0 = arith.constant 0 : i32
    return %arg0, %c0_i32 : i32, i32
  }
  func.func @transform_1(%arg0: i32) -> (i32, i32) {
    %c0_i32 = arith.constant 0 : i32
    %c0_i32_0 = arith.constant 0 : i32
    return %arg0, %c0_i32 : i32, i32
  }
  func.func @transform_2(%arg0: i32) -> (i32, i32) {
    %c0_i32 = arith.constant 0 : i32
    %c0_i32_0 = arith.constant 0 : i32
    %c0_i32_1 = arith.constant 0 : i32
    return %c0_i32, %c0_i32_0 : i32, i32
  }
  func.func @transform_3(%arg0: i32) -> (i32, i32) {
    %c0_i32 = arith.constant 0 : i32
    %c0_i32_0 = arith.constant 0 : i32
    %c0_i32_1 = arith.constant 0 : i32
    return %c0_i32, %c0_i32_0 : i32, i32
  }
  func.func @transform_4(%arg0: i32) -> (i32, i32) {
    %c0_i32 = arith.constant 0 : i32
    %c0_i32_0 = arith.constant 0 : i32
    return %arg0, %c0_i32 : i32, i32
  }
}

module attributes {stable_mosaic.version = 11 : i64} {
  func.func @_attn_kernel(%arg0: i32, %arg1: memref<1x39x192xf32, #tpu.memory_space<vmem>>, %arg2: memref<1x39x64xf32, #tpu.memory_space<vmem>>) attributes {dimension_semantics = [#tpu.dimension_semantics<parallel>], iteration_bounds = array<i64: 2>, scalar_prefetch = 0 : i64, scratch_operands = 0 : i64, tpu.core_type = #tpu.core_type<tc>, window_params = [{transform_indices = @transform_0, window_bounds = array<i64: 1, 39, 192>}, {transform_indices = @transform_1, window_bounds = array<i64: 1, 39, 64>}]} {
    %c0 = arith.constant 0 : index
    %c0_0 = arith.constant 0 : index
    %c0_1 = arith.constant 0 : index
    %0 = vector.load %arg1[%c0, %c0_0, %c0_1] : memref<1x39x192xf32, #tpu.memory_space<vmem>>, vector<1x39x192xf32>
    %1 = vector.shape_cast %0 : vector<1x39x192xf32> to vector<39x192xf32>
    %2 = vector.extract_strided_slice %1 {offsets = [0, 0], sizes = [39, 16], strides = [1, 1]} : vector<39x192xf32> to vector<39x16xf32>
    %3 = arith.truncf %2 : vector<39x16xf32> to vector<39x16xbf16>
    %4 = vector.extract_strided_slice %1 {offsets = [0, 64], sizes = [39, 16], strides = [1, 1]} : vector<39x192xf32> to vector<39x16xf32>
    %5 = arith.truncf %4 : vector<39x16xf32> to vector<39x16xbf16>
    %6 = vector.extract_strided_slice %1 {offsets = [0, 128], sizes = [39, 16], strides = [1, 1]} : vector<39x192xf32> to vector<39x16xf32>
    %7 = arith.truncf %6 : vector<39x16xf32> to vector<39x16xbf16>
    %cst = arith.constant dense<0.000000e+00> : vector<39x39xf32>
    %8 = tpu.matmul %3, %5, %cst {dimension_numbers = #tpu.dot_dimension_numbers<[1], [1], [0], [0], [0, 0, 1, 0], [], []>} : vector<39x16xbf16>, vector<39x16xbf16>, vector<39x39xf32> -> vector<39x39xf32>
    %cst_2 = arith.constant 2.500000e-01 : f32
    %9 = vector.broadcast %cst_2 : f32 to vector<39x39xf32>
    %10 = arith.mulf %8, %9 : vector<39x39xf32>
    %cst_3 = arith.constant dense<0xFF800000> : vector<39xf32>
    %11 = vector.multi_reduction <maximumf>, %10, %cst_3 [1] : vector<39x39xf32> to vector<39xf32>
    %12 = vector.shape_cast %11 : vector<39xf32> to vector<39x1xf32>
    %13 = vector.broadcast %12 : vector<39x1xf32> to vector<39x39xf32>
    %14 = arith.subf %10, %13 : vector<39x39xf32>
    %15 = math.exp %14 : vector<39x39xf32>
    %cst_4 = arith.constant dense<0.000000e+00> : vector<39xf32>
    %16 = vector.multi_reduction <add>, %15, %cst_4 [1] : vector<39x39xf32> to vector<39xf32>
    %17 = vector.shape_cast %16 : vector<39xf32> to vector<39x1xf32>
    %18 = vector.broadcast %17 : vector<39x1xf32> to vector<39x39xf32>
    %19 = arith.divf %15, %18 : vector<39x39xf32>
    %20 = arith.truncf %19 : vector<39x39xf32> to vector<39x39xbf16>
    %cst_5 = arith.constant dense<0.000000e+00> : vector<39x16xf32>
    %21 = tpu.matmul %20, %7, %cst_5 {dimension_numbers = #tpu.dot_dimension_numbers<[1], [0], [0], [1], [0, 0, 1, 1], [], []>} : vector<39x39xbf16>, vector<39x16xbf16>, vector<39x16xf32> -> vector<39x16xf32>
    %22 = vector.extract_strided_slice %1 {offsets = [0, 16], sizes = [39, 16], strides = [1, 1]} : vector<39x192xf32> to vector<39x16xf32>
    %23 = arith.truncf %22 : vector<39x16xf32> to vector<39x16xbf16>
    %24 = vector.extract_strided_slice %1 {offsets = [0, 80], sizes = [39, 16], strides = [1, 1]} : vector<39x192xf32> to vector<39x16xf32>
    %25 = arith.truncf %24 : vector<39x16xf32> to vector<39x16xbf16>
    %26 = vector.extract_strided_slice %1 {offsets = [0, 144], sizes = [39, 16], strides = [1, 1]} : vector<39x192xf32> to vector<39x16xf32>
    %27 = arith.truncf %26 : vector<39x16xf32> to vector<39x16xbf16>
    %cst_6 = arith.constant dense<0.000000e+00> : vector<39x39xf32>
    %28 = tpu.matmul %23, %25, %cst_6 {dimension_numbers = #tpu.dot_dimension_numbers<[1], [1], [0], [0], [0, 0, 1, 0], [], []>} : vector<39x16xbf16>, vector<39x16xbf16>, vector<39x39xf32> -> vector<39x39xf32>
    %cst_7 = arith.constant 2.500000e-01 : f32
    %29 = vector.broadcast %cst_7 : f32 to vector<39x39xf32>
    %30 = arith.mulf %28, %29 : vector<39x39xf32>
    %cst_8 = arith.constant dense<0xFF800000> : vector<39xf32>
    %31 = vector.multi_reduction <maximumf>, %30, %cst_8 [1] : vector<39x39xf32> to vector<39xf32>
    %32 = vector.shape_cast %31 : vector<39xf32> to vector<39x1xf32>
    %33 = vector.broadcast %32 : vector<39x1xf32> to vector<39x39xf32>
    %34 = arith.subf %30, %33 : vector<39x39xf32>
    %35 = math.exp %34 : vector<39x39xf32>
    %cst_9 = arith.constant dense<0.000000e+00> : vector<39xf32>
    %36 = vector.multi_reduction <add>, %35, %cst_9 [1] : vector<39x39xf32> to vector<39xf32>
    %37 = vector.shape_cast %36 : vector<39xf32> to vector<39x1xf32>
    %38 = vector.broadcast %37 : vector<39x1xf32> to vector<39x39xf32>
    %39 = arith.divf %35, %38 : vector<39x39xf32>
    %40 = arith.truncf %39 : vector<39x39xf32> to vector<39x39xbf16>
    %cst_10 = arith.constant dense<0.000000e+00> : vector<39x16xf32>
    %41 = tpu.matmul %40, %27, %cst_10 {dimension_numbers = #tpu.dot_dimension_numbers<[1], [0], [0], [1], [0, 0, 1, 1], [], []>} : vector<39x39xbf16>, vector<39x16xbf16>, vector<39x16xf32> -> vector<39x16xf32>
    %42 = vector.extract_strided_slice %1 {offsets = [0, 32], sizes = [39, 16], strides = [1, 1]} : vector<39x192xf32> to vector<39x16xf32>
    %43 = arith.truncf %42 : vector<39x16xf32> to vector<39x16xbf16>
    %44 = vector.extract_strided_slice %1 {offsets = [0, 96], sizes = [39, 16], strides = [1, 1]} : vector<39x192xf32> to vector<39x16xf32>
    %45 = arith.truncf %44 : vector<39x16xf32> to vector<39x16xbf16>
    %46 = vector.extract_strided_slice %1 {offsets = [0, 160], sizes = [39, 16], strides = [1, 1]} : vector<39x192xf32> to vector<39x16xf32>
    %47 = arith.truncf %46 : vector<39x16xf32> to vector<39x16xbf16>
    %cst_11 = arith.constant dense<0.000000e+00> : vector<39x39xf32>
    %48 = tpu.matmul %43, %45, %cst_11 {dimension_numbers = #tpu.dot_dimension_numbers<[1], [1], [0], [0], [0, 0, 1, 0], [], []>} : vector<39x16xbf16>, vector<39x16xbf16>, vector<39x39xf32> -> vector<39x39xf32>
    %cst_12 = arith.constant 2.500000e-01 : f32
    %49 = vector.broadcast %cst_12 : f32 to vector<39x39xf32>
    %50 = arith.mulf %48, %49 : vector<39x39xf32>
    %cst_13 = arith.constant dense<0xFF800000> : vector<39xf32>
    %51 = vector.multi_reduction <maximumf>, %50, %cst_13 [1] : vector<39x39xf32> to vector<39xf32>
    %52 = vector.shape_cast %51 : vector<39xf32> to vector<39x1xf32>
    %53 = vector.broadcast %52 : vector<39x1xf32> to vector<39x39xf32>
    %54 = arith.subf %50, %53 : vector<39x39xf32>
    %55 = math.exp %54 : vector<39x39xf32>
    %cst_14 = arith.constant dense<0.000000e+00> : vector<39xf32>
    %56 = vector.multi_reduction <add>, %55, %cst_14 [1] : vector<39x39xf32> to vector<39xf32>
    %57 = vector.shape_cast %56 : vector<39xf32> to vector<39x1xf32>
    %58 = vector.broadcast %57 : vector<39x1xf32> to vector<39x39xf32>
    %59 = arith.divf %55, %58 : vector<39x39xf32>
    %60 = arith.truncf %59 : vector<39x39xf32> to vector<39x39xbf16>
    %cst_15 = arith.constant dense<0.000000e+00> : vector<39x16xf32>
    %61 = tpu.matmul %60, %47, %cst_15 {dimension_numbers = #tpu.dot_dimension_numbers<[1], [0], [0], [1], [0, 0, 1, 1], [], []>} : vector<39x39xbf16>, vector<39x16xbf16>, vector<39x16xf32> -> vector<39x16xf32>
    %62 = vector.extract_strided_slice %1 {offsets = [0, 48], sizes = [39, 16], strides = [1, 1]} : vector<39x192xf32> to vector<39x16xf32>
    %63 = arith.truncf %62 : vector<39x16xf32> to vector<39x16xbf16>
    %64 = vector.extract_strided_slice %1 {offsets = [0, 112], sizes = [39, 16], strides = [1, 1]} : vector<39x192xf32> to vector<39x16xf32>
    %65 = arith.truncf %64 : vector<39x16xf32> to vector<39x16xbf16>
    %66 = vector.extract_strided_slice %1 {offsets = [0, 176], sizes = [39, 16], strides = [1, 1]} : vector<39x192xf32> to vector<39x16xf32>
    %67 = arith.truncf %66 : vector<39x16xf32> to vector<39x16xbf16>
    %cst_16 = arith.constant dense<0.000000e+00> : vector<39x39xf32>
    %68 = tpu.matmul %63, %65, %cst_16 {dimension_numbers = #tpu.dot_dimension_numbers<[1], [1], [0], [0], [0, 0, 1, 0], [], []>} : vector<39x16xbf16>, vector<39x16xbf16>, vector<39x39xf32> -> vector<39x39xf32>
    %cst_17 = arith.constant 2.500000e-01 : f32
    %69 = vector.broadcast %cst_17 : f32 to vector<39x39xf32>
    %70 = arith.mulf %68, %69 : vector<39x39xf32>
    %cst_18 = arith.constant dense<0xFF800000> : vector<39xf32>
    %71 = vector.multi_reduction <maximumf>, %70, %cst_18 [1] : vector<39x39xf32> to vector<39xf32>
    %72 = vector.shape_cast %71 : vector<39xf32> to vector<39x1xf32>
    %73 = vector.broadcast %72 : vector<39x1xf32> to vector<39x39xf32>
    %74 = arith.subf %70, %73 : vector<39x39xf32>
    %75 = math.exp %74 : vector<39x39xf32>
    %cst_19 = arith.constant dense<0.000000e+00> : vector<39xf32>
    %76 = vector.multi_reduction <add>, %75, %cst_19 [1] : vector<39x39xf32> to vector<39xf32>
    %77 = vector.shape_cast %76 : vector<39xf32> to vector<39x1xf32>
    %78 = vector.broadcast %77 : vector<39x1xf32> to vector<39x39xf32>
    %79 = arith.divf %75, %78 : vector<39x39xf32>
    %80 = arith.truncf %79 : vector<39x39xf32> to vector<39x39xbf16>
    %cst_20 = arith.constant dense<0.000000e+00> : vector<39x16xf32>
    %81 = tpu.matmul %80, %67, %cst_20 {dimension_numbers = #tpu.dot_dimension_numbers<[1], [0], [0], [1], [0, 0, 1, 1], [], []>} : vector<39x39xbf16>, vector<39x16xbf16>, vector<39x16xf32> -> vector<39x16xf32>
    %82 = tpu.concatenate %21, %41, %61, %81 in 1 : vector<39x16xf32>, vector<39x16xf32>, vector<39x16xf32>, vector<39x16xf32> -> vector<39x64xf32>
    %c0_21 = arith.constant 0 : index
    %c0_22 = arith.constant 0 : index
    %c0_23 = arith.constant 0 : index
    %83 = vector.load %arg2[%c0_21, %c0_22, %c0_23] : memref<1x39x64xf32, #tpu.memory_space<vmem>>, vector<1x39x64xf32>
    %84 = vector.shape_cast %83 : vector<1x39x64xf32> to vector<39x64xf32>
    %85 = vector.shape_cast %82 : vector<39x64xf32> to vector<1x39x64xf32>
    tpu.vector_store %arg2[%c0_21, %c0_22, %c0_23], %85 {strides = array<i32>} : memref<1x39x64xf32, #tpu.memory_space<vmem>>, vector<1x39x64xf32>,
    return
  }
  func.func @transform_0(%arg0: i32) -> (i32, i32, i32) {
    %c0_i32 = arith.constant 0 : i32
    %c0_i32_0 = arith.constant 0 : i32
    %c0_i32_1 = arith.constant 0 : i32
    return %arg0, %c0_i32, %c0_i32_0 : i32, i32, i32
  }
  func.func @transform_1(%arg0: i32) -> (i32, i32, i32) {
    %c0_i32 = arith.constant 0 : i32
    %c0_i32_0 = arith.constant 0 : i32
    %c0_i32_1 = arith.constant 0 : i32
    return %arg0, %c0_i32, %c0_i32_0 : i32, i32, i32
  }
}

module attributes {stable_mosaic.version = 11 : i64} {
  func.func @_matmul_kernel(%arg0: i32, %arg1: memref<80x64xf32, #tpu.memory_space<vmem>>, %arg2: memref<64x64xbf16, #tpu.memory_space<vmem>>, %arg3: memref<1x64xf32, #tpu.memory_space<vmem>>, %arg4: memref<80x64xf32, #tpu.memory_space<vmem>>) attributes {dimension_semantics = [#tpu.dimension_semantics<parallel>], iteration_bounds = array<i64: 1>, scalar_prefetch = 0 : i64, scratch_operands = 0 : i64, tpu.core_type = #tpu.core_type<tc>, window_params = [{transform_indices = @transform_0, window_bounds = array<i64: 80, 64>}, {pipeline_mode = #tpu.pipeline_mode<synchronous>, transform_indices = @transform_1, window_bounds = array<i64: 64, 64>}, {pipeline_mode = #tpu.pipeline_mode<synchronous>, transform_indices = @transform_2, window_bounds = array<i64: 1, 64>}, {transform_indices = @transform_3, window_bounds = array<i64: 80, 64>}]} {
    %c0 = arith.constant 0 : index
    %c0_0 = arith.constant 0 : index
    %0 = vector.load %arg1[%c0, %c0_0] : memref<80x64xf32, #tpu.memory_space<vmem>>, vector<80x64xf32>
    %1 = arith.truncf %0 : vector<80x64xf32> to vector<80x64xbf16>
    %c0_1 = arith.constant 0 : index
    %c0_2 = arith.constant 0 : index
    %2 = vector.load %arg2[%c0_1, %c0_2] : memref<64x64xbf16, #tpu.memory_space<vmem>>, vector<64x64xbf16>
    %cst = arith.constant dense<0.000000e+00> : vector<80x64xf32>
    %3 = tpu.matmul %1, %2, %cst {dimension_numbers = #tpu.dot_dimension_numbers<[1], [0], [0], [1], [0, 0, 1, 1], [], []>} : vector<80x64xbf16>, vector<64x64xbf16>, vector<80x64xf32> -> vector<80x64xf32>
    %c0_3 = arith.constant 0 : index
    %c0_4 = arith.constant 0 : index
    %4 = vector.load %arg3[%c0_3, %c0_4] : memref<1x64xf32, #tpu.memory_space<vmem>>, vector<1x64xf32>
    %5 = vector.broadcast %4 : vector<1x64xf32> to vector<80x64xf32>
    %6 = arith.addf %3, %5 : vector<80x64xf32>
    %c0_5 = arith.constant 0 : index
    %c0_6 = arith.constant 0 : index
    %7 = vector.load %arg4[%c0_5, %c0_6] : memref<80x64xf32, #tpu.memory_space<vmem>>, vector<80x64xf32>
    tpu.vector_store %arg4[%c0_5, %c0_6], %6 {strides = array<i32>} : memref<80x64xf32, #tpu.memory_space<vmem>>, vector<80x64xf32>,
    return
  }
  func.func @transform_0(%arg0: i32) -> (i32, i32) {
    %c0_i32 = arith.constant 0 : i32
    %c0_i32_0 = arith.constant 0 : i32
    return %arg0, %c0_i32 : i32, i32
  }
  func.func @transform_1(%arg0: i32) -> (i32, i32) {
    %c0_i32 = arith.constant 0 : i32
    %c0_i32_0 = arith.constant 0 : i32
    %c0_i32_1 = arith.constant 0 : i32
    return %c0_i32, %c0_i32_0 : i32, i32
  }
  func.func @transform_2(%arg0: i32) -> (i32, i32) {
    %c0_i32 = arith.constant 0 : i32
    %c0_i32_0 = arith.constant 0 : i32
    %c0_i32_1 = arith.constant 0 : i32
    return %c0_i32, %c0_i32_0 : i32, i32
  }
  func.func @transform_3(%arg0: i32) -> (i32, i32) {
    %c0_i32 = arith.constant 0 : i32
    %c0_i32_0 = arith.constant 0 : i32
    return %arg0, %c0_i32 : i32, i32
  }
}

module attributes {stable_mosaic.version = 11 : i64} {
  func.func @_matmul_kernel(%arg0: i32, %arg1: memref<80x64xf32, #tpu.memory_space<vmem>>, %arg2: memref<64x128xbf16, #tpu.memory_space<vmem>>, %arg3: memref<1x128xf32, #tpu.memory_space<vmem>>, %arg4: memref<80x128xf32, #tpu.memory_space<vmem>>) attributes {dimension_semantics = [#tpu.dimension_semantics<parallel>], iteration_bounds = array<i64: 1>, scalar_prefetch = 0 : i64, scratch_operands = 0 : i64, tpu.core_type = #tpu.core_type<tc>, window_params = [{transform_indices = @transform_0, window_bounds = array<i64: 80, 64>}, {pipeline_mode = #tpu.pipeline_mode<synchronous>, transform_indices = @transform_1, window_bounds = array<i64: 64, 128>}, {pipeline_mode = #tpu.pipeline_mode<synchronous>, transform_indices = @transform_2, window_bounds = array<i64: 1, 128>}, {transform_indices = @transform_3, window_bounds = array<i64: 80, 128>}]} {
    %c0 = arith.constant 0 : index
    %c0_0 = arith.constant 0 : index
    %0 = vector.load %arg1[%c0, %c0_0] : memref<80x64xf32, #tpu.memory_space<vmem>>, vector<80x64xf32>
    %1 = arith.truncf %0 : vector<80x64xf32> to vector<80x64xbf16>
    %c0_1 = arith.constant 0 : index
    %c0_2 = arith.constant 0 : index
    %2 = vector.load %arg2[%c0_1, %c0_2] : memref<64x128xbf16, #tpu.memory_space<vmem>>, vector<64x128xbf16>
    %cst = arith.constant dense<0.000000e+00> : vector<80x128xf32>
    %3 = tpu.matmul %1, %2, %cst {dimension_numbers = #tpu.dot_dimension_numbers<[1], [0], [0], [1], [0, 0, 1, 1], [], []>} : vector<80x64xbf16>, vector<64x128xbf16>, vector<80x128xf32> -> vector<80x128xf32>
    %c0_3 = arith.constant 0 : index
    %c0_4 = arith.constant 0 : index
    %4 = vector.load %arg3[%c0_3, %c0_4] : memref<1x128xf32, #tpu.memory_space<vmem>>, vector<1x128xf32>
    %5 = vector.broadcast %4 : vector<1x128xf32> to vector<80x128xf32>
    %6 = arith.addf %3, %5 : vector<80x128xf32>
    %cst_5 = arith.constant 5.000000e-01 : f32
    %7 = vector.broadcast %cst_5 : f32 to vector<80x128xf32>
    %8 = arith.mulf %7, %6 : vector<80x128xf32>
    %cst_6 = arith.constant 1.41421354 : f32
    %9 = vector.broadcast %cst_6 : f32 to vector<80x128xf32>
    %10 = arith.divf %6, %9 : vector<80x128xf32>
    %11 = math.erf %10 : vector<80x128xf32>
    %cst_7 = arith.constant 1.000000e+00 : f32
    %12 = vector.broadcast %cst_7 : f32 to vector<80x128xf32>
    %13 = arith.addf %12, %11 : vector<80x128xf32>
    %14 = arith.mulf %8, %13 : vector<80x128xf32>
    %c0_8 = arith.constant 0 : index
    %c0_9 = arith.constant 0 : index
    %15 = vector.load %arg4[%c0_8, %c0_9] : memref<80x128xf32, #tpu.memory_space<vmem>>, vector<80x128xf32>
    tpu.vector_store %arg4[%c0_8, %c0_9], %14 {strides = array<i32>} : memref<80x128xf32, #tpu.memory_space<vmem>>, vector<80x128xf32>,
    return
  }
  func.func @transform_0(%arg0: i32) -> (i32, i32) {
    %c0_i32 = arith.constant 0 : i32
    %c0_i32_0 = arith.constant 0 : i32
    return %arg0, %c0_i32 : i32, i32
  }
  func.func @transform_1(%arg0: i32) -> (i32, i32) {
    %c0_i32 = arith.constant 0 : i32
    %c0_i32_0 = arith.constant 0 : i32
    %c0_i32_1 = arith.constant 0 : i32
    return %c0_i32, %c0_i32_0 : i32, i32
  }
  func.func @transform_2(%arg0: i32) -> (i32, i32) {
    %c0_i32 = arith.constant 0 : i32
    %c0_i32_0 = arith.constant 0 : i32
    %c0_i32_1 = arith.constant 0 : i32
    return %c0_i32, %c0_i32_0 : i32, i32
  }
  func.func @transform_3(%arg0: i32) -> (i32, i32) {
    %c0_i32 = arith.constant 0 : i32
    %c0_i32_0 = arith.constant 0 : i32
    return %arg0, %c0_i32 : i32, i32
  }
}

module attributes {stable_mosaic.version = 11 : i64} {
  func.func @_matmul_kernel(%arg0: i32, %arg1: memref<80x64xf32, #tpu.memory_space<vmem>>, %arg2: memref<64x32xbf16, #tpu.memory_space<vmem>>, %arg3: memref<1x32xf32, #tpu.memory_space<vmem>>, %arg4: memref<80x32xf32, #tpu.memory_space<vmem>>) attributes {dimension_semantics = [#tpu.dimension_semantics<parallel>], iteration_bounds = array<i64: 1>, scalar_prefetch = 0 : i64, scratch_operands = 0 : i64, tpu.core_type = #tpu.core_type<tc>, window_params = [{transform_indices = @transform_0, window_bounds = array<i64: 80, 64>}, {pipeline_mode = #tpu.pipeline_mode<synchronous>, transform_indices = @transform_1, window_bounds = array<i64: 64, 32>}, {pipeline_mode = #tpu.pipeline_mode<synchronous>, transform_indices = @transform_2, window_bounds = array<i64: 1, 32>}, {transform_indices = @transform_3, window_bounds = array<i64: 80, 32>}]} {
    %c0 = arith.constant 0 : index
    %c0_0 = arith.constant 0 : index
    %0 = vector.load %arg1[%c0, %c0_0] : memref<80x64xf32, #tpu.memory_space<vmem>>, vector<80x64xf32>
    %1 = arith.truncf %0 : vector<80x64xf32> to vector<80x64xbf16>
    %c0_1 = arith.constant 0 : index
    %c0_2 = arith.constant 0 : index
    %2 = vector.load %arg2[%c0_1, %c0_2] : memref<64x32xbf16, #tpu.memory_space<vmem>>, vector<64x32xbf16>
    %cst = arith.constant dense<0.000000e+00> : vector<80x32xf32>
    %3 = tpu.matmul %1, %2, %cst {dimension_numbers = #tpu.dot_dimension_numbers<[1], [0], [0], [1], [0, 0, 1, 1], [], []>} : vector<80x64xbf16>, vector<64x32xbf16>, vector<80x32xf32> -> vector<80x32xf32>
    %c0_3 = arith.constant 0 : index
    %c0_4 = arith.constant 0 : index
    %4 = vector.load %arg3[%c0_3, %c0_4] : memref<1x32xf32, #tpu.memory_space<vmem>>, vector<1x32xf32>
    %5 = vector.broadcast %4 : vector<1x32xf32> to vector<80x32xf32>
    %6 = arith.addf %3, %5 : vector<80x32xf32>
    %c0_5 = arith.constant 0 : index
    %c0_6 = arith.constant 0 : index
    %7 = vector.load %arg4[%c0_5, %c0_6] : memref<80x32xf32, #tpu.memory_space<vmem>>, vector<80x32xf32>
    tpu.vector_store %arg4[%c0_5, %c0_6], %6 {strides = array<i32>} : memref<80x32xf32, #tpu.memory_space<vmem>>, vector<80x32xf32>,
    return
  }
  func.func @transform_0(%arg0: i32) -> (i32, i32) {
    %c0_i32 = arith.constant 0 : i32
    %c0_i32_0 = arith.constant 0 : i32
    return %arg0, %c0_i32 : i32, i32
  }
  func.func @transform_1(%arg0: i32) -> (i32, i32) {
    %c0_i32 = arith.constant 0 : i32
    %c0_i32_0 = arith.constant 0 : i32
    %c0_i32_1 = arith.constant 0 : i32
    return %c0_i32, %c0_i32_0 : i32, i32
  }
  func.func @transform_2(%arg0: i32) -> (i32, i32) {
    %c0_i32 = arith.constant 0 : i32
    %c0_i32_0 = arith.constant 0 : i32
    %c0_i32_1 = arith.constant 0 : i32
    return %c0_i32, %c0_i32_0 : i32, i32
  }
  func.func @transform_3(%arg0: i32) -> (i32, i32) {
    %c0_i32 = arith.constant 0 : i32
    %c0_i32_0 = arith.constant 0 : i32
    return %arg0, %c0_i32 : i32, i32
  }
}

module attributes {stable_mosaic.version = 11 : i64} {
  func.func @_matmul_kernel(%arg0: i32, %arg1: memref<80x128xf32, #tpu.memory_space<vmem>>, %arg2: memref<128x64xbf16, #tpu.memory_space<vmem>>, %arg3: memref<1x64xf32, #tpu.memory_space<vmem>>, %arg4: memref<80x64xf32, #tpu.memory_space<vmem>>) attributes {dimension_semantics = [#tpu.dimension_semantics<parallel>], iteration_bounds = array<i64: 1>, scalar_prefetch = 0 : i64, scratch_operands = 0 : i64, tpu.core_type = #tpu.core_type<tc>, window_params = [{transform_indices = @transform_0, window_bounds = array<i64: 80, 128>}, {pipeline_mode = #tpu.pipeline_mode<synchronous>, transform_indices = @transform_1, window_bounds = array<i64: 128, 64>}, {pipeline_mode = #tpu.pipeline_mode<synchronous>, transform_indices = @transform_2, window_bounds = array<i64: 1, 64>}, {transform_indices = @transform_3, window_bounds = array<i64: 80, 64>}]} {
    %c0 = arith.constant 0 : index
    %c0_0 = arith.constant 0 : index
    %0 = vector.load %arg1[%c0, %c0_0] : memref<80x128xf32, #tpu.memory_space<vmem>>, vector<80x128xf32>
    %1 = arith.truncf %0 : vector<80x128xf32> to vector<80x128xbf16>
    %c0_1 = arith.constant 0 : index
    %c0_2 = arith.constant 0 : index
    %2 = vector.load %arg2[%c0_1, %c0_2] : memref<128x64xbf16, #tpu.memory_space<vmem>>, vector<128x64xbf16>
    %cst = arith.constant dense<0.000000e+00> : vector<80x64xf32>
    %3 = tpu.matmul %1, %2, %cst {dimension_numbers = #tpu.dot_dimension_numbers<[1], [0], [0], [1], [0, 0, 1, 1], [], []>} : vector<80x128xbf16>, vector<128x64xbf16>, vector<80x64xf32> -> vector<80x64xf32>
    %c0_3 = arith.constant 0 : index
    %c0_4 = arith.constant 0 : index
    %4 = vector.load %arg3[%c0_3, %c0_4] : memref<1x64xf32, #tpu.memory_space<vmem>>, vector<1x64xf32>
    %5 = vector.broadcast %4 : vector<1x64xf32> to vector<80x64xf32>
    %6 = arith.addf %3, %5 : vector<80x64xf32>
    %c0_5 = arith.constant 0 : index
    %c0_6 = arith.constant 0 : index
    %7 = vector.load %arg4[%c0_5, %c0_6] : memref<80x64xf32, #tpu.memory_space<vmem>>, vector<80x64xf32>
    tpu.vector_store %arg4[%c0_5, %c0_6], %6 {strides = array<i32>} : memref<80x64xf32, #tpu.memory_space<vmem>>, vector<80x64xf32>,
    return
  }
  func.func @transform_0(%arg0: i32) -> (i32, i32) {
    %c0_i32 = arith.constant 0 : i32
    %c0_i32_0 = arith.constant 0 : i32
    return %arg0, %c0_i32 : i32, i32
  }
  func.func @transform_1(%arg0: i32) -> (i32, i32) {
    %c0_i32 = arith.constant 0 : i32
    %c0_i32_0 = arith.constant 0 : i32
    %c0_i32_1 = arith.constant 0 : i32
    return %c0_i32, %c0_i32_0 : i32, i32
  }
  func.func @transform_2(%arg0: i32) -> (i32, i32) {
    %c0_i32 = arith.constant 0 : i32
    %c0_i32_0 = arith.constant 0 : i32
    %c0_i32_1 = arith.constant 0 : i32
    return %c0_i32, %c0_i32_0 : i32, i32
  }
  func.func @transform_3(%arg0: i32) -> (i32, i32) {
    %c0_i32 = arith.constant 0 : i32
    %c0_i32_0 = arith.constant 0 : i32
    return %arg0, %c0_i32 : i32, i32
  }
}

</mosaic_0001>

<bundles_post_ra>
// kernel: tile.2
= control target key start
LH: loop header
LB: loop body
LE: loop exit
PB: predicated region body
PF: predicated region fallthrough
CT: control target
= control target key end

     0   :  { %s62_s0 = inlined_call_operand.<no memory space> [shape: f32[], index: 0, kind: input, shape index: {}]   ;;  %s63_s1 = inlined_call_operand.vmem [shape: f32[64,1], index: 1, kind: output, shape index: {}]  }
   0x1   :  { %v2_v0 = vstv %s62_s0 }
   0x2   :  { %3 = vst [vmem:[%s63_s1] sm:$0xff] %v2_v0  ;;  %18 = vst [vmem:[%s63_s1 + $0x8] sm:$0xff] %v2_v0 }
   0x3   :  { %19 = vst [vmem:[%s63_s1 + $0x10] sm:$0xff] %v2_v0  ;;  %20 = vst [vmem:[%s63_s1 + $0x18] sm:$0xff] %v2_v0 }
   0x4   :  { %21 = vst [vmem:[%s63_s1 + $0x20] sm:$0xff] %v2_v0  ;;  %22 = vst [vmem:[%s63_s1 + $0x28] sm:$0xff] %v2_v0 }
   0x5   :  { %23 = vst [vmem:[%s63_s1 + $0x30] sm:$0xff] %v2_v0  ;;  %24 = vst [vmem:[%s63_s1 + $0x38] sm:$0xff] %v2_v0 }

// kernel: wav2vec2_forward.24
= control target key start
LH: loop header
LB: loop body
LE: loop exit
PB: predicated region body
PF: predicated region fallthrough
CT: control target
= control target key end

     0   :  { %vm90_vm0 = vcmask 1044480   ;;  %vm59_vm1 = vcmask 80896   ;;  %vm207_vm2 = vcmask 261120   ;;  %s458_s1 = inlined_call_operand.vmem [shape: bf16[10,32], index: 1, kind: input, shape index: {}]   ;;  %s459_s0 = inlined_call_operand.vmem [shape: f32[158,10], index: 0, kind: input, shape index: {}]   ;;  %s460_s2 = inlined_call_operand.vmem [shape: f32[1,32], index: 2, kind: input, shape index: {}]   ;;  %s461_s3 = inlined_call_operand.vmem [shape: f32[158,32], index: 3, kind: output, shape index: {}]  }
   0x1   :  { %v281_v0 = vld [vmem:[%s458_s1] sm:$0x1f]   ;;  %v16_v2 = vld [vmem:[%s459_s0 + $0x8] sm:$0xff]  ;;  %v17_v3 = vld [vmem:[%s459_s0 + $0x10] sm:$0xff] }
   0x2   :  { %v15_v1 = vld [vmem:[%s459_s0] sm:$0xff]  ;;  %279 = vmatprep.subr.msk.bf16.mxu0 %vm90_vm0, %v281_v0  ;;  %v92_v4 = vsel %vm90_vm0, %v281_v0, 0  ;;  %v18_v6 = vld [vmem:[%s459_s0 + $0x18] sm:$0xff]  ;;  %280 = vmatprep.subr.msk.bf16.mxu1 %vm90_vm0, %v281_v0  ;;  %v28_v8 = vld [vmem:[%s459_s0 + $0x68] sm:$0xff] }
   0x3   :  { %v35_v5 = vpack.c.bf16 %v16_v2, %v15_v1  ;;  %v27_v7 = vld [vmem:[%s459_s0 + $0x60] sm:$0xff]  ;;  %256 = vmatpush3.bf16.msra.mxu0 %v92_v4  ;;  %v36_v9 = vpack.c.bf16 %v18_v6, %v17_v3  ;;  %278 = vmatpush3.bf16.msra.mxu1 %v92_v4  ;;  %v29_v11 = vld [vmem:[%s459_s0 + $0x70] sm:$0xff]  ;;  %v30_v12 = vld [vmem:[%s459_s0 + $0x78] sm:$0xff] }
   0x4   :  { %v41_v10 = vpack.c.bf16 %v28_v8, %v27_v7  ;;  %v19_v13 = vld [vmem:[%s459_s0 + $0x20] sm:$0xff]  ;;  %v42_v14 = vpack.c.bf16 %v30_v12, %v29_v11  ;;  %v20_v15 = vld [vmem:[%s459_s0 + $0x28] sm:$0xff]  ;;  %v21_v19 = vld [vmem:[%s459_s0 + $0x30] sm:$0xff] }
   0x5   :  { %257 = vmatprep.mubr.msk.bf16.mxu0 %vm59_vm1, %v35_v5  ;;  %v37_v16 = vpack.c.bf16 %v20_v15, %v19_v13  ;;  %v31_v17 = vld [vmem:[%s459_s0 + $0x80] sm:$0xff]  ;;  %v32_v18 = vld [vmem:[%s459_s0 + $0x88] sm:$0xff]  ;;  %v22_v21 = vld [vmem:[%s459_s0 + $0x38] sm:$0xff] }
   0x6   :  { %269 = vmatprep.mubr.msk.bf16.mxu1 %vm59_vm1, %v41_v10  ;;  %258 = vmatmul.mubr.msk.bf16.vlgmr.msra.gmra.mrb[0].mxu0 %vm59_vm1, %v36_v9  ;;  %v43_v20 = vpack.c.bf16 %v32_v18, %v31_v17  ;;  %v33_v22 = vld [vmem:[%s459_s0 + $0x90] sm:$0xff]  ;;  %v34_v23 = vld [vmem:[%s459_s0 + $0x98] sm:$0xff]  ;;  %v23_v24 = vld [vmem:[%s459_s0 + $0x40] sm:$0xff]  ;;  %v38_v26 = vpack.c.bf16 %v22_v21, %v21_v19 }
   0x7   :  { %270 = vmatmul.mubr.msk.bf16.vlgmr.msra.gmra.mrb[0].mxu1 %vm59_vm1, %v42_v14  ;;  %261 = vmatprep.mubr.msk.bf16.mxu0 %vm59_vm1, %v37_v16  ;;  %v24_v25 = vld [vmem:[%s459_s0 + $0x48] sm:$0xff]  ;;  %v44_v27 = vpack.c.bf16 %v34_v23, %v33_v22  ;;  %v25_v29 = vld [vmem:[%s459_s0 + $0x50] sm:$0xff]  ;;  %v26_v30 = vld [vmem:[%s459_s0 + $0x58] sm:$0xff] }
   0x8   :  { %273 = vmatprep.mubr.msk.bf16.mxu1 %vm59_vm1, %v43_v20  ;;  %v39_v28 = vpack.c.bf16 %v24_v25, %v23_v24  ;;  %v40_v31 = vpack.c.bf16 %v26_v30, %v25_v29  ;;  %v232_v32 = vld [vmem:[%s460_s2] ss:$0 sm:$0xff] }
   0xe   :  { %262 = vmatmul.mubr.msk.bf16.gmra.mrb[4].mxu0 %vm59_vm1, %v38_v26 }
   0xf   :  { %274 = vmatmul.mubr.msk.bf16.gmra.mrb[4].mxu1 %vm59_vm1, %v44_v27  ;;  %265 = vmatprep.mubr.msk.bf16.mxu0 %vm59_vm1, %v39_v28 }
  0x16   :  { %266 = vmatmul.mubr.msk.bf16.gmra.mrb[8].mxu0 %vm59_vm1, %v40_v31 }
  0xd9   :  { %v259_v33 = vpop.f32.mrb[0].mxu0 }
  0xda   :  { %v271_v34 = vpop.f32.mrb[0].mxu1  ;;  %v137_v35 = vadd.f32 %v259_v33, %v232_v32  ;;  %v128_v36 = vpop.f32.mrb[1].mxu0 }
  0xdb   :  { %v185_v37 = vadd.f32 %v271_v34, %v232_v32  ;;  %v176_v38 = vpop.f32.mrb[1].mxu1  ;;  %v129_v39 = vadd.f32 %v232_v32, %v128_v36  ;;  %v260_v40 = vpop.f32.mrb[2].mxu0 }
  0xdc   :  { %v177_v41 = vadd.f32 %v232_v32, %v176_v38  ;;  %v272_v42 = vpop.f32.mrb[2].mxu1  ;;  %210 = vst.msk [vmem:[%s461_s3 + $0x10] sm:$0xff] %vm207_vm2, %v137_v35  ;;  %v140_v43 = vadd.f32 %v260_v40, %v232_v32  ;;  %v131_v44 = vpop.f32.mrb[3].mxu0 }
  0xdd   :  { %222 = vst.msk [vmem:[%s461_s3 + $0x70] sm:$0xff] %vm207_vm2, %v185_v37  ;;  %v188_v45 = vadd.f32 %v272_v42, %v232_v32  ;;  %v179_v46 = vpop.f32.mrb[3].mxu1  ;;  %208 = vst.msk [vmem:[%s461_s3] sm:$0xff] %vm207_vm2, %v129_v39  ;;  %v132_v47 = vadd.f32 %v232_v32, %v131_v44 }
  0xde   :  { %220 = vst.msk [vmem:[%s461_s3 + $0x60] sm:$0xff] %vm207_vm2, %v177_v41  ;;  %v180_v48 = vadd.f32 %v232_v32, %v179_v46  ;;  %211 = vst.msk [vmem:[%s461_s3 + $0x18] sm:$0xff] %vm207_vm2, %v140_v43 }
  0xdf   :  { %223 = vst.msk [vmem:[%s461_s3 + $0x78] sm:$0xff] %vm207_vm2, %v188_v45  ;;  %209 = vst.msk [vmem:[%s461_s3 + $0x8] sm:$0xff] %vm207_vm2, %v132_v47 }
  0xe0   :  { %221 = vst.msk [vmem:[%s461_s3 + $0x68] sm:$0xff] %vm207_vm2, %v180_v48 }
  0xe1   :  { %v263_v49 = vpop.f32.mrb[4].mxu0 }
  0xe2   :  { %v275_v50 = vpop.f32.mrb[4].mxu1  ;;  %v153_v51 = vadd.f32 %v263_v49, %v232_v32  ;;  %v144_v52 = vpop.f32.mrb[5].mxu0 }
  0xe3   :  { %v201_v53 = vadd.f32 %v275_v50, %v232_v32  ;;  %v192_v54 = vpop.f32.mrb[5].mxu1  ;;  %v145_v55 = vadd.f32 %v232_v32, %v144_v52  ;;  %v264_v56 = vpop.f32.mrb[6].mxu0 }
  0xe4   :  { %v193_v57 = vadd.f32 %v232_v32, %v192_v54  ;;  %v276_v58 = vpop.f32.mrb[6].mxu1  ;;  %214 = vst.msk [vmem:[%s461_s3 + $0x30] sm:$0xff] %vm207_vm2, %v153_v51  ;;  %v156_v59 = vadd.f32 %v264_v56, %v232_v32  ;;  %v147_v60 = vpop.f32.mrb[7].mxu0 }
  0xe5   :  { %226 = vst.msk [vmem:[%s461_s3 + $0x90] sm:$0xff] %vm207_vm2, %v201_v53  ;;  %v204_v61 = vadd.f32 %v276_v58, %v232_v32  ;;  %v195_v62 = vpop.f32.mrb[7].mxu1  ;;  %212 = vst.msk [vmem:[%s461_s3 + $0x20] sm:$0xff] %vm207_vm2, %v145_v55  ;;  %v148_v63 = vadd.f32 %v232_v32, %v147_v60 }
  0xe6   :  { %224 = vst.msk [vmem:[%s461_s3 + $0x80] sm:$0xff] %vm207_vm2, %v193_v57  ;;  %v196_v0 = vadd.f32 %v232_v32, %v195_v62  ;;  %215 = vst.msk [vmem:[%s461_s3 + $0x38] sm:$0xff] %vm207_vm2, %v156_v59 }
  0xe7   :  { %227 = vst.msk [vmem:[%s461_s3 + $0x98] sm:$0xff] %vm207_vm2, %v204_v61  ;;  %213 = vst.msk [vmem:[%s461_s3 + $0x28] sm:$0xff] %vm207_vm2, %v148_v63 }
  0xe8   :  { %225 = vst.msk [vmem:[%s461_s3 + $0x88] sm:$0xff] %vm207_vm2, %v196_v0 }
  0xe9   :  { %v267_v1 = vpop.f32.mrb[8].mxu0 }
  0xea   :  { %v169_v2 = vadd.f32 %v267_v1, %v232_v32  ;;  %v160_v3 = vpop.f32.mrb[9].mxu0 }
  0xeb   :  { %v161_v4 = vadd.f32 %v232_v32, %v160_v3  ;;  %v268_v5 = vpop.f32.mrb[10].mxu0 }
  0xec   :  { %218 = vst.msk [vmem:[%s461_s3 + $0x50] sm:$0xff] %vm207_vm2, %v169_v2  ;;  %v172_v6 = vadd.f32 %v268_v5, %v232_v32  ;;  %v163_v7 = vpop.f32.mrb[11].mxu0 }
  0xed   :  { %216 = vst.msk [vmem:[%s461_s3 + $0x40] sm:$0xff] %vm207_vm2, %v161_v4  ;;  %v164_v8 = vadd.f32 %v232_v32, %v163_v7 }
  0xee   :  { %219 = vst.msk [vmem:[%s461_s3 + $0x58] sm:$0xff] %vm207_vm2, %v172_v6 }
  0xef   :  { %217 = vst.msk [vmem:[%s461_s3 + $0x48] sm:$0xff] %vm207_vm2, %v164_v8 }

// kernel: wav2vec2_forward.25
= control target key start
LH: loop header
LB: loop body
LE: loop exit
PB: predicated region body
PF: predicated region fallthrough
CT: control target
= control target key end

     0   :  { %vm22_vm0 = vcmask 646144   ;;  %v328_v3 = vmov 0   ;;  %s547_s0 = inlined_call_operand.vmem [shape: f32[64,79], index: 0, kind: input, shape index: {}]   ;;  %s548_s1 = inlined_call_operand.vmem [shape: f32[64,1], index: 1, kind: input, shape index: {}]   ;;  %s549_s2 = inlined_call_operand.vmem [shape: f32[64,1], index: 2, kind: input, shape index: {}]   ;;  %s550_s3 = inlined_call_operand.vmem [shape: f32[64,79], index: 3, kind: output, shape index: {}]  }
   0x1   :  { %v14_v0 = vld [vmem:[%s547_s0] sm:$0xff]  ;;  %v16_v1 = vld [vmem:[%s547_s0 + $0x10] sm:$0xff]  ;;  %v358_v2 = vld [vmem:[%s547_s0 + $0x8] sm:$0xff]  ;;  %295 = vset.pattern.permute.xlu1 %v328_v3  ;;  %294 = vset.pattern.permute.xlu0 %v328_v3 }
   0x2   :  { %v23_v4 = vsel %vm22_vm0, %v14_v0, 0.0  ;;  %v29_v5 = vsel %vm22_vm0, %v16_v1, 0.0  ;;  %v17_v6 = vld [vmem:[%s547_s0 + $0x18] sm:$0xff]  ;;  %v26_v7 = vsel %vm22_vm0, %v358_v2, 0.0  ;;  %v371_v9 = vld [vmem:[%s547_s0 + $0x20] sm:$0xff]  ;;  %v376_v10 = vld [vmem:[%s547_s0 + $0x28] sm:$0xff] }
   0x3   :  { %24 = vadd.xlane.f32.xlu0 %v23_v4  ;;  %30 = vadd.xlane.f32.xlu1 %v29_v5  ;;  %v32_v8 = vsel %vm22_vm0, %v17_v6, 0.0  ;;  %v35_v11 = vsel %vm22_vm0, %v371_v9, 0.0  ;;  %v38_v12 = vsel %vm22_vm0, %v376_v10, 0.0  ;;  %v385_v13 = vld [vmem:[%s547_s0 + $0x30] sm:$0xff]  ;;  %v390_v14 = vld [vmem:[%s547_s0 + $0x38] sm:$0xff]  ;;  %v129_v17 = vld [vmem:[%s548_s1 + $0x8] sm:$0xff] }
   0x4   :  { %v41_v15 = vsel %vm22_vm0, %v385_v13, 0.0  ;;  %v44_v16 = vsel %vm22_vm0, %v390_v14, 0.0  ;;  %v130_v18 = vld [vmem:[%s548_s1 + $0x10] sm:$0xff]  ;;  %v128_v19 = vld [vmem:[%s548_s1] sm:$0xff]  ;;  %v131_v20 = vld [vmem:[%s548_s1 + $0x18] sm:$0xff] }
   0x5   :  { %v185_v21 = vld [vmem:[%s549_s2 + $0x8] sm:$0xff]  ;;  %v132_v22 = vld [vmem:[%s548_s1 + $0x20] sm:$0xff]  ;;  %v187_v23 = vld [vmem:[%s549_s2 + $0x18] sm:$0xff] }
   0x6   :  { %v133_v24 = vld [vmem:[%s548_s1 + $0x28] sm:$0xff]  ;;  %v134_v26 = vld [vmem:[%s548_s1 + $0x30] sm:$0xff]  ;;  %v135_v27 = vld [vmem:[%s548_s1 + $0x38] sm:$0xff] }
   0x7   :  { %27 = vadd.xlane.f32.xlu0 %v26_v7  ;;  %33 = vadd.xlane.f32.xlu1 %v32_v8  ;;  %v189_v25 = vld [vmem:[%s549_s2 + $0x28] sm:$0xff]  ;;  %v184_v28 = vld [vmem:[%s549_s2] sm:$0xff]  ;;  %v186_v29 = vld [vmem:[%s549_s2 + $0x10] sm:$0xff] }
   0x8   :  { %v188_v30 = vld [vmem:[%s549_s2 + $0x20] sm:$0xff]  ;;  %v190_v7 = vld [vmem:[%s549_s2 + $0x30] sm:$0xff]  ;;  %v191_v8 = vld [vmem:[%s549_s2 + $0x38] sm:$0xff] }
   0xb   :  { %36 = vadd.xlane.f32.xlu0 %v35_v11  ;;  %39 = vadd.xlane.f32.xlu1 %v38_v12 }
   0xf   :  { %42 = vadd.xlane.f32.xlu0 %v41_v15  ;;  %45 = vadd.xlane.f32.xlu1 %v44_v16 }
  0x20   :  { %143 = vperm.xlu1 %295, %v129_v17  }
  0x24   :  { %148 = vperm.xlu1 %295, %v130_v18  }
  0x25   :  { %138 = vperm.xlu0 %294, %v128_v19  }
  0x28   :  { %153 = vperm.xlu1 %295, %v131_v20  }
  0x29   :  { %199 = vperm.xlu0 %294, %v185_v21  }
  0x2c   :  { %158 = vperm.xlu1 %295, %v132_v22  }
  0x2d   :  { %209 = vperm.xlu0 %294, %v187_v23  }
  0x30   :  { %163 = vperm.xlu1 %295, %v133_v24  }
  0x31   :  { %219 = vperm.xlu0 %294, %v189_v25  }
  0x34   :  { %168 = vperm.xlu1 %295, %v134_v26  }
  0x38   :  { %173 = vperm.xlu1 %295, %v135_v27  }
  0x3c   :  { %194 = vperm.xlu1 %295, %v184_v28  }
  0x40   :  { %204 = vperm.xlu1 %295, %v186_v29  }
  0x44   :  { %214 = vperm.xlu1 %295, %v188_v30  }
  0x90   :  { %v25_v31 = vpop.xlane.xlu0 %24  ;;  %v31_v32 = vpop.xlane.xlu1 %30 }
  0x91   :  { %v48_v33 = vmul.f32 0.012658228, %v25_v31  ;;  %v50_v34 = vmul.f32 0.012658228, %v31_v32 }
  0x93   :  { %v438_v35 = vsub.f32 %v14_v0, %v48_v33  ;;  %v440_v36 = vsub.f32 %v16_v1, %v50_v34 }
  0x94   :  { %v28_v37 = vpop.xlane.xlu0 %27  ;;  %v34_v38 = vpop.xlane.xlu1 %33 }
  0x95   :  { %v49_v39 = vmul.f32 0.012658228, %v28_v37  ;;  %v51_v40 = vmul.f32 0.012658228, %v34_v38  ;;  %v64_v41 = vmul.f32 %v438_v35, %v438_v35  ;;  %v66_v42 = vmul.f32 %v440_v36, %v440_v36 }
  0x97   :  { %v447_v43 = vsub.f32 %v358_v2, %v49_v39  ;;  %v449_v44 = vsub.f32 %v17_v6, %v51_v40  ;;  %v72_v45 = vsel %vm22_vm0, %v64_v41, 0.0  ;;  %v78_v48 = vsel %vm22_vm0, %v66_v42, 0.0 }
  0x98   :  { %73 = vadd.xlane.f32.xlu0 %v72_v45  ;;  %v37_v46 = vpop.xlane.xlu0 %36  ;;  %v40_v47 = vpop.xlane.xlu1 %39 }
  0x99   :  { %v52_v49 = vmul.f32 0.012658228, %v37_v46  ;;  %v53_v50 = vmul.f32 0.012658228, %v40_v47  ;;  %v65_v51 = vmul.f32 %v447_v43, %v447_v43  ;;  %v67_v52 = vmul.f32 %v449_v44, %v449_v44 }
  0x9b   :  { %v458_v53 = vsub.f32 %v371_v9, %v52_v49  ;;  %v461_v54 = vsub.f32 %v376_v10, %v53_v50  ;;  %v75_v55 = vsel %vm22_vm0, %v65_v51, 0.0  ;;  %v81_v58 = vsel %vm22_vm0, %v67_v52, 0.0 }
  0x9c   :  { %79 = vadd.xlane.f32.xlu0 %v78_v48  ;;  %76 = vadd.xlane.f32.xlu1 %v75_v55  ;;  %v43_v56 = vpop.xlane.xlu0 %42  ;;  %v46_v57 = vpop.xlane.xlu1 %45 }
  0x9d   :  { %v54_v59 = vmul.f32 0.012658228, %v43_v56  ;;  %v55_v60 = vmul.f32 0.012658228, %v46_v57  ;;  %v68_v61 = vmul.f32 %v458_v53, %v458_v53  ;;  %v69_v62 = vmul.f32 %v461_v54, %v461_v54 }
  0x9f   :  { %v470_v63 = vsub.f32 %v385_v13, %v54_v59  ;;  %v473_v0 = vsub.f32 %v390_v14, %v55_v60  ;;  %v84_v1 = vsel %vm22_vm0, %v68_v61, 0.0  ;;  %v87_v2 = vsel %vm22_vm0, %v69_v62, 0.0 }
  0xa0   :  { %82 = vadd.xlane.f32.xlu1 %v81_v58  ;;  %85 = vadd.xlane.f32.xlu0 %v84_v1  ;;  %v144_v9 = vpop.permute.xlu1 %143 }
  0xa1   :  { %v70_v3 = vmul.f32 %v470_v63, %v470_v63  ;;  %v71_v4 = vmul.f32 %v473_v0, %v473_v0 }
  0xa3   :  { %v90_v5 = vsel %vm22_vm0, %v70_v3, 0.0  ;;  %v93_v6 = vsel %vm22_vm0, %v71_v4, 0.0 }
  0xa4   :  { %88 = vadd.xlane.f32.xlu1 %v87_v2  ;;  %91 = vadd.xlane.f32.xlu0 %v90_v5  ;;  %v149_v10 = vpop.permute.xlu1 %148  ;;  %v139_v15 = vpop.permute.xlu0 %138 }
  0xa8   :  { %94 = vadd.xlane.f32.xlu1 %v93_v6  ;;  %v489_v11 = vpop.permute.xlu1 %153  ;;  %v200_v17 = vpop.permute.xlu0 %199 }
  0xac   :  { %v491_v12 = vpop.permute.xlu1 %158  ;;  %v210_v19 = vpop.permute.xlu0 %209 }
  0xb0   :  { %v493_v13 = vpop.permute.xlu1 %163  ;;  %v499_v21 = vpop.permute.xlu0 %219 }
  0xb4   :  { %v495_v14 = vpop.permute.xlu1 %168 }
  0xb8   :  { %v497_v16 = vpop.permute.xlu1 %173 }
  0xb9   :  { %224 = vperm.xlu1 %295, %v190_v7  }
  0xba   :  { %229 = vperm.xlu0 %294, %v191_v8  }
  0xbc   :  { %v195_v18 = vpop.permute.xlu1 %194 }
  0xc0   :  { %v205_v20 = vpop.permute.xlu1 %204 }
  0xc4   :  { %v215_v22 = vpop.permute.xlu1 %214 }
 0x125   :  { %v74_v23 = vpop.xlane.xlu0 %73 }
 0x126   :  { %v96_v24 = vmul.f32 0.012658228, %v74_v23 }
 0x128   :  { %v104_v25 = vadd.f32 1e-05, %v96_v24 }
 0x129   :  { %v77_v26 = vpop.xlane.xlu1 %76  ;;  %v80_v27 = vpop.xlane.xlu0 %79 }
 0x12a   :  { %296 = vrsqrt.f32 %v104_v25  ;;  %v97_v28 = vmul.f32 0.012658228, %v77_v26  ;;  %v98_v29 = vmul.f32 0.012658228, %v80_v27 }
 0x12c   :  { %v105_v30 = vadd.f32 1e-05, %v97_v28  ;;  %v106_v31 = vadd.f32 1e-05, %v98_v29 }
 0x12d   :  { %v83_v32 = vpop.xlane.xlu1 %82  ;;  %v86_v33 = vpop.xlane.xlu0 %85 }
 0x12e   :  { %298 = vrsqrt.f32 %v105_v30  ;;  %v99_v34 = vmul.f32 0.012658228, %v83_v32  ;;  %v100_v37 = vmul.f32 0.012658228, %v86_v33 }
 0x12f   :  { %300 = vrsqrt.f32 %v106_v31 }
 0x130   :  { %v107_v38 = vadd.f32 1e-05, %v99_v34  ;;  %v108_v39 = vadd.f32 1e-05, %v100_v37 }
 0x131   :  { %v89_v40 = vpop.xlane.xlu1 %88  ;;  %v92_v41 = vpop.xlane.xlu0 %91 }
 0x132   :  { %302 = vrsqrt.f32 %v107_v38  ;;  %v101_v42 = vmul.f32 0.012658228, %v89_v40  ;;  %v102_v45 = vmul.f32 0.012658228, %v92_v41 }
 0x133   :  { %304 = vrsqrt.f32 %v108_v39 }
 0x134   :  { %v297_v46 = vpop.eup %296  ;;  %v109_v47 = vadd.f32 1e-05, %v101_v42  ;;  %v110_v48 = vadd.f32 1e-05, %v102_v45 }
 0x135   :  { %v120_v49 = vmul.f32 %v297_v46, %v438_v35  ;;  %v95_v50 = vpop.xlane.xlu1 %94 }
 0x136   :  { %306 = vrsqrt.f32 %v109_v47  ;;  %v103_v51 = vmul.f32 0.012658228, %v95_v50 }
 0x137   :  { %v176_v52 = vmul.f32 %v139_v15, %v120_v49  ;;  %308 = vrsqrt.f32 %v110_v48 }
 0x138   :  { %v299_v55 = vpop.eup %298  ;;  %v111_v56 = vadd.f32 1e-05, %v103_v51 }
 0x139   :  { %v301_v57 = vpop.eup %300  ;;  %v232_v58 = vadd.f32 %v195_v18, %v176_v52  ;;  %v121_v59 = vmul.f32 %v299_v55, %v447_v43 }
 0x13a   :  { %v122_v60 = vmul.f32 %v301_v57, %v440_v36  ;;  %310 = vrsqrt.f32 %v111_v56 }
 0x13b   :  { %v249_v61 = vmul.f32 0.70710677, %v232_v58  ;;  %v177_v62 = vmul.f32 %v144_v9, %v121_v59 }
 0x13c   :  { %v303_v1 = vpop.eup %302  ;;  %v178_v2 = vmul.f32 %v149_v10, %v122_v60 }
 0x13d   :  { %v305_v3 = vpop.eup %304  ;;  %312 = verf.f32 %v249_v61  ;;  %v233_v35 = vadd.f32 %v200_v17, %v177_v62  ;;  %v123_v4 = vmul.f32 %v303_v1, %v449_v44 }
 0x13e   :  { %v234_v5 = vadd.f32 %v205_v20, %v178_v2  ;;  %v124_v6 = vmul.f32 %v305_v3, %v458_v53 }
 0x13f   :  { %v250_v7 = vmul.f32 0.70710677, %v233_v35  ;;  %v179_v8 = vmul.f32 %v489_v11, %v123_v4 }
 0x140   :  { %v307_v15 = vpop.eup %306  ;;  %v251_v43 = vmul.f32 0.70710677, %v234_v5  ;;  %v180_v36 = vmul.f32 %v491_v12, %v124_v6  ;;  %v225_v12 = vpop.permute.xlu1 %224  ;;  %v242_v34 = vmul.f32 0.5, %v234_v5 }
 0x141   :  { %v309_v18 = vpop.eup %308  ;;  %314 = verf.f32 %v250_v7  ;;  %v235_v9 = vadd.f32 %v210_v19, %v179_v8  ;;  %v125_v10 = vmul.f32 %v307_v15, %v461_v54 }
 0x142   :  { %316 = verf.f32 %v251_v43  ;;  %v236_v23 = vadd.f32 %v215_v22, %v180_v36  ;;  %v126_v17 = vmul.f32 %v309_v18, %v470_v63  ;;  %v240_v63 = vmul.f32 0.5, %v232_v58 }
 0x143   :  { %v252_v44 = vmul.f32 0.70710677, %v235_v9  ;;  %v181_v20 = vmul.f32 %v493_v13, %v125_v10  ;;  %v230_v13 = vpop.permute.xlu0 %229  ;;  %v243_v41 = vmul.f32 0.5, %v235_v9 }
 0x144   :  { %v311_v53 = vpop.eup %310  ;;  %v253_v24 = vmul.f32 0.70710677, %v236_v23  ;;  %v182_v11 = vmul.f32 %v495_v14, %v126_v17  ;;  %v244_v45 = vmul.f32 0.5, %v236_v23 }
 0x145   :  { %318 = verf.f32 %v252_v44  ;;  %v237_v25 = vadd.f32 %v499_v21, %v181_v20  ;;  %v127_v26 = vmul.f32 %v311_v53, %v473_v0  ;;  %v241_v0 = vmul.f32 0.5, %v233_v35 }
 0x146   :  { %320 = verf.f32 %v253_v24  ;;  %v238_v19 = vadd.f32 %v225_v12, %v182_v11 }
 0x147   :  { %v313_v54 = vpop.eup %312  ;;  %v254_v27 = vmul.f32 0.70710677, %v237_v25  ;;  %v183_v22 = vmul.f32 %v497_v16, %v127_v26  ;;  %v245_v51 = vmul.f32 0.5, %v237_v25 }
 0x148   :  { %v265_v28 = vadd.f32 1.0, %v313_v54  ;;  %v255_v29 = vmul.f32 0.70710677, %v238_v19  ;;  %v246_v55 = vmul.f32 0.5, %v238_v19 }
 0x149   :  { %322 = verf.f32 %v254_v27  ;;  %v239_v30 = vadd.f32 %v230_v13, %v183_v22 }
 0x14a   :  { %v273_v31 = vmul.f32 %v265_v28, %v240_v63  ;;  %324 = verf.f32 %v255_v29 }
 0x14b   :  { %v315_v14 = vpop.eup %314  ;;  %v256_v32 = vmul.f32 0.70710677, %v239_v30  ;;  %v247_v60 = vmul.f32 0.5, %v239_v30 }
 0x14c   :  { %v317_v21 = vpop.eup %316  ;;  %281 = vst.msk [vmem:[%s550_s3] sm:$0xff] %vm22_vm0, %v273_v31  ;;  %v266_v33 = vadd.f32 1.0, %v315_v14 }
 0x14d   :  { %v267_v16 = vadd.f32 1.0, %v317_v21  ;;  %326 = verf.f32 %v256_v32 }
 0x14e   :  { %v274_v37 = vmul.f32 %v266_v33, %v241_v0 }
 0x14f   :  { %v319_v38 = vpop.eup %318  ;;  %v275_v39 = vmul.f32 %v267_v16, %v242_v34 }
 0x150   :  { %v321_v40 = vpop.eup %320  ;;  %282 = vst.msk [vmem:[%s550_s3 + $0x8] sm:$0xff] %vm22_vm0, %v274_v37  ;;  %v268_v42 = vadd.f32 1.0, %v319_v38 }
 0x151   :  { %283 = vst.msk [vmem:[%s550_s3 + $0x10] sm:$0xff] %vm22_vm0, %v275_v39  ;;  %v269_v46 = vadd.f32 1.0, %v321_v40 }
 0x152   :  { %v276_v47 = vmul.f32 %v268_v42, %v243_v41 }
 0x153   :  { %v323_v48 = vpop.eup %322  ;;  %v277_v49 = vmul.f32 %v269_v46, %v244_v45 }
 0x154   :  { %v325_v50 = vpop.eup %324  ;;  %284 = vst.msk [vmem:[%s550_s3 + $0x18] sm:$0xff] %vm22_vm0, %v276_v47  ;;  %v270_v52 = vadd.f32 1.0, %v323_v48 }
 0x155   :  { %285 = vst.msk [vmem:[%s550_s3 + $0x20] sm:$0xff] %vm22_vm0, %v277_v49  ;;  %v271_v56 = vadd.f32 1.0, %v325_v50 }
 0x156   :  { %v278_v57 = vmul.f32 %v270_v52, %v245_v51 }
 0x157   :  { %v327_v58 = vpop.eup %326  ;;  %v279_v59 = vmul.f32 %v271_v56, %v246_v55 }
 0x158   :  { %286 = vst.msk [vmem:[%s550_s3 + $0x28] sm:$0xff] %vm22_vm0, %v278_v57  ;;  %v272_v61 = vadd.f32 1.0, %v327_v58 }
 0x159   :  { %287 = vst.msk [vmem:[%s550_s3 + $0x30] sm:$0xff] %vm22_vm0, %v279_v59 }
 0x15a   :  { %v280_v62 = vmul.f32 %v272_v61, %v247_v60 }
 0x15c   :  { %288 = vst.msk [vmem:[%s550_s3 + $0x38] sm:$0xff] %vm22_vm0, %v280_v62 }

// kernel: wav2vec2_forward.27
= control target key start
LH: loop header
LB: loop body
LE: loop exit
PB: predicated region body
PF: predicated region fallthrough
CT: control target
= control target key end

     0   :  { %vm24_vm0 = vcmask 261120   ;;  %s404_s0 = inlined_call_operand.vmem [shape: f32[78,32], index: 0, kind: input, shape index: {}]   ;;  %s405_s1 = inlined_call_operand.vmem [shape: f32[1,32], index: 1, kind: input, shape index: {}]   ;;  %s406_s2 = inlined_call_operand.vmem [shape: f32[1,32], index: 2, kind: input, shape index: {}]   ;;  %s407_s3 = inlined_call_operand.vmem [shape: f32[78,32], index: 3, kind: output, shape index: {}]  }
   0x1   :  { %v14_v0 = vld [vmem:[%s404_s0] sm:$0xff]  ;;  %v16_v1 = vld [vmem:[%s404_s0 + $0x10] sm:$0xff]  ;;  %v15_v2 = vld [vmem:[%s404_s0 + $0x8] sm:$0xff] }
   0x2   :  { %v25_v3 = vsel %vm24_vm0, %v14_v0, 0.0  ;;  %v31_v4 = vsel %vm24_vm0, %v16_v1, 0.0  ;;  %v17_v5 = vld [vmem:[%s404_s0 + $0x18] sm:$0xff]  ;;  %v28_v6 = vsel %vm24_vm0, %v15_v2, 0.0  ;;  %v18_v8 = vld [vmem:[%s404_s0 + $0x20] sm:$0xff]  ;;  %v19_v9 = vld [vmem:[%s404_s0 + $0x28] sm:$0xff] }
   0x3   :  { %26 = vadd.xlane.f32.xlu0 %v25_v3  ;;  %32 = vadd.xlane.f32.xlu1 %v31_v4  ;;  %v34_v7 = vsel %vm24_vm0, %v17_v5, 0.0  ;;  %v37_v10 = vsel %vm24_vm0, %v18_v8, 0.0  ;;  %v40_v11 = vsel %vm24_vm0, %v19_v9, 0.0  ;;  %v20_v12 = vld [vmem:[%s404_s0 + $0x30] sm:$0xff]  ;;  %v21_v13 = vld [vmem:[%s404_s0 + $0x38] sm:$0xff]  ;;  %v22_v16 = vld [vmem:[%s404_s0 + $0x40] sm:$0xff] }
   0x4   :  { %v43_v14 = vsel %vm24_vm0, %v20_v12, 0.0  ;;  %v46_v15 = vsel %vm24_vm0, %v21_v13, 0.0  ;;  %v23_v17 = vld [vmem:[%s404_s0 + $0x48] sm:$0xff]  ;;  %v49_v18 = vsel %vm24_vm0, %v22_v16, 0.0 }
   0x5   :  { %v52_v19 = vsel %vm24_vm0, %v23_v17, 0.0 }
   0x7   :  { %29 = vadd.xlane.f32.xlu0 %v28_v6  ;;  %35 = vadd.xlane.f32.xlu1 %v34_v7 }
   0xb   :  { %38 = vadd.xlane.f32.xlu0 %v37_v10  ;;  %41 = vadd.xlane.f32.xlu1 %v40_v11 }
   0xf   :  { %44 = vadd.xlane.f32.xlu0 %v43_v14  ;;  %47 = vadd.xlane.f32.xlu1 %v46_v15 }
  0x13   :  { %50 = vadd.xlane.f32.xlu0 %v49_v18  ;;  %53 = vadd.xlane.f32.xlu1 %v52_v19 }
  0x90   :  { %v27_v20 = vpop.xlane.xlu0 %26  ;;  %v33_v21 = vpop.xlane.xlu1 %32 }
  0x91   :  { %v56_v22 = vmul.f32 0.03125, %v27_v20  ;;  %v58_v23 = vmul.f32 0.03125, %v33_v21 }
  0x93   :  { %v286_v24 = vsub.f32 %v14_v0, %v56_v22  ;;  %v288_v25 = vsub.f32 %v16_v1, %v58_v23 }
  0x94   :  { %v30_v26 = vpop.xlane.xlu0 %29  ;;  %v36_v27 = vpop.xlane.xlu1 %35 }
  0x95   :  { %v57_v28 = vmul.f32 0.03125, %v30_v26  ;;  %v59_v29 = vmul.f32 0.03125, %v36_v27  ;;  %v76_v30 = vmul.f32 %v286_v24, %v286_v24  ;;  %v78_v31 = vmul.f32 %v288_v25, %v288_v25 }
  0x97   :  { %v294_v32 = vsub.f32 %v15_v2, %v57_v28  ;;  %v296_v33 = vsub.f32 %v17_v5, %v59_v29  ;;  %v86_v34 = vsel %vm24_vm0, %v76_v30, 0.0  ;;  %v92_v37 = vsel %vm24_vm0, %v78_v31, 0.0  ;;  %v339_v28 = vld [vmem:[%s405_s1] ss:$0 sm:$0xff] }
  0x98   :  { %87 = vadd.xlane.f32.xlu0 %v86_v34  ;;  %v39_v35 = vpop.xlane.xlu0 %38  ;;  %v42_v36 = vpop.xlane.xlu1 %41 }
  0x99   :  { %v60_v38 = vmul.f32 0.03125, %v39_v35  ;;  %v61_v39 = vmul.f32 0.03125, %v42_v36  ;;  %v77_v40 = vmul.f32 %v294_v32, %v294_v32  ;;  %v79_v41 = vmul.f32 %v296_v33, %v296_v33  ;;  %v205_v36 = vld [vmem:[%s406_s2] ss:$0 sm:$0xff] }
  0x9b   :  { %v304_v42 = vsub.f32 %v18_v8, %v60_v38  ;;  %v306_v43 = vsub.f32 %v19_v9, %v61_v39  ;;  %v89_v44 = vsel %vm24_vm0, %v77_v40, 0.0  ;;  %v95_v47 = vsel %vm24_vm0, %v79_v41, 0.0 }
  0x9c   :  { %93 = vadd.xlane.f32.xlu0 %v92_v37  ;;  %90 = vadd.xlane.f32.xlu1 %v89_v44  ;;  %v45_v45 = vpop.xlane.xlu0 %44  ;;  %v48_v46 = vpop.xlane.xlu1 %47 }
  0x9d   :  { %v62_v48 = vmul.f32 0.03125, %v45_v45  ;;  %v63_v49 = vmul.f32 0.03125, %v48_v46  ;;  %v80_v50 = vmul.f32 %v304_v42, %v304_v42  ;;  %v81_v51 = vmul.f32 %v306_v43, %v306_v43 }
  0x9f   :  { %v314_v52 = vsub.f32 %v20_v12, %v62_v48  ;;  %v316_v53 = vsub.f32 %v21_v13, %v63_v49  ;;  %v98_v54 = vsel %vm24_vm0, %v80_v50, 0.0  ;;  %v101_v57 = vsel %vm24_vm0, %v81_v51, 0.0 }
  0xa0   :  { %96 = vadd.xlane.f32.xlu1 %v95_v47  ;;  %99 = vadd.xlane.f32.xlu0 %v98_v54  ;;  %v51_v55 = vpop.xlane.xlu0 %50  ;;  %v54_v56 = vpop.xlane.xlu1 %53 }
  0xa1   :  { %v64_v58 = vmul.f32 0.03125, %v51_v55  ;;  %v65_v59 = vmul.f32 0.03125, %v54_v56  ;;  %v82_v60 = vmul.f32 %v314_v52, %v314_v52  ;;  %v83_v61 = vmul.f32 %v316_v53, %v316_v53 }
  0xa3   :  { %v324_v62 = vsub.f32 %v22_v16, %v64_v58  ;;  %v326_v63 = vsub.f32 %v23_v17, %v65_v59  ;;  %v104_v0 = vsel %vm24_vm0, %v82_v60, 0.0  ;;  %v107_v1 = vsel %vm24_vm0, %v83_v61, 0.0 }
  0xa4   :  { %102 = vadd.xlane.f32.xlu1 %v101_v57  ;;  %105 = vadd.xlane.f32.xlu0 %v104_v0 }
  0xa5   :  { %v84_v2 = vmul.f32 %v324_v62, %v324_v62  ;;  %v85_v3 = vmul.f32 %v326_v63, %v326_v63 }
  0xa7   :  { %v110_v4 = vsel %vm24_vm0, %v84_v2, 0.0  ;;  %v113_v5 = vsel %vm24_vm0, %v85_v3, 0.0 }
  0xa8   :  { %108 = vadd.xlane.f32.xlu1 %v107_v1  ;;  %111 = vadd.xlane.f32.xlu0 %v110_v4 }
  0xac   :  { %114 = vadd.xlane.f32.xlu1 %v113_v5 }
 0x125   :  { %v88_v6 = vpop.xlane.xlu0 %87 }
 0x126   :  { %v116_v7 = vmul.f32 0.03125, %v88_v6 }
 0x128   :  { %v126_v8 = vadd.f32 1e-05, %v116_v7 }
 0x129   :  { %v91_v9 = vpop.xlane.xlu1 %90  ;;  %v94_v10 = vpop.xlane.xlu0 %93 }
 0x12a   :  { %206 = vrsqrt.f32 %v126_v8  ;;  %v117_v11 = vmul.f32 0.03125, %v91_v9  ;;  %v118_v12 = vmul.f32 0.03125, %v94_v10 }
 0x12c   :  { %v127_v13 = vadd.f32 1e-05, %v117_v11  ;;  %v128_v14 = vadd.f32 1e-05, %v118_v12 }
 0x12d   :  { %v97_v15 = vpop.xlane.xlu1 %96  ;;  %v100_v16 = vpop.xlane.xlu0 %99 }
 0x12e   :  { %208 = vrsqrt.f32 %v127_v13  ;;  %v119_v17 = vmul.f32 0.03125, %v97_v15  ;;  %v120_v18 = vmul.f32 0.03125, %v100_v16 }
 0x12f   :  { %210 = vrsqrt.f32 %v128_v14 }
 0x130   :  { %v129_v19 = vadd.f32 1e-05, %v119_v17  ;;  %v130_v20 = vadd.f32 1e-05, %v120_v18 }
 0x131   :  { %v103_v21 = vpop.xlane.xlu1 %102  ;;  %v106_v22 = vpop.xlane.xlu0 %105 }
 0x132   :  { %212 = vrsqrt.f32 %v129_v19  ;;  %v121_v23 = vmul.f32 0.03125, %v103_v21  ;;  %v122_v26 = vmul.f32 0.03125, %v106_v22 }
 0x133   :  { %214 = vrsqrt.f32 %v130_v20 }
 0x134   :  { %v207_v27 = vpop.eup %206  ;;  %v131_v29 = vadd.f32 1e-05, %v121_v23  ;;  %v132_v30 = vadd.f32 1e-05, %v122_v26 }
 0x135   :  { %v146_v31 = vmul.f32 %v207_v27, %v286_v24  ;;  %v109_v34 = vpop.xlane.xlu1 %108  ;;  %v112_v35 = vpop.xlane.xlu0 %111 }
 0x136   :  { %216 = vrsqrt.f32 %v131_v29  ;;  %v123_v37 = vmul.f32 0.03125, %v109_v34  ;;  %v124_v38 = vmul.f32 0.03125, %v112_v35 }
 0x137   :  { %v163_v39 = vmul.f32 %v339_v28, %v146_v31  ;;  %218 = vrsqrt.f32 %v132_v30 }
 0x138   :  { %v209_v40 = vpop.eup %208  ;;  %v133_v41 = vadd.f32 1e-05, %v123_v37  ;;  %v134_v44 = vadd.f32 1e-05, %v124_v38 }
 0x139   :  { %v211_v45 = vpop.eup %210  ;;  %v180_v46 = vadd.f32 %v205_v36, %v163_v39  ;;  %v147_v47 = vmul.f32 %v209_v40, %v294_v32  ;;  %v115_v24 = vpop.xlane.xlu1 %114 }
 0x13a   :  { %v148_v48 = vmul.f32 %v211_v45, %v288_v25  ;;  %220 = vrsqrt.f32 %v133_v41  ;;  %v125_v49 = vmul.f32 0.03125, %v115_v24 }
 0x13b   :  { %190 = vst.msk [vmem:[%s407_s3] sm:$0xff] %vm24_vm0, %v180_v46  ;;  %v164_v50 = vmul.f32 %v339_v28, %v147_v47  ;;  %222 = vrsqrt.f32 %v134_v44 }
 0x13c   :  { %v213_v51 = vpop.eup %212  ;;  %v165_v54 = vmul.f32 %v339_v28, %v148_v48  ;;  %v135_v55 = vadd.f32 1e-05, %v125_v49 }
 0x13d   :  { %v215_v56 = vpop.eup %214  ;;  %v181_v57 = vadd.f32 %v205_v36, %v164_v50  ;;  %v149_v32 = vmul.f32 %v213_v51, %v296_v33 }
 0x13e   :  { %v182_v58 = vadd.f32 %v205_v36, %v165_v54  ;;  %v150_v25 = vmul.f32 %v215_v56, %v304_v42  ;;  %224 = vrsqrt.f32 %v135_v55 }
 0x13f   :  { %191 = vst.msk [vmem:[%s407_s3 + $0x8] sm:$0xff] %vm24_vm0, %v181_v57  ;;  %v166_v59 = vmul.f32 %v339_v28, %v149_v32 }
 0x140   :  { %v217_v60 = vpop.eup %216  ;;  %192 = vst.msk [vmem:[%s407_s3 + $0x10] sm:$0xff] %vm24_vm0, %v182_v58  ;;  %v167_v61 = vmul.f32 %v339_v28, %v150_v25 }
 0x141   :  { %v219_v33 = vpop.eup %218  ;;  %v183_v0 = vadd.f32 %v205_v36, %v166_v59  ;;  %v151_v42 = vmul.f32 %v217_v60, %v306_v43 }
 0x142   :  { %v184_v1 = vadd.f32 %v205_v36, %v167_v61  ;;  %v152_v2 = vmul.f32 %v219_v33, %v314_v52 }
 0x143   :  { %193 = vst.msk [vmem:[%s407_s3 + $0x18] sm:$0xff] %vm24_vm0, %v183_v0  ;;  %v168_v3 = vmul.f32 %v339_v28, %v151_v42 }
 0x144   :  { %v221_v4 = vpop.eup %220  ;;  %194 = vst.msk [vmem:[%s407_s3 + $0x20] sm:$0xff] %vm24_vm0, %v184_v1  ;;  %v169_v5 = vmul.f32 %v339_v28, %v152_v2 }
 0x145   :  { %v223_v6 = vpop.eup %222  ;;  %v185_v43 = vadd.f32 %v205_v36, %v168_v3  ;;  %v153_v7 = vmul.f32 %v221_v4, %v316_v53 }
 0x146   :  { %v186_v52 = vadd.f32 %v205_v36, %v169_v5  ;;  %v154_v8 = vmul.f32 %v223_v6, %v324_v62 }
 0x147   :  { %195 = vst.msk [vmem:[%s407_s3 + $0x28] sm:$0xff] %vm24_vm0, %v185_v43  ;;  %v170_v9 = vmul.f32 %v339_v28, %v153_v7 }
 0x148   :  { %v225_v10 = vpop.eup %224  ;;  %196 = vst.msk [vmem:[%s407_s3 + $0x30] sm:$0xff] %vm24_vm0, %v186_v52  ;;  %v171_v11 = vmul.f32 %v339_v28, %v154_v8 }
 0x149   :  { %v187_v12 = vadd.f32 %v205_v36, %v170_v9  ;;  %v155_v53 = vmul.f32 %v225_v10, %v326_v63 }
 0x14a   :  { %v188_v13 = vadd.f32 %v205_v36, %v171_v11 }
 0x14b   :  { %197 = vst.msk [vmem:[%s407_s3 + $0x38] sm:$0xff] %vm24_vm0, %v187_v12  ;;  %v172_v62 = vmul.f32 %v339_v28, %v155_v53 }
 0x14c   :  { %198 = vst.msk [vmem:[%s407_s3 + $0x40] sm:$0xff] %vm24_vm0, %v188_v13 }
 0x14d   :  { %v189_v14 = vadd.f32 %v205_v36, %v172_v62 }
 0x14f   :  { %199 = vst.msk [vmem:[%s407_s3 + $0x48] sm:$0xff] %vm24_vm0, %v189_v14 }

// kernel: wav2vec2_forward.26
= control target key start
LH: loop header
LB: loop body
LE: loop exit
PB: predicated region body
PF: predicated region fallthrough
CT: control target
= control target key end

     0   :  { %v344_v0 = vmov 0.0   ;;  %vm345_vm0 = vmmov 0   ;;  %vm225_vm1 = vcmask 261120   ;;  %s501_s1 = inlined_call_operand.vmem [shape: bf16[128,32], index: 1, kind: input, shape index: {}]   ;;  %s502_s0 = inlined_call_operand.vmem [shape: f32[78,128], index: 0, kind: input, shape index: {}]   ;;  %s503_s2 = inlined_call_operand.vmem [shape: f32[1,32], index: 2, kind: input, shape index: {}]   ;;  %s504_s3 = inlined_call_operand.vmem [shape: f32[78,32], index: 3, kind: output, shape index: {}]  }
   0x1   :  { %262 = vmatprep.subr.bf16.mxu0 %v344_v0  ;;  %298 = vmatprep.subr.bf16.mxu1 %v344_v0  ;;  %v316_v1 = vld [vmem:[%s501_s1] sm:$0xff]   ;;  %v317_v2 = vld [vmem:[%s501_s1 + $0x8] sm:$0xff]   ;;  %v318_v3 = vld [vmem:[%s501_s1 + $0x10] sm:$0xff]  }
   0x2   :  { %278 = vmatprep.mubr.msk.bf16.mxu0 %vm345_vm0, %v344_v0  ;;  %290 = vmatprep.mubr.msk.bf16.mxu1 %vm345_vm0, %v344_v0  ;;  %v319_v4 = vld [vmem:[%s501_s1 + $0x18] sm:$0xff]   ;;  %v320_v5 = vld [vmem:[%s501_s1 + $0x20] sm:$0xff]   ;;  %v321_v6 = vld [vmem:[%s501_s1 + $0x28] sm:$0xff]  }
   0x3   :  { %263 = vmatpush3.bf16.msra.mxu0 %v316_v1  ;;  %306 = vmatpush3.bf16.msra.mxu1 %v316_v1  ;;  %v322_v7 = vld [vmem:[%s501_s1 + $0x30] sm:$0xff]   ;;  %v323_v8 = vld [vmem:[%s501_s1 + $0x38] sm:$0xff]   ;;  %v15_v9 = vld [vmem:[%s502_s0] sm:$0xff] }
   0x4   :  { %264 = vmatprep.subr.bf16.mxu0 %v344_v0  ;;  %299 = vmatprep.subr.bf16.mxu1 %v344_v0  ;;  %v16_v10 = vld [vmem:[%s502_s0 + $0x8] sm:$0xff]  ;;  %v21_v11 = vld [vmem:[%s502_s0 + $0x30] sm:$0xff]  ;;  %v22_v12 = vld [vmem:[%s502_s0 + $0x38] sm:$0xff] }
   0x5   :  { %v25_v13 = vpack.c.bf16 %v16_v10, %v15_v9  ;;  %v28_v14 = vpack.c.bf16 %v22_v12, %v21_v11  ;;  %v17_v15 = vld [vmem:[%s502_s0 + $0x10] sm:$0xff]  ;;  %v18_v16 = vld [vmem:[%s502_s0 + $0x18] sm:$0xff]  ;;  %v23_v17 = vld [vmem:[%s502_s0 + $0x40] sm:$0xff] }
   0x6   :  { %v24_v18 = vld [vmem:[%s502_s0 + $0x48] sm:$0xff]  ;;  %v26_v19 = vpack.c.bf16 %v18_v16, %v17_v15  ;;  %v19_v21 = vld [vmem:[%s502_s0 + $0x20] sm:$0xff] }
   0x7   :  { %265 = vmatpush3.bf16.msra.mxu0 %v317_v2  ;;  %307 = vmatpush3.bf16.msra.mxu1 %v317_v2  ;;  %v29_v20 = vpack.c.bf16 %v24_v18, %v23_v17  ;;  %v20_v22 = vld [vmem:[%s502_s0 + $0x28] sm:$0xff]  ;;  %v449_v24 = vld [vmem:[%s503_s2] ss:$0 sm:$0xff] }
   0x8   :  { %266 = vmatprep.subr.bf16.mxu0 %v344_v0  ;;  %300 = vmatprep.subr.bf16.mxu1 %v344_v0  ;;  %v27_v23 = vpack.c.bf16 %v20_v22, %v19_v21 }
   0xb   :  { %267 = vmatpush3.bf16.msra.mxu0 %v318_v3  ;;  %308 = vmatpush3.bf16.msra.mxu1 %v318_v3 }
   0xc   :  { %268 = vmatprep.subr.bf16.mxu0 %v344_v0  ;;  %301 = vmatprep.subr.bf16.mxu1 %v344_v0 }
   0xf   :  { %269 = vmatpush3.bf16.msra.mxu0 %v319_v4  ;;  %309 = vmatpush3.bf16.msra.mxu1 %v319_v4 }
  0x10   :  { %270 = vmatprep.subr.bf16.mxu0 %v344_v0  ;;  %302 = vmatprep.subr.bf16.mxu1 %v344_v0 }
  0x13   :  { %271 = vmatpush3.bf16.msra.mxu0 %v320_v5  ;;  %310 = vmatpush3.bf16.msra.mxu1 %v320_v5 }
  0x14   :  { %272 = vmatprep.subr.bf16.mxu0 %v344_v0  ;;  %303 = vmatprep.subr.bf16.mxu1 %v344_v0 }
  0x17   :  { %273 = vmatpush3.bf16.msra.mxu0 %v321_v6  ;;  %311 = vmatpush3.bf16.msra.mxu1 %v321_v6 }
  0x18   :  { %274 = vmatprep.subr.bf16.mxu0 %v344_v0  ;;  %304 = vmatprep.subr.bf16.mxu1 %v344_v0 }
  0x1b   :  { %275 = vmatpush3.bf16.msra.mxu0 %v322_v7  ;;  %312 = vmatpush3.bf16.msra.mxu1 %v322_v7 }
  0x1c   :  { %276 = vmatprep.subr.bf16.mxu0 %v344_v0  ;;  %305 = vmatprep.subr.bf16.mxu1 %v344_v0 }
  0x1f   :  { %277 = vmatpush3.bf16.msra.mxu0 %v323_v8  ;;  %313 = vmatpush3.bf16.msra.mxu1 %v323_v8 }
  0x22   :  { %279 = vmatmul.mubr.bf16.vlgmr.msra.gmra.mrb[0].mxu0 %v25_v13  ;;  %291 = vmatmul.mubr.bf16.vlgmr.msra.gmra.mrb[0].mxu1 %v28_v14 }
  0x23   :  { %282 = vmatprep.mubr.msk.bf16.mxu0 %vm345_vm0, %v344_v0  ;;  %294 = vmatprep.mubr.msk.bf16.mxu1 %vm345_vm0, %v344_v0 }
  0x2a   :  { %283 = vmatmul.mubr.bf16.gmra.mrb[4].mxu0 %v26_v19  ;;  %295 = vmatmul.mubr.bf16.gmra.mrb[4].mxu1 %v29_v20 }
  0x2b   :  { %286 = vmatprep.mubr.msk.bf16.mxu0 %vm345_vm0, %v344_v0 }
  0x32   :  { %287 = vmatmul.mubr.bf16.gmra.mrb[8].mxu0 %v27_v23 }
  0xf5   :  { %v135_v25 = vpop.f32.mrb[0].mxu0  ;;  %v159_v26 = vpop.f32.mrb[0].mxu1 }
  0xf6   :  { %v136_v27 = vadd.f32 %v449_v24, %v135_v25  ;;  %v160_v28 = vadd.f32 %v449_v24, %v159_v26  ;;  %v280_v29 = vpop.f32.mrb[1].mxu0  ;;  %v292_v30 = vpop.f32.mrb[1].mxu1 }
  0xf7   :  { %v138_v31 = vpop.f32.mrb[2].mxu0  ;;  %v162_v32 = vpop.f32.mrb[2].mxu1 }
  0xf8   :  { %v185_v33 = vmul.f32 0.70710677, %v136_v27  ;;  %v191_v34 = vmul.f32 0.70710677, %v160_v28  ;;  %v139_v35 = vadd.f32 %v449_v24, %v138_v31  ;;  %v163_v36 = vadd.f32 %v449_v24, %v162_v32  ;;  %v281_v37 = vpop.f32.mrb[3].mxu0  ;;  %v293_v38 = vpop.f32.mrb[3].mxu1 }
  0xf9   :  { %v174_v59 = vmul.f32 0.5, %v136_v27  ;;  %v180_v62 = vmul.f32 0.5, %v160_v28 }
  0xfa   :  { %324 = verf.f32 %v185_v33  ;;  %v186_v39 = vmul.f32 0.70710677, %v139_v35  ;;  %v192_v40 = vmul.f32 0.70710677, %v163_v36  ;;  %v175_v7 = vmul.f32 0.5, %v139_v35 }
  0xfb   :  { %326 = verf.f32 %v191_v34  ;;  %v181_v11 = vmul.f32 0.5, %v163_v36 }
  0xfc   :  { %328 = verf.f32 %v186_v39 }
  0xfd   :  { %v143_v41 = vpop.f32.mrb[4].mxu0  ;;  %v167_v42 = vpop.f32.mrb[4].mxu1  ;;  %330 = verf.f32 %v192_v40 }
  0xfe   :  { %v144_v43 = vadd.f32 %v449_v24, %v143_v41  ;;  %v168_v44 = vadd.f32 %v449_v24, %v167_v42  ;;  %v284_v45 = vpop.f32.mrb[5].mxu0  ;;  %v296_v46 = vpop.f32.mrb[5].mxu1 }
  0xff   :  { %v146_v47 = vpop.f32.mrb[6].mxu0  ;;  %v170_v48 = vpop.f32.mrb[6].mxu1 }
 0x100   :  { %v187_v49 = vmul.f32 0.70710677, %v144_v43  ;;  %v193_v50 = vmul.f32 0.70710677, %v168_v44  ;;  %v147_v51 = vadd.f32 %v449_v24, %v146_v47  ;;  %v171_v52 = vadd.f32 %v449_v24, %v170_v48  ;;  %v285_v53 = vpop.f32.mrb[7].mxu0  ;;  %v297_v54 = vpop.f32.mrb[7].mxu1 }
 0x101   :  { %v176_v19 = vmul.f32 0.5, %v144_v43  ;;  %v182_v21 = vmul.f32 0.5, %v168_v44 }
 0x102   :  { %332 = verf.f32 %v187_v49  ;;  %v188_v55 = vmul.f32 0.70710677, %v147_v51  ;;  %v194_v57 = vmul.f32 0.70710677, %v171_v52  ;;  %v177_v27 = vmul.f32 0.5, %v147_v51 }
 0x103   :  { %334 = verf.f32 %v193_v50  ;;  %v183_v29 = vmul.f32 0.5, %v171_v52 }
 0x104   :  { %v325_v56 = vpop.eup %324  ;;  %336 = verf.f32 %v188_v55 }
 0x105   :  { %v327_v58 = vpop.eup %326  ;;  %v205_v60 = vadd.f32 1.0, %v325_v56  ;;  %v151_v61 = vpop.f32.mrb[8].mxu0  ;;  %338 = verf.f32 %v194_v57 }
 0x106   :  { %v211_v63 = vadd.f32 1.0, %v327_v58  ;;  %v152_v0 = vadd.f32 %v449_v24, %v151_v61  ;;  %v288_v1 = vpop.f32.mrb[9].mxu0  ;;  %v329_v2 = vpop.eup %328 }
 0x107   :  { %v215_v3 = vmul.f32 %v205_v60, %v174_v59  ;;  %v154_v4 = vpop.f32.mrb[10].mxu0  ;;  %v331_v5 = vpop.eup %330  ;;  %v206_v8 = vadd.f32 1.0, %v329_v2 }
 0x108   :  { %v221_v6 = vmul.f32 %v211_v63, %v180_v62  ;;  %v189_v9 = vmul.f32 0.70710677, %v152_v0  ;;  %v289_v10 = vpop.f32.mrb[11].mxu0  ;;  %v212_v12 = vadd.f32 1.0, %v331_v5  ;;  %v155_v13 = vadd.f32 %v449_v24, %v154_v4 }
 0x109   :  { %226 = vst.msk [vmem:[%s504_s3] sm:$0xff] %vm225_vm1, %v215_v3  ;;  %v216_v14 = vmul.f32 %v206_v8, %v175_v7  ;;  %v178_v34 = vmul.f32 0.5, %v152_v0 }
 0x10a   :  { %232 = vst.msk [vmem:[%s504_s3 + $0x30] sm:$0xff] %vm225_vm1, %v221_v6  ;;  %340 = verf.f32 %v189_v9  ;;  %v222_v15 = vmul.f32 %v212_v12, %v181_v11  ;;  %v190_v16 = vmul.f32 0.70710677, %v155_v13  ;;  %v179_v38 = vmul.f32 0.5, %v155_v13 }
 0x10b   :  { %227 = vst.msk [vmem:[%s504_s3 + $0x8] sm:$0xff] %vm225_vm1, %v216_v14 }
 0x10c   :  { %v333_v17 = vpop.eup %332  ;;  %233 = vst.msk [vmem:[%s504_s3 + $0x38] sm:$0xff] %vm225_vm1, %v222_v15  ;;  %342 = verf.f32 %v190_v16 }
 0x10d   :  { %v335_v18 = vpop.eup %334  ;;  %v207_v20 = vadd.f32 1.0, %v333_v17 }
 0x10e   :  { %v213_v22 = vadd.f32 1.0, %v335_v18  ;;  %v337_v23 = vpop.eup %336 }
 0x10f   :  { %v217_v24 = vmul.f32 %v207_v20, %v176_v19  ;;  %v339_v25 = vpop.eup %338  ;;  %v208_v28 = vadd.f32 1.0, %v337_v23 }
 0x110   :  { %v223_v26 = vmul.f32 %v213_v22, %v182_v21  ;;  %v214_v30 = vadd.f32 1.0, %v339_v25 }
 0x111   :  { %228 = vst.msk [vmem:[%s504_s3 + $0x10] sm:$0xff] %vm225_vm1, %v217_v24  ;;  %v218_v31 = vmul.f32 %v208_v28, %v177_v27 }
 0x112   :  { %234 = vst.msk [vmem:[%s504_s3 + $0x40] sm:$0xff] %vm225_vm1, %v223_v26  ;;  %v224_v32 = vmul.f32 %v214_v30, %v183_v29 }
 0x113   :  { %229 = vst.msk [vmem:[%s504_s3 + $0x18] sm:$0xff] %vm225_vm1, %v218_v31 }
 0x114   :  { %v341_v33 = vpop.eup %340  ;;  %235 = vst.msk [vmem:[%s504_s3 + $0x48] sm:$0xff] %vm225_vm1, %v224_v32 }
 0x115   :  { %v209_v35 = vadd.f32 1.0, %v341_v33 }
 0x116   :  { %v343_v36 = vpop.eup %342 }
 0x117   :  { %v219_v37 = vmul.f32 %v209_v35, %v178_v34  ;;  %v210_v39 = vadd.f32 1.0, %v343_v36 }
 0x119   :  { %230 = vst.msk [vmem:[%s504_s3 + $0x20] sm:$0xff] %vm225_vm1, %v219_v37  ;;  %v220_v40 = vmul.f32 %v210_v39, %v179_v38 }
 0x11b   :  { %231 = vst.msk [vmem:[%s504_s3 + $0x28] sm:$0xff] %vm225_vm1, %v220_v40 }

// kernel: wav2vec2_forward.28
= control target key start
LH: loop header
LB: loop body
LE: loop exit
PB: predicated region body
PF: predicated region fallthrough
CT: control target
= control target key end

     0   :  { %v204_v0 = vmov 0.0   ;;  %vm205_vm0 = vmmov 0   ;;  %vm53_vm1 = vcmask 261120   ;;  %vm142_vm2 = vcmask 523264   ;;  %s315_s1 = inlined_call_operand.vmem [shape: bf16[32,64], index: 1, kind: input, shape index: {}]   ;;  %s316_s0 = inlined_call_operand.vmem [shape: f32[78,32], index: 0, kind: input, shape index: {}]   ;;  %s317_s2 = inlined_call_operand.vmem [shape: f32[1,64], index: 2, kind: input, shape index: {}]   ;;  %s318_s3 = inlined_call_operand.vmem [shape: f32[78,64], index: 3, kind: output, shape index: {}]  }
   0x1   :  { %172 = vmatprep.subr.bf16.mxu0 %v204_v0  ;;  %v202_v1 = vld [vmem:[%s315_s1] sm:$0xff]   ;;  %196 = vmatprep.subr.bf16.mxu1 %v204_v0  ;;  %v203_v2 = vld [vmem:[%s315_s1 + $0x8] sm:$0xff]   ;;  %v21_v5 = vld [vmem:[%s316_s0 + $0x30] sm:$0xff] }
   0x2   :  { %176 = vmatprep.mubr.msk.bf16.mxu0 %vm205_vm0, %v204_v0  ;;  %188 = vmatprep.mubr.msk.bf16.mxu1 %vm205_vm0, %v204_v0  ;;  %v15_v3 = vld [vmem:[%s316_s0] sm:$0xff]  ;;  %v16_v4 = vld [vmem:[%s316_s0 + $0x8] sm:$0xff]  ;;  %v22_v6 = vld [vmem:[%s316_s0 + $0x38] sm:$0xff] }
   0x3   :  { %173 = vmatpush3.bf16.msra.mxu0 %v202_v1  ;;  %198 = vmatpush3.bf16.msra.mxu1 %v202_v1  ;;  %v25_v7 = vpack.c.bf16 %v16_v4, %v15_v3  ;;  %v28_v8 = vpack.c.bf16 %v22_v6, %v21_v5  ;;  %v17_v9 = vld [vmem:[%s316_s0 + $0x10] sm:$0xff]  ;;  %v18_v10 = vld [vmem:[%s316_s0 + $0x18] sm:$0xff]  ;;  %v23_v11 = vld [vmem:[%s316_s0 + $0x40] sm:$0xff] }
   0x4   :  { %174 = vmatprep.subr.bf16.mxu0 %v204_v0  ;;  %197 = vmatprep.subr.bf16.mxu1 %v204_v0  ;;  %v24_v12 = vld [vmem:[%s316_s0 + $0x48] sm:$0xff]  ;;  %v26_v13 = vpack.c.bf16 %v18_v10, %v17_v9  ;;  %v19_v15 = vld [vmem:[%s316_s0 + $0x20] sm:$0xff] }
   0x5   :  { %v29_v14 = vpack.c.bf16 %v24_v12, %v23_v11  ;;  %v20_v16 = vld [vmem:[%s316_s0 + $0x28] sm:$0xff]  ;;  %v157_v18 = vld [vmem:[%s317_s2] ss:$0 sm:$0xff] }
   0x6   :  { %v27_v17 = vpack.c.bf16 %v20_v16, %v19_v15 }
   0x7   :  { %175 = vmatpush3.bf16.msra.mxu0 %v203_v2  ;;  %199 = vmatpush3.bf16.msra.mxu1 %v203_v2 }
   0xa   :  { %177 = vmatmul.mubr.msk.bf16.vlgmr.msra.gmra.mrb[0].mxu0 %vm53_vm1, %v25_v7  ;;  %189 = vmatmul.mubr.msk.bf16.vlgmr.msra.gmra.mrb[0].mxu1 %vm53_vm1, %v28_v8 }
   0xb   :  { %180 = vmatprep.mubr.msk.bf16.mxu0 %vm205_vm0, %v204_v0  ;;  %192 = vmatprep.mubr.msk.bf16.mxu1 %vm205_vm0, %v204_v0 }
  0x12   :  { %181 = vmatmul.mubr.msk.bf16.gmra.mrb[4].mxu0 %vm53_vm1, %v26_v13  ;;  %193 = vmatmul.mubr.msk.bf16.gmra.mrb[4].mxu1 %vm53_vm1, %v29_v14 }
  0x13   :  { %184 = vmatprep.mubr.msk.bf16.mxu0 %vm205_vm0, %v204_v0 }
  0x1a   :  { %185 = vmatmul.mubr.msk.bf16.gmra.mrb[8].mxu0 %vm53_vm1, %v27_v17 }
  0xdd   :  { %v103_v19 = vpop.f32.mrb[0].mxu0  ;;  %v127_v20 = vpop.f32.mrb[0].mxu1 }
  0xde   :  { %v104_v21 = vadd.f32 %v157_v18, %v103_v19  ;;  %v178_v22 = vpop.f32.mrb[1].mxu0  ;;  %v128_v23 = vadd.f32 %v157_v18, %v127_v20  ;;  %v190_v24 = vpop.f32.mrb[1].mxu1 }
  0xdf   :  { %v106_v25 = vpop.f32.mrb[2].mxu0  ;;  %v130_v26 = vpop.f32.mrb[2].mxu1 }
  0xe0   :  { %143 = vst.msk [vmem:[%s318_s3] sm:$0xff] %vm142_vm2, %v104_v21  ;;  %v107_v27 = vadd.f32 %v157_v18, %v106_v25  ;;  %v179_v28 = vpop.f32.mrb[3].mxu0  ;;  %149 = vst.msk [vmem:[%s318_s3 + $0x30] sm:$0xff] %vm142_vm2, %v128_v23  ;;  %v131_v29 = vadd.f32 %v157_v18, %v130_v26  ;;  %v191_v30 = vpop.f32.mrb[3].mxu1 }
  0xe2   :  { %144 = vst.msk [vmem:[%s318_s3 + $0x8] sm:$0xff] %vm142_vm2, %v107_v27  ;;  %150 = vst.msk [vmem:[%s318_s3 + $0x38] sm:$0xff] %vm142_vm2, %v131_v29 }
  0xe5   :  { %v111_v31 = vpop.f32.mrb[4].mxu0  ;;  %v135_v32 = vpop.f32.mrb[4].mxu1 }
  0xe6   :  { %v112_v33 = vadd.f32 %v157_v18, %v111_v31  ;;  %v182_v34 = vpop.f32.mrb[5].mxu0  ;;  %v136_v35 = vadd.f32 %v157_v18, %v135_v32  ;;  %v194_v36 = vpop.f32.mrb[5].mxu1 }
  0xe7   :  { %v114_v37 = vpop.f32.mrb[6].mxu0  ;;  %v138_v38 = vpop.f32.mrb[6].mxu1 }
  0xe8   :  { %145 = vst.msk [vmem:[%s318_s3 + $0x10] sm:$0xff] %vm142_vm2, %v112_v33  ;;  %v115_v39 = vadd.f32 %v157_v18, %v114_v37  ;;  %v183_v40 = vpop.f32.mrb[7].mxu0  ;;  %151 = vst.msk [vmem:[%s318_s3 + $0x40] sm:$0xff] %vm142_vm2, %v136_v35  ;;  %v139_v41 = vadd.f32 %v157_v18, %v138_v38  ;;  %v195_v42 = vpop.f32.mrb[7].mxu1 }
  0xea   :  { %146 = vst.msk [vmem:[%s318_s3 + $0x18] sm:$0xff] %vm142_vm2, %v115_v39  ;;  %152 = vst.msk [vmem:[%s318_s3 + $0x48] sm:$0xff] %vm142_vm2, %v139_v41 }
  0xed   :  { %v119_v43 = vpop.f32.mrb[8].mxu0 }
  0xee   :  { %v120_v44 = vadd.f32 %v157_v18, %v119_v43  ;;  %v186_v45 = vpop.f32.mrb[9].mxu0 }
  0xef   :  { %v122_v46 = vpop.f32.mrb[10].mxu0 }
  0xf0   :  { %147 = vst.msk [vmem:[%s318_s3 + $0x20] sm:$0xff] %vm142_vm2, %v120_v44  ;;  %v123_v47 = vadd.f32 %v157_v18, %v122_v46  ;;  %v187_v48 = vpop.f32.mrb[11].mxu0 }
  0xf2   :  { %148 = vst.msk [vmem:[%s318_s3 + $0x28] sm:$0xff] %vm142_vm2, %v123_v47 }

// kernel: wav2vec2_forward.31
= control target key start
LH: loop header
LB: loop body
LE: loop exit
PB: predicated region body
PF: predicated region fallthrough
CT: control target
= control target key end

     0   :  { %v247_v1 = vmov 0   ;;  %vm90_vm0 = vcmask 523264   ;;  %v40_v24 = vlaneseq  ;;  %s400_s1 = inlined_call_operand.vmem [shape: bf16[64,192], index: 1, kind: input, shape index: {}]   ;;  %s401_s0 = inlined_call_operand.vmem [shape: f32[78,64], index: 0, kind: input, shape index: {}]   ;;  %s402_s2 = inlined_call_operand.vmem [shape: f32[1,192], index: 2, kind: input, shape index: {}]   ;;  %s403_s3 = inlined_call_operand.vmem [shape: f32[78,192], index: 3, kind: output, shape index: {}]  }
   0x1   :  { %v235_v0 = vld [vmem:[%s400_s1 + $0x4] ss:$8 sps:$4 sm:$0xff]   ;;  %138 = vmatprep.mubr.bf16.mxu0 %v247_v1  ;;  %168 = vmatprep.mubr.bf16.mxu1 %v247_v1  ;;  %v237_v2 = vld [vmem:[%s400_s1] ss:$8 sps:$4 sm:$0xff]   ;;  %v238_v3 = vld [vmem:[%s400_s1 + $0x14] ss:$8 sps:$4 sm:$0xff]  }
   0x2   :  { %106 = vmatprep.subr.bf16.mxu0 %v235_v0  ;;  %226 = vmatprep.subr.bf16.mxu1 %v235_v0  ;;  %v240_v4 = vld [vmem:[%s400_s1 + $0x10] ss:$8 sps:$4 sm:$0xff]   ;;  %v241_v5 = vld [vmem:[%s400_s1 + $0x24] ss:$8 sps:$4 sm:$0xff]   ;;  %v243_v6 = vld [vmem:[%s400_s1 + $0x20] ss:$8 sps:$4 sm:$0xff]  }
   0x3   :  { %107 = vmatpush1.bf16.msra.mxu0 %v237_v2  ;;  %230 = vmatpush1.bf16.msra.mxu1 %v237_v2  ;;  %v244_v7 = vld [vmem:[%s400_s1 + $0x34] ss:$8 sps:$4 sm:$0xff]   ;;  %v246_v8 = vld [vmem:[%s400_s1 + $0x30] ss:$8 sps:$4 sm:$0xff]   ;;  %v15_v9 = vld [vmem:[%s401_s0] sm:$0xff]  ;;  %v41_v25 = vshrl.u32 %v40_v24, 7 }
   0x4   :  { %108 = vmatprep.subr.bf16.mxu0 %v238_v3  ;;  %227 = vmatprep.subr.bf16.mxu1 %v238_v3  ;;  %v16_v10 = vld [vmem:[%s401_s0 + $0x8] sm:$0xff]  ;;  %v21_v11 = vld [vmem:[%s401_s0 + $0x30] sm:$0xff]  ;;  %v22_v12 = vld [vmem:[%s401_s0 + $0x38] sm:$0xff] }
   0x5   :  { %v25_v13 = vpack.c.bf16 %v16_v10, %v15_v9  ;;  %v28_v14 = vpack.c.bf16 %v22_v12, %v21_v11  ;;  %v17_v15 = vld [vmem:[%s401_s0 + $0x10] sm:$0xff]  ;;  %v18_v16 = vld [vmem:[%s401_s0 + $0x18] sm:$0xff]  ;;  %v23_v17 = vld [vmem:[%s401_s0 + $0x40] sm:$0xff]  ;;  %v42_v26 = vsub.s32 0, %v41_v25  ;;  %v46_v28 = vsub.s32 1, %v41_v25 }
   0x6   :  { %v24_v18 = vld [vmem:[%s401_s0 + $0x48] sm:$0xff]  ;;  %v26_v19 = vpack.c.bf16 %v18_v16, %v17_v15  ;;  %v19_v21 = vld [vmem:[%s401_s0 + $0x20] sm:$0xff] }
   0x7   :  { %109 = vmatpush1.bf16.msra.mxu0 %v240_v4  ;;  %231 = vmatpush1.bf16.msra.mxu1 %v240_v4  ;;  %v29_v20 = vpack.c.bf16 %v24_v18, %v23_v17  ;;  %v20_v22 = vld [vmem:[%s401_s0 + $0x28] sm:$0xff]  ;;  %v38_v27 = vld [vmem:[%s402_s2] sm:$0x3] }
   0x8   :  { %110 = vmatprep.subr.bf16.mxu0 %v241_v5  ;;  %228 = vmatprep.subr.bf16.mxu1 %v241_v5  ;;  %v27_v23 = vpack.c.bf16 %v20_v22, %v19_v21  ;;  %v43_v29 = vrot.slane %v38_v27, %v42_v26  ;;  %v47_v30 = vrot.slane %v38_v27, %v46_v28 }
   0xb   :  { %111 = vmatpush1.bf16.msra.mxu0 %v243_v6  ;;  %232 = vmatpush1.bf16.msra.mxu1 %v243_v6 }
   0xc   :  { %112 = vmatprep.subr.bf16.mxu0 %v244_v7  ;;  %229 = vmatprep.subr.bf16.mxu1 %v244_v7 }
   0xf   :  { %113 = vmatpush1.bf16.msra.mxu0 %v246_v8  ;;  %233 = vmatpush1.bf16.msra.mxu1 %v246_v8 }
  0x12   :  { %221 = vmatmul.mubr.msk.bf16.vlgmr.msra.gmra.mrb[0].mxu0 %vm90_vm0, %v25_v13  ;;  %224 = vmatmul.mubr.msk.bf16.vlgmr.msra.gmra.mrb[0].mxu1 %vm90_vm0, %v28_v14 }
  0x13   :  { %148 = vmatprep.mubr.bf16.mxu0 %v247_v1  ;;  %178 = vmatprep.mubr.bf16.mxu1 %v247_v1 }
  0x1a   :  { %222 = vmatmul.mubr.msk.bf16.gmra.mrb[4].mxu0 %vm90_vm0, %v26_v19  ;;  %225 = vmatmul.mubr.msk.bf16.gmra.mrb[4].mxu1 %vm90_vm0, %v29_v20 }
  0x1b   :  { %158 = vmatprep.mubr.bf16.mxu0 %v247_v1 }
  0x22   :  { %223 = vmatmul.mubr.msk.bf16.gmra.mrb[8].mxu0 %vm90_vm0, %v27_v23 }
  0xe5   :  { %v140_v31 = vpop.f32.mrb[0].mxu0  ;;  %v170_v32 = vpop.f32.mrb[0].mxu1 }
  0xe6   :  { %v141_v33 = vadd.f32 %v140_v31, %v43_v29  ;;  %v142_v34 = vpop.f32.mrb[1].mxu0  ;;  %v171_v35 = vadd.f32 %v170_v32, %v43_v29  ;;  %v172_v36 = vpop.f32.mrb[1].mxu1 }
  0xe7   :  { %v143_v37 = vadd.f32 %v142_v34, %v47_v30  ;;  %v144_v38 = vpop.f32.mrb[2].mxu0  ;;  %v173_v39 = vadd.f32 %v172_v36, %v47_v30  ;;  %v174_v40 = vpop.f32.mrb[2].mxu1 }
  0xe8   :  { %189 = vst [vmem:[%s403_s3] sm:$0xff] %v141_v33  ;;  %v145_v41 = vadd.f32 %v144_v38, %v43_v29  ;;  %v146_v42 = vpop.f32.mrb[3].mxu0  ;;  %201 = vst [vmem:[%s403_s3 + $0x60] sm:$0xff] %v171_v35  ;;  %v175_v43 = vadd.f32 %v174_v40, %v43_v29  ;;  %v176_v44 = vpop.f32.mrb[3].mxu1 }
  0xe9   :  { %190 = vst.msk [vmem:[%s403_s3 + $0x8] sm:$0xff] %vm90_vm0, %v143_v37  ;;  %v147_v45 = vadd.f32 %v146_v42, %v47_v30  ;;  %202 = vst.msk [vmem:[%s403_s3 + $0x68] sm:$0xff] %vm90_vm0, %v173_v39  ;;  %v177_v46 = vadd.f32 %v176_v44, %v47_v30 }
  0xea   :  { %191 = vst [vmem:[%s403_s3 + $0x10] sm:$0xff] %v145_v41  ;;  %203 = vst [vmem:[%s403_s3 + $0x70] sm:$0xff] %v175_v43 }
  0xeb   :  { %192 = vst.msk [vmem:[%s403_s3 + $0x18] sm:$0xff] %vm90_vm0, %v147_v45  ;;  %204 = vst.msk [vmem:[%s403_s3 + $0x78] sm:$0xff] %vm90_vm0, %v177_v46 }
  0xed   :  { %v150_v47 = vpop.f32.mrb[4].mxu0  ;;  %v180_v48 = vpop.f32.mrb[4].mxu1 }
  0xee   :  { %v151_v49 = vadd.f32 %v150_v47, %v43_v29  ;;  %v152_v50 = vpop.f32.mrb[5].mxu0  ;;  %v181_v51 = vadd.f32 %v180_v48, %v43_v29  ;;  %v182_v52 = vpop.f32.mrb[5].mxu1 }
  0xef   :  { %v153_v53 = vadd.f32 %v152_v50, %v47_v30  ;;  %v154_v54 = vpop.f32.mrb[6].mxu0  ;;  %v183_v55 = vadd.f32 %v182_v52, %v47_v30  ;;  %v184_v56 = vpop.f32.mrb[6].mxu1 }
  0xf0   :  { %193 = vst [vmem:[%s403_s3 + $0x20] sm:$0xff] %v151_v49  ;;  %v155_v57 = vadd.f32 %v154_v54, %v43_v29  ;;  %v156_v58 = vpop.f32.mrb[7].mxu0  ;;  %205 = vst [vmem:[%s403_s3 + $0x80] sm:$0xff] %v181_v51  ;;  %v185_v59 = vadd.f32 %v184_v56, %v43_v29  ;;  %v186_v60 = vpop.f32.mrb[7].mxu1 }
  0xf1   :  { %194 = vst.msk [vmem:[%s403_s3 + $0x28] sm:$0xff] %vm90_vm0, %v153_v53  ;;  %v157_v61 = vadd.f32 %v156_v58, %v47_v30  ;;  %206 = vst.msk [vmem:[%s403_s3 + $0x88] sm:$0xff] %vm90_vm0, %v183_v55  ;;  %v187_v62 = vadd.f32 %v186_v60, %v47_v30 }
  0xf2   :  { %195 = vst [vmem:[%s403_s3 + $0x30] sm:$0xff] %v155_v57  ;;  %207 = vst [vmem:[%s403_s3 + $0x90] sm:$0xff] %v185_v59 }
  0xf3   :  { %196 = vst.msk [vmem:[%s403_s3 + $0x38] sm:$0xff] %vm90_vm0, %v157_v61  ;;  %208 = vst.msk [vmem:[%s403_s3 + $0x98] sm:$0xff] %vm90_vm0, %v187_v62 }
  0xf5   :  { %v160_v63 = vpop.f32.mrb[8].mxu0 }
  0xf6   :  { %v161_v0 = vadd.f32 %v160_v63, %v43_v29  ;;  %v162_v1 = vpop.f32.mrb[9].mxu0 }
  0xf7   :  { %v163_v2 = vadd.f32 %v162_v1, %v47_v30  ;;  %v164_v3 = vpop.f32.mrb[10].mxu0 }
  0xf8   :  { %197 = vst [vmem:[%s403_s3 + $0x40] sm:$0xff] %v161_v0  ;;  %v165_v4 = vadd.f32 %v164_v3, %v43_v29  ;;  %v166_v5 = vpop.f32.mrb[11].mxu0 }
  0xf9   :  { %198 = vst.msk [vmem:[%s403_s3 + $0x48] sm:$0xff] %vm90_vm0, %v163_v2  ;;  %v167_v6 = vadd.f32 %v166_v5, %v47_v30 }
  0xfa   :  { %199 = vst [vmem:[%s403_s3 + $0x50] sm:$0xff] %v165_v4 }
  0xfb   :  { %200 = vst.msk [vmem:[%s403_s3 + $0x58] sm:$0xff] %vm90_vm0, %v167_v6 }

// kernel: wav2vec2_forward.30
= control target key start
LH: loop header
LB: loop body
LE: loop exit
PB: predicated region body
PF: predicated region fallthrough
CT: control target
= control target key end

     0   :  { %vm47_vm0 = vcmask 523264   ;;  %s462_s0 = inlined_call_operand.vmem [shape: f32[78,64], index: 0, kind: input, shape index: {}]   ;;  %s463_s1 = inlined_call_operand.vmem [shape: f32[78,64], index: 1, kind: input, shape index: {}]   ;;  %s464_s2 = inlined_call_operand.vmem [shape: f32[1,64], index: 2, kind: input, shape index: {}]   ;;  %s465_s3 = inlined_call_operand.vmem [shape: f32[1,64], index: 3, kind: input, shape index: {}]   ;;  %s466_s4 = inlined_call_operand.vmem [shape: f32[78,64], index: 4, kind: output, shape index: {}]  }
   0x1   :  { %v17_v0 = vld [vmem:[%s462_s0] sm:$0xff]  ;;  %v19_v2 = vld [vmem:[%s462_s0 + $0x10] sm:$0xff]  ;;  %v18_v5 = vld [vmem:[%s462_s0 + $0x8] sm:$0xff] }
   0x2   :  { %v27_v1 = vld [vmem:[%s463_s1] sm:$0xff]  ;;  %v29_v4 = vld [vmem:[%s463_s1 + $0x10] sm:$0xff]  ;;  %v28_v6 = vld [vmem:[%s463_s1 + $0x8] sm:$0xff] }
   0x3   :  { %v37_v3 = vadd.f32 %v27_v1, %v17_v0  ;;  %v39_v7 = vadd.f32 %v29_v4, %v19_v2  ;;  %v38_v8 = vadd.f32 %v28_v6, %v18_v5  ;;  %v20_v9 = vld [vmem:[%s462_s0 + $0x18] sm:$0xff]  ;;  %v21_v11 = vld [vmem:[%s462_s0 + $0x20] sm:$0xff]  ;;  %v22_v15 = vld [vmem:[%s462_s0 + $0x28] sm:$0xff] }
   0x4   :  { %v30_v10 = vld [vmem:[%s463_s1 + $0x18] sm:$0xff]  ;;  %v31_v14 = vld [vmem:[%s463_s1 + $0x20] sm:$0xff]  ;;  %v32_v16 = vld [vmem:[%s463_s1 + $0x28] sm:$0xff] }
   0x5   :  { %v48_v12 = vsel %vm47_vm0, %v37_v3, 0.0  ;;  %v40_v13 = vadd.f32 %v30_v10, %v20_v9  ;;  %v54_v17 = vsel %vm47_vm0, %v39_v7, 0.0  ;;  %v51_v18 = vsel %vm47_vm0, %v38_v8, 0.0  ;;  %v23_v22 = vld [vmem:[%s462_s0 + $0x30] sm:$0xff]  ;;  %v24_v24 = vld [vmem:[%s462_s0 + $0x38] sm:$0xff]  ;;  %v25_v30 = vld [vmem:[%s462_s0 + $0x40] sm:$0xff] }
   0x6   :  { %49 = vadd.xlane.f32.xlu0 %v48_v12  ;;  %55 = vadd.xlane.f32.xlu1 %v54_v17  ;;  %v41_v19 = vadd.f32 %v31_v14, %v21_v11  ;;  %v42_v21 = vadd.f32 %v32_v16, %v22_v15  ;;  %v33_v23 = vld [vmem:[%s463_s1 + $0x30] sm:$0xff]  ;;  %v34_v25 = vld [vmem:[%s463_s1 + $0x38] sm:$0xff]  ;;  %v35_v31 = vld [vmem:[%s463_s1 + $0x40] sm:$0xff] }
   0x7   :  { %v57_v20 = vsel %vm47_vm0, %v40_v13, 0.0  ;;  %v43_v27 = vadd.f32 %v33_v23, %v23_v22  ;;  %v44_v29 = vadd.f32 %v34_v25, %v24_v24  ;;  %v26_v32 = vld [vmem:[%s462_s0 + $0x48] sm:$0xff]  ;;  %v45_v35 = vadd.f32 %v35_v31, %v25_v30 }
   0x8   :  { %v60_v26 = vsel %vm47_vm0, %v41_v19, 0.0  ;;  %v63_v28 = vsel %vm47_vm0, %v42_v21, 0.0  ;;  %v36_v33 = vld [vmem:[%s463_s1 + $0x48] sm:$0xff] }
   0x9   :  { %v66_v34 = vsel %vm47_vm0, %v43_v27, 0.0  ;;  %v69_v36 = vsel %vm47_vm0, %v44_v29, 0.0  ;;  %v46_v37 = vadd.f32 %v36_v33, %v26_v32  ;;  %v72_v38 = vsel %vm47_vm0, %v45_v35, 0.0 }
   0xa   :  { %52 = vadd.xlane.f32.xlu0 %v51_v18  ;;  %58 = vadd.xlane.f32.xlu1 %v57_v20 }
   0xb   :  { %v75_v39 = vsel %vm47_vm0, %v46_v37, 0.0 }
   0xe   :  { %61 = vadd.xlane.f32.xlu0 %v60_v26  ;;  %64 = vadd.xlane.f32.xlu1 %v63_v28 }
  0x12   :  { %67 = vadd.xlane.f32.xlu0 %v66_v34  ;;  %70 = vadd.xlane.f32.xlu1 %v69_v36 }
  0x16   :  { %73 = vadd.xlane.f32.xlu0 %v72_v38  ;;  %76 = vadd.xlane.f32.xlu1 %v75_v39 }
  0x93   :  { %v50_v40 = vpop.xlane.xlu0 %49  ;;  %v56_v42 = vpop.xlane.xlu1 %55 }
  0x94   :  { %v79_v41 = vmul.f32 0.015625, %v50_v40  ;;  %v81_v43 = vmul.f32 0.015625, %v56_v42 }
  0x96   :  { %v344_v44 = vsub.f32 %v37_v3, %v79_v41  ;;  %v346_v45 = vsub.f32 %v39_v7, %v81_v43 }
  0x97   :  { %v53_v46 = vpop.xlane.xlu0 %52  ;;  %v59_v48 = vpop.xlane.xlu1 %58 }
  0x98   :  { %v80_v47 = vmul.f32 0.015625, %v53_v46  ;;  %v99_v49 = vmul.f32 %v344_v44, %v344_v44  ;;  %v82_v50 = vmul.f32 0.015625, %v59_v48  ;;  %v101_v51 = vmul.f32 %v346_v45, %v346_v45  ;;  %v397_v48 = vld [vmem:[%s464_s2] ss:$0 sm:$0xff] }
  0x9a   :  { %v352_v52 = vsub.f32 %v38_v8, %v80_v47  ;;  %v109_v53 = vsel %vm47_vm0, %v99_v49, 0.0  ;;  %v355_v54 = vsub.f32 %v40_v13, %v82_v50  ;;  %v115_v58 = vsel %vm47_vm0, %v101_v51, 0.0 }
  0x9b   :  { %110 = vadd.xlane.f32.xlu0 %v109_v53  ;;  %v62_v55 = vpop.xlane.xlu0 %61  ;;  %v65_v57 = vpop.xlane.xlu1 %64 }
  0x9c   :  { %v83_v56 = vmul.f32 0.015625, %v62_v55  ;;  %v100_v59 = vmul.f32 %v352_v52, %v352_v52  ;;  %v84_v60 = vmul.f32 0.015625, %v65_v57  ;;  %v102_v61 = vmul.f32 %v355_v54, %v355_v54 }
  0x9e   :  { %v362_v62 = vsub.f32 %v41_v19, %v83_v56  ;;  %v112_v63 = vsel %vm47_vm0, %v100_v59, 0.0  ;;  %v365_v0 = vsub.f32 %v42_v21, %v84_v60  ;;  %v118_v4 = vsel %vm47_vm0, %v102_v61, 0.0  ;;  %v228_v56 = vld [vmem:[%s465_s3] ss:$0 sm:$0xff] }
  0x9f   :  { %116 = vadd.xlane.f32.xlu0 %v115_v58  ;;  %113 = vadd.xlane.f32.xlu1 %v112_v63  ;;  %v68_v1 = vpop.xlane.xlu0 %67  ;;  %v71_v3 = vpop.xlane.xlu1 %70 }
  0xa0   :  { %v85_v2 = vmul.f32 0.015625, %v68_v1  ;;  %v103_v5 = vmul.f32 %v362_v62, %v362_v62  ;;  %v86_v6 = vmul.f32 0.015625, %v71_v3  ;;  %v104_v7 = vmul.f32 %v365_v0, %v365_v0 }
  0xa2   :  { %v372_v8 = vsub.f32 %v43_v27, %v85_v2  ;;  %v121_v9 = vsel %vm47_vm0, %v103_v5, 0.0  ;;  %v375_v10 = vsub.f32 %v44_v29, %v86_v6  ;;  %v124_v14 = vsel %vm47_vm0, %v104_v7, 0.0 }
  0xa3   :  { %119 = vadd.xlane.f32.xlu1 %v118_v4  ;;  %122 = vadd.xlane.f32.xlu0 %v121_v9  ;;  %v74_v11 = vpop.xlane.xlu0 %73  ;;  %v77_v13 = vpop.xlane.xlu1 %76 }
  0xa4   :  { %v87_v12 = vmul.f32 0.015625, %v74_v11  ;;  %v105_v15 = vmul.f32 %v372_v8, %v372_v8  ;;  %v88_v16 = vmul.f32 0.015625, %v77_v13  ;;  %v106_v17 = vmul.f32 %v375_v10, %v375_v10 }
  0xa6   :  { %v382_v18 = vsub.f32 %v45_v35, %v87_v12  ;;  %v127_v19 = vsel %vm47_vm0, %v105_v15, 0.0  ;;  %v385_v20 = vsub.f32 %v46_v37, %v88_v16  ;;  %v130_v21 = vsel %vm47_vm0, %v106_v17, 0.0 }
  0xa7   :  { %125 = vadd.xlane.f32.xlu1 %v124_v14  ;;  %128 = vadd.xlane.f32.xlu0 %v127_v19 }
  0xa8   :  { %v107_v22 = vmul.f32 %v382_v18, %v382_v18  ;;  %v108_v23 = vmul.f32 %v385_v20, %v385_v20 }
  0xaa   :  { %v133_v24 = vsel %vm47_vm0, %v107_v22, 0.0  ;;  %v136_v25 = vsel %vm47_vm0, %v108_v23, 0.0 }
  0xab   :  { %131 = vadd.xlane.f32.xlu1 %v130_v21  ;;  %134 = vadd.xlane.f32.xlu0 %v133_v24 }
  0xaf   :  { %137 = vadd.xlane.f32.xlu1 %v136_v25 }
 0x128   :  { %v111_v26 = vpop.xlane.xlu0 %110 }
 0x129   :  { %v139_v27 = vmul.f32 0.015625, %v111_v26 }
 0x12b   :  { %v149_v28 = vadd.f32 1e-05, %v139_v27 }
 0x12c   :  { %v114_v29 = vpop.xlane.xlu1 %113  ;;  %v117_v30 = vpop.xlane.xlu0 %116 }
 0x12d   :  { %229 = vrsqrt.f32 %v149_v28  ;;  %v140_v31 = vmul.f32 0.015625, %v114_v29  ;;  %v141_v32 = vmul.f32 0.015625, %v117_v30 }
 0x12f   :  { %v150_v33 = vadd.f32 1e-05, %v140_v31  ;;  %v151_v34 = vadd.f32 1e-05, %v141_v32 }
 0x130   :  { %v120_v35 = vpop.xlane.xlu1 %119  ;;  %v123_v36 = vpop.xlane.xlu0 %122 }
 0x131   :  { %231 = vrsqrt.f32 %v150_v33  ;;  %v142_v37 = vmul.f32 0.015625, %v120_v35  ;;  %v143_v38 = vmul.f32 0.015625, %v123_v36 }
 0x132   :  { %233 = vrsqrt.f32 %v151_v34 }
 0x133   :  { %v152_v39 = vadd.f32 1e-05, %v142_v37  ;;  %v153_v40 = vadd.f32 1e-05, %v143_v38 }
 0x134   :  { %v126_v41 = vpop.xlane.xlu1 %125  ;;  %v129_v42 = vpop.xlane.xlu0 %128 }
 0x135   :  { %235 = vrsqrt.f32 %v152_v39  ;;  %v144_v43 = vmul.f32 0.015625, %v126_v41  ;;  %v145_v46 = vmul.f32 0.015625, %v129_v42 }
 0x136   :  { %237 = vrsqrt.f32 %v153_v40 }
 0x137   :  { %v230_v47 = vpop.eup %229  ;;  %v154_v49 = vadd.f32 1e-05, %v144_v43  ;;  %v155_v50 = vadd.f32 1e-05, %v145_v46 }
 0x138   :  { %v169_v51 = vmul.f32 %v230_v47, %v344_v44  ;;  %v132_v53 = vpop.xlane.xlu1 %131  ;;  %v135_v55 = vpop.xlane.xlu0 %134 }
 0x139   :  { %239 = vrsqrt.f32 %v154_v49  ;;  %v146_v57 = vmul.f32 0.015625, %v132_v53  ;;  %v147_v58 = vmul.f32 0.015625, %v135_v55 }
 0x13a   :  { %v186_v59 = vmul.f32 %v397_v48, %v169_v51  ;;  %241 = vrsqrt.f32 %v155_v50 }
 0x13b   :  { %v232_v60 = vpop.eup %231  ;;  %v156_v61 = vadd.f32 1e-05, %v146_v57  ;;  %v157_v63 = vadd.f32 1e-05, %v147_v58 }
 0x13c   :  { %v234_v1 = vpop.eup %233  ;;  %v203_v2 = vadd.f32 %v228_v56, %v186_v59  ;;  %v170_v3 = vmul.f32 %v232_v60, %v352_v52  ;;  %v138_v44 = vpop.xlane.xlu1 %137 }
 0x13d   :  { %v171_v4 = vmul.f32 %v234_v1, %v346_v45  ;;  %243 = vrsqrt.f32 %v156_v61  ;;  %v148_v5 = vmul.f32 0.015625, %v138_v44 }
 0x13e   :  { %213 = vst.msk [vmem:[%s466_s4] sm:$0xff] %vm47_vm0, %v203_v2  ;;  %v187_v6 = vmul.f32 %v397_v48, %v170_v3  ;;  %245 = vrsqrt.f32 %v157_v63 }
 0x13f   :  { %v236_v7 = vpop.eup %235  ;;  %v188_v9 = vmul.f32 %v397_v48, %v171_v4  ;;  %v158_v11 = vadd.f32 1e-05, %v148_v5 }
 0x140   :  { %v238_v12 = vpop.eup %237  ;;  %v204_v13 = vadd.f32 %v228_v56, %v187_v6  ;;  %v172_v52 = vmul.f32 %v236_v7, %v355_v54 }
 0x141   :  { %v205_v14 = vadd.f32 %v228_v56, %v188_v9  ;;  %v173_v45 = vmul.f32 %v238_v12, %v362_v62  ;;  %247 = vrsqrt.f32 %v158_v11 }
 0x142   :  { %214 = vst.msk [vmem:[%s466_s4 + $0x8] sm:$0xff] %vm47_vm0, %v204_v13  ;;  %v189_v15 = vmul.f32 %v397_v48, %v172_v52 }
 0x143   :  { %v240_v16 = vpop.eup %239  ;;  %215 = vst.msk [vmem:[%s466_s4 + $0x10] sm:$0xff] %vm47_vm0, %v205_v14  ;;  %v190_v17 = vmul.f32 %v397_v48, %v173_v45 }
 0x144   :  { %v242_v54 = vpop.eup %241  ;;  %v206_v19 = vadd.f32 %v228_v56, %v189_v15  ;;  %v174_v62 = vmul.f32 %v240_v16, %v365_v0 }
 0x145   :  { %v207_v21 = vadd.f32 %v228_v56, %v190_v17  ;;  %v175_v22 = vmul.f32 %v242_v54, %v372_v8 }
 0x146   :  { %216 = vst.msk [vmem:[%s466_s4 + $0x18] sm:$0xff] %vm47_vm0, %v206_v19  ;;  %v191_v23 = vmul.f32 %v397_v48, %v174_v62 }
 0x147   :  { %v244_v24 = vpop.eup %243  ;;  %217 = vst.msk [vmem:[%s466_s4 + $0x20] sm:$0xff] %vm47_vm0, %v207_v21  ;;  %v192_v25 = vmul.f32 %v397_v48, %v175_v22 }
 0x148   :  { %v246_v26 = vpop.eup %245  ;;  %v208_v0 = vadd.f32 %v228_v56, %v191_v23  ;;  %v176_v27 = vmul.f32 %v244_v24, %v375_v10 }
 0x149   :  { %v209_v8 = vadd.f32 %v228_v56, %v192_v25  ;;  %v177_v28 = vmul.f32 %v246_v26, %v382_v18 }
 0x14a   :  { %218 = vst.msk [vmem:[%s466_s4 + $0x28] sm:$0xff] %vm47_vm0, %v208_v0  ;;  %v193_v29 = vmul.f32 %v397_v48, %v176_v27 }
 0x14b   :  { %v248_v30 = vpop.eup %247  ;;  %219 = vst.msk [vmem:[%s466_s4 + $0x30] sm:$0xff] %vm47_vm0, %v209_v8  ;;  %v194_v31 = vmul.f32 %v397_v48, %v177_v28 }
 0x14c   :  { %v210_v32 = vadd.f32 %v228_v56, %v193_v29  ;;  %v178_v10 = vmul.f32 %v248_v30, %v385_v20 }
 0x14d   :  { %v211_v33 = vadd.f32 %v228_v56, %v194_v31 }
 0x14e   :  { %220 = vst.msk [vmem:[%s466_s4 + $0x38] sm:$0xff] %vm47_vm0, %v210_v32  ;;  %v195_v18 = vmul.f32 %v397_v48, %v178_v10 }
 0x14f   :  { %221 = vst.msk [vmem:[%s466_s4 + $0x40] sm:$0xff] %vm47_vm0, %v211_v33 }
 0x150   :  { %v212_v34 = vadd.f32 %v228_v56, %v195_v18 }
 0x152   :  { %222 = vst.msk [vmem:[%s466_s4 + $0x48] sm:$0xff] %vm47_vm0, %v212_v34 }

// kernel: wav2vec2_forward.29
= control target key start
LH: loop header
LB: loop body
LE: loop exit
PB: predicated region body
PF: predicated region fallthrough
CT: control target
= control target key end

     0   :  { %s1538_s12 = smov 0   ;;  %s1540_s13 = smov 0   ;;  %s1750_s0 = inlined_call_operand.vmem [shape: bf16[2,4,47,16], index: 0, kind: input, shape index: {}]   ;;  %s1751_s1 = inlined_call_operand.vmem [shape: bf16[4,8,16,16], index: 1, kind: input, shape index: {}]   ;;  %s1752_s2 = inlined_call_operand.vmem [shape: f32[4,1,16], index: 2, kind: input, shape index: {}]   ;;  %s1753_s3 = inlined_call_operand.vmem [shape: f32[2,4,39,16], index: 3, kind: output, shape index: {}]  }
   0x1   :  { %s1542_s14 = smov 0   ;;  %s1544_s15 = smov 0  }
   0x2   :  { %s1546_s16 = smov 0  }
   0x3 LB: > { %s22_s17 = sadd.s32 1, %s1506_s14  ;;  %s25_s18 = sadd.s32 1, %s1510_s15  ;;  %s1514_s16 = sphi %s1546_s16, %s13_s16   ;;  %s1510_s15 = sphi %s1544_s15, %s1757_s15   ;;  %s1506_s14 = sphi %s1542_s14, %s1756_s14   ;;  %s1502_s13 = sphi %s1540_s13, %s1755_s13   ;;  %s1498_s12 = sphi %s1538_s12, %s1754_s12  }
   0x4   : > { %p23_p0 = scmp.ge.s32.totalorder %s22_s17, 4  ;;  %p1193_p1 = scmp.ge.s32.totalorder %s1514_s16, 1 }
   0x5   : > { %p175_p2 = scmp.lt.s32.totalorder %s1514_s16, 9 }
   0x6   : > { %s1759_s17 = smov (%p23_p0, %s22_s17), 0  ;;  %s1761_s18 = smov (!%p23_p0, %s25_s18), %s1510_s15 }
   0x7   : > { %p176_p3 = pnand %p1193_p1, %p175_p2  ;;  %p27_p4 = scmp.ge.s32.totalorder %s1761_s18, 2 }
   0x8   : > { %p217_p5 = scmp.lt.s32.totalorder (!%p176_p3), %s1498_s12, 3  ;;  %p215_p6 = scmp.lt.s32.totalorder (!%p176_p3), %s1502_s13, 1  ;;  %v1516_v0 = vmov (!%p176_p3), 0.0   ;;  %vm1517_vm0 = vmmov (!%p176_p3), 0   ;;  %vm295_vm1 = vcmask (!%p176_p3), 130048   ;;  %vm453_vm4 = vcmask (!%p176_p3), 1046528  }
   0x9   : > { %s1763_s18 = smov (%p27_p4, %s1761_s18), 0  ;;  %179 = sbr.rel (%p176_p3) target bundleno = 355 (0x163), region = 32 }
   0xa   : > { %1290 = vmatprep.subr.bf16.mxu0 (!%p176_p3), %v1516_v0  ;;  %1304 = vmatprep.subr.bf16.mxu1 (!%p176_p3), %v1516_v0  ;;  %vm265_vm2 = vsmask.f32 (!%p176_p3), 7424  ;;  %vm538_vm3 = vsmask.f32 (!%p176_p3), 6400  ;;  %vm737_vm5 = vsmask.f32 (!%p176_p3), 5376 }
   0xb   : > { %1306 = vmatprep.mubr.msk.bf16.mxu1 (!%p176_p3), %vm1517_vm0, %v1516_v0  ;;  %1292 = vmatprep.mubr.msk.bf16.mxu0 (!%p176_p3), %vm1517_vm0, %v1516_v0  ;;  %vm652_vm6 = vcmask (!%p176_p3), 1045504   ;;  %vm931_vm7 = vsmask.f32 (!%p176_p3), 4352  ;;  %vm846_vm8 = vcmask (!%p176_p3), 1044480   ;;  %vm1071_vm9 = vcmask (!%p176_p3), 129024  }
  0x10   : > { %s1765_s12 = smov (!%p217_p5, %s1498_s12), 3  ;;  %s1767_s13 = smov (!%p215_p6, %s1502_s13), 1 }
  0x11   : > { %s1257_s19 = sshll.u32 %s1765_s12, 6  ;;  %s1402_s20 = smul.u32 6, %s1765_s12 }
  0x12   : > { %s1583_s23 = scalar_lea.vmem %s1751_s1, %s1257_s19  ;;  %s1403_s24 = smul.u32 24, %s1767_s13 }
  0x13   : > { %v1448_v1 = vld [vmem:[%s1583_s23 + $0x8] sm:$0xff]   ;;  %v1449_v2 = vld [vmem:[%s1583_s23] sm:$0xff]   ;;  %v1453_v3 = vld [vmem:[%s1583_s23 + $0x18] sm:$0xff]   ;;  %s231_s5 = scalar_lea.vmem %s1752_s2, %s1765_s12  ;;  %s1404_s6 = smul.u32 5, %s1765_s12 }
  0x14   : > { %s221_s25 = sadd.s32 %s1403_s24, %s1402_s20  ;;  %1291 = vmatpush3.bf16.msra.mxu0 %v1448_v1  ;;  %1305 = vmatpush3.bf16.msra.mxu1 %v1449_v2  ;;  %v1452_v15 = vld [vmem:[%s1583_s23 + $0x10] sm:$0xff]   ;;  %v1458_v42 = vld [vmem:[%s1583_s23 + $0x28] sm:$0xff]   ;;  %v1457_v50 = vld [vmem:[%s1583_s23 + $0x20] sm:$0xff]   ;;  %s1405_s7 = smul.u32 20, %s1767_s13 }
  0x15   : > { %s1194_s26 = sshll.u32 %s221_s25, 2  ;;  %1318 = vmatprep.subr.bf16.mxu0 %v1516_v0  ;;  %1332 = vmatprep.subr.bf16.mxu1 %v1516_v0 }
  0x16   : > { %s1591_s29 = scalar_lea.vmem %s1750_s0, %s1194_s26  ;;  %s238_s8 = sadd.s32 %s1405_s7, %s1404_s6 }
  0x17   : > { %v1450_v4 = vld [vmem:[%s1591_s29] sm:$0xff]   ;;  %v1451_v5 = vld [vmem:[%s1591_s29 + $0x8] sm:$0xff]   ;;  %v1454_v8 = vld [vmem:[%s1591_s29 + $0x10] ss:$0 sps:$4 sm:$0xff]   ;;  %s1197_s9 = sshll.u32 %s238_s8, 3 }
  0x18   : > { %1307 = vmatmul.mubr.msk.bf16.vlgmr.msra.gmra.mrb[0].mxu1 %vm295_vm1, %v1450_v4  ;;  %v267_v6 = vshrl.u32 %v1450_v4, 16  ;;  %v269_v7 = vshll.u32 %v1450_v4, 16  ;;  %v274_v9 = vshll.u32 %v1451_v5, 16  ;;  %v429_v10 = vld [vmem:[%s1591_s29] sm:$0xe]  ;;  %v278_v16 = vshrl.u32 %v1451_v5, 16  ;;  %s240_s12 = scalar_lea.vmem %s1753_s3, %s1197_s9 }
  0x19   : > { %1333 = vmatpush3.bf16.msra.mxu1 %v1453_v3  ;;  %1310 = vmatprep.mubr.msk.bf16.mxu1 %vm1517_vm0, %v1516_v0  ;;  %v1604_v12 = vld [vmem:[%s1591_s29 + $0x4] sm:$0xf]  ;;  %v282_v17 = vshll.u32 %v1454_v8, 16  ;;  %v1611_v20 = vld [vmem:[%s1591_s29 + $0x8] sm:$0xff]   ;;  %v1627_v27 = vld [vmem:[%s1591_s29 + $0x10] sm:$0xf] }
  0x1a   : > { %v271_v11 = vrot.slane %v269_v7, 1  ;;  %1360 = vmatprep.subr.bf16.mxu1 %v1516_v0  ;;  %v276_v13 = vrot.slane %v274_v9, 1  ;;  %v1213_v18 = vcombine.low %v429_v10, %v1604_v12  ;;  %v1621_v25 = vshrl.u32 %v1611_v20, 16  ;;  %v434_v28 = vld [vmem:[%s1591_s29 + $0x14] sm:$0x1] }
  0x1b   : > { %v284_v22 = vrot.slane %v282_v17, 1  ;;  %v1624_v26 = vshll.u32 %v1611_v20, 16  ;;  %v1215_v34 = vcombine.low %v1627_v27, %v434_v28  ;;  %v286_v35 = vshrl.u32 %v1454_v8, 16  ;;  %v641_v48 = vld [vmem:[%s1591_s29] sm:$0xc] }
  0x1c   : > { %v272_v14 = vor.u32 %v271_v11, %v267_v6  ;;  %v280_v21 = vor.u32 %v278_v16, %v276_v13  ;;  %v540_v23 = vshrl.u32 %v1213_v18, 16  ;;  %v543_v24 = vshll.u32 %v1213_v18, 16  ;;  %v642_v56 = vld [vmem:[%s1591_s29 + $0x14] sm:$0x3]  ;;  %v835_v11 = vld [vmem:[%s1591_s29] sm:$0x8] }
  0x1d   : > { %v550_v32 = vrot.slane %v1621_v25, 1  ;;  %v553_v33 = vrot.slane %v1624_v26, 2  ;;  %v557_v38 = vshrl.u32 %v1215_v34, 16  ;;  %v560_v39 = vshll.u32 %v1215_v34, 16 }
  0x1e   : > { %v277_v19 = vsel %vm265_vm2, %v272_v14, %v276_v13  ;;  %v285_v29 = vsel %vm265_vm2, %v280_v21, %v284_v22  ;;  %v542_v30 = vrot.slane %v540_v23, 1  ;;  %v545_v31 = vrot.slane %v543_v24, 2  ;;  %v1461_v14 = vld [vmem:[%s1583_s23 + $0x30] sm:$0xff]  }
  0x1f   : > { %1293 = vmatmul.mubr.msk.bf16.vlgmr.msra.gmra.mrb[0].mxu0 %vm295_vm1, %v277_v19  ;;  %v554_v37 = vor.u32 %v553_v33, %v550_v32  ;;  %v288_v40 = vor.u32 %v286_v35, %v284_v22  ;;  %v559_v43 = vrot.slane %v557_v38, 1  ;;  %v562_v44 = vrot.slane %v560_v39, 2  ;;  %v836_v21 = vld [vmem:[%s1591_s29 + $0x14] sm:$0x7] }
  0x20   : > { %1319 = vmatpush3.bf16.msra.mxu0 %v1452_v15  ;;  %1296 = vmatprep.mubr.msk.bf16.mxu0 %vm1517_vm0, %v1516_v0  ;;  %v546_v36 = vor.u32 %v545_v31, %v542_v30  ;;  %v454_v45 = vrot.slane %v1213_v18, 1  ;;  %v455_v46 = vrot.slane %v1611_v20, 1  ;;  %v1228_v52 = vcombine.low %v641_v48, %v1604_v12 }
  0x21   : > { %1311 = vmatmul.mubr.msk.bf16.gmra.mrb[4].mxu1 %vm295_vm1, %v1451_v5  ;;  %1346 = vmatprep.subr.bf16.mxu0 %v1516_v0  ;;  %v563_v47 = vor.u32 %v562_v44, %v559_v43  ;;  %v457_v53 = vrot.slane %v1215_v34, 1  ;;  %v746_v58 = vrot.slane %v1621_v25, 2  ;;  %v747_v61 = vrot.slane %v1624_v26, 3  ;;  %v1462_v5 = vld [vmem:[%s1583_s23 + $0x38] sm:$0xff]  }
  0x22   : > { %1314 = vmatprep.mubr.msk.bf16.mxu1 %vm1517_vm0, %v1516_v0  ;;  %v555_v41 = vsel %vm538_vm3, %v546_v36, %v554_v37  ;;  %v456_v49 = vsel %vm453_vm4, %v454_v45, %v455_v46  ;;  %v739_v54 = vshrl.u32 %v1228_v52, 16  ;;  %v742_v55 = vshll.u32 %v1228_v52, 16 }
  0x23   : > { %v564_v51 = vsel %vm538_vm3, %v554_v37, %v563_v47  ;;  %v458_v57 = vsel %vm453_vm4, %v455_v46, %v457_v53  ;;  %v1229_v62 = vcombine.low %v1627_v27, %v642_v56  ;;  %v748_v1 = vor.u32 %v747_v61, %v746_v58 }
  0x24   : > { %v741_v59 = vrot.slane %v739_v54, 2  ;;  %v744_v60 = vrot.slane %v742_v55, 3  ;;  %v654_v9 = vrot.slane %v1611_v20, 2  ;;  %v1242_v16 = vcombine.low %v835_v11, %v1604_v12 }
  0x25   : > { %v751_v2 = vshrl.u32 %v1229_v62, 16  ;;  %v754_v3 = vshll.u32 %v1229_v62, 16  ;;  %v656_v17 = vrot.slane %v1229_v62, 2  ;;  %v940_v23 = vrot.slane %v1621_v25, 3 }
  0x26   : > { %v745_v63 = vor.u32 %v744_v60, %v741_v59  ;;  %v933_v18 = vshrl.u32 %v1242_v16, 16  ;;  %v936_v19 = vshll.u32 %v1242_v16, 16  ;;  %v941_v28 = vrot.slane %v1624_v26, 4 }
  0x27   : > { %1297 = vmatmul.mubr.msk.bf16.gmra.mrb[4].mxu0 %vm295_vm1, %v285_v29  ;;  %v753_v6 = vrot.slane %v751_v2, 2  ;;  %v756_v7 = vrot.slane %v754_v3, 3  ;;  %v657_v22 = vsel %vm652_vm6, %v654_v9, %v656_v17  ;;  %v1243_v29 = vcombine.low %v1627_v27, %v836_v21 }
  0x28   : > { %1300 = vmatprep.mubr.msk.bf16.mxu0 %vm1517_vm0, %v1516_v0  ;;  %v749_v4 = vsel %vm737_vm5, %v745_v63, %v748_v1  ;;  %v935_v12 = vrot.slane %v933_v18, 3  ;;  %v938_v24 = vrot.slane %v936_v19, 4  ;;  %v942_v31 = vor.u32 %v941_v28, %v940_v23 }
  0x29   : > { %1315 = vmatmul.mubr.msk.bf16.gmra.mrb[8].mxu1 %vm295_vm1, %v1454_v8  ;;  %v653_v8 = vrot.slane %v1228_v52, 2  ;;  %v757_v10 = vor.u32 %v756_v7, %v753_v6  ;;  %v945_v32 = vshrl.u32 %v1243_v29, 16  ;;  %v948_v25 = vshll.u32 %v1243_v29, 16 }
  0x2a   : > { %1334 = vmatprep.mubr.msk.bf16.mxu1 %vm1517_vm0, %v1516_v0  ;;  %v939_v30 = vor.u32 %v938_v24, %v935_v12  ;;  %v847_v27 = vrot.slane %v1242_v16, 3  ;;  %v848_v35 = vrot.slane %v1611_v20, 3  ;;  %v850_v39 = vrot.slane %v1243_v29, 3 }
  0x2b   : > { %v655_v13 = vsel %vm652_vm6, %v653_v8, %v654_v9  ;;  %v758_v15 = vsel %vm737_vm5, %v748_v1, %v757_v10  ;;  %v947_v34 = vrot.slane %v945_v32, 3  ;;  %v950_v26 = vrot.slane %v948_v25, 4 }
  0x2c   : > { %v943_v33 = vsel %vm931_vm7, %v939_v30, %v942_v31  ;;  %v849_v37 = vsel %vm846_vm8, %v847_v27, %v848_v35  ;;  %v851_v20 = vsel %vm846_vm8, %v848_v35, %v850_v39 }
  0x2d   : > { %v951_v36 = vor.u32 %v950_v26, %v947_v34 }
  0x2f   : > { %1301 = vmatmul.mubr.msk.bf16.gmra.mrb[8].mxu0 %vm295_vm1, %v288_v40  ;;  %v952_v38 = vsel %vm931_vm7, %v942_v31, %v951_v36 }
  0x30   : > { %1320 = vmatprep.mubr.msk.bf16.mxu0 %vm1517_vm0, %v1516_v0 }
  0x31   : > { %1335 = vmatmul.mubr.msk.bf16.vlgmr.msra.gmra.mrb[12].mxu1 %vm295_vm1, %v555_v41 }
  0x32   : > { %1361 = vmatpush3.bf16.msra.mxu1 %v1458_v42  ;;  %1338 = vmatprep.mubr.msk.bf16.mxu1 %vm1517_vm0, %v1516_v0 }
  0x33   : > { %1388 = vmatprep.subr.bf16.mxu1 %v1516_v0 }
  0x37   : > { %1321 = vmatmul.mubr.msk.bf16.vlgmr.msra.gmra.mrb[12].mxu0 %vm295_vm1, %v456_v49 }
  0x38   : > { %1347 = vmatpush3.bf16.msra.mxu0 %v1457_v50  ;;  %1324 = vmatprep.mubr.msk.bf16.mxu0 %vm1517_vm0, %v1516_v0 }
  0x39   : > { %1339 = vmatmul.mubr.msk.bf16.gmra.mrb[16].mxu1 %vm295_vm1, %v564_v51  ;;  %1374 = vmatprep.subr.bf16.mxu0 %v1516_v0 }
  0x3a   : > { %1342 = vmatprep.mubr.msk.bf16.mxu1 %vm1517_vm0, %v1516_v0 }
  0x3f   : > { %1325 = vmatmul.mubr.msk.bf16.gmra.mrb[16].mxu0 %vm295_vm1, %v458_v57 }
  0x40   : > { %1328 = vmatprep.mubr.msk.bf16.mxu0 %vm1517_vm0, %v1516_v0 }
  0x41   : > { %1343 = vmatmul.mubr.msk.bf16.gmra.mrb[20].mxu1 %vm295_vm1, %v563_v47 }
  0x42   : > { %1362 = vmatprep.mubr.msk.bf16.mxu1 %vm1517_vm0, %v1516_v0 }
  0x47   : > { %1329 = vmatmul.mubr.msk.bf16.gmra.mrb[20].mxu0 %vm295_vm1, %v457_v53 }
  0x48   : > { %1348 = vmatprep.mubr.msk.bf16.mxu0 %vm1517_vm0, %v1516_v0 }
  0x49   : > { %1363 = vmatmul.mubr.msk.bf16.vlgmr.msra.gmra.mrb[24].mxu1 %vm295_vm1, %v749_v4 }
  0x4a   : > { %1389 = vmatpush3.bf16.msra.mxu1 %v1462_v5  ;;  %1366 = vmatprep.mubr.msk.bf16.mxu1 %vm1517_vm0, %v1516_v0 }
  0x4f   : > { %1349 = vmatmul.mubr.msk.bf16.vlgmr.msra.gmra.mrb[24].mxu0 %vm295_vm1, %v655_v13 }
  0x50   : > { %1375 = vmatpush3.bf16.msra.mxu0 %v1461_v14  ;;  %1352 = vmatprep.mubr.msk.bf16.mxu0 %vm1517_vm0, %v1516_v0 }
  0x51   : > { %1367 = vmatmul.mubr.msk.bf16.gmra.mrb[28].mxu1 %vm295_vm1, %v758_v15 }
  0x52   : > { %1370 = vmatprep.mubr.msk.bf16.mxu1 %vm1517_vm0, %v1516_v0 }
  0x57   : > { %1353 = vmatmul.mubr.msk.bf16.gmra.mrb[28].mxu0 %vm295_vm1, %v657_v22 }
  0x58   : > { %1356 = vmatprep.mubr.msk.bf16.mxu0 %vm1517_vm0, %v1516_v0 }
  0x59   : > { %1371 = vmatmul.mubr.msk.bf16.gmra.mrb[32].mxu1 %vm295_vm1, %v757_v10 }
  0x5a   : > { %1390 = vmatprep.mubr.msk.bf16.mxu1 %vm1517_vm0, %v1516_v0 }
  0x5f   : > { %1357 = vmatmul.mubr.msk.bf16.gmra.mrb[32].mxu0 %vm295_vm1, %v656_v17 }
  0x60   : > { %1376 = vmatprep.mubr.msk.bf16.mxu0 %vm1517_vm0, %v1516_v0 }
  0x61   : > { %1391 = vmatmul.mubr.msk.bf16.vlgmr.msra.gmra.mrb[36].mxu1 %vm295_vm1, %v943_v33 }
  0x62   : > { %1394 = vmatprep.mubr.msk.bf16.mxu1 %vm1517_vm0, %v1516_v0 }
  0x67   : > { %1377 = vmatmul.mubr.msk.bf16.vlgmr.msra.gmra.mrb[36].mxu0 %vm295_vm1, %v849_v37 }
  0x68   : > { %1380 = vmatprep.mubr.msk.bf16.mxu0 %vm1517_vm0, %v1516_v0 }
  0x69   : > { %1395 = vmatmul.mubr.msk.bf16.gmra.mrb[40].mxu1 %vm295_vm1, %v952_v38 }
  0x6a   : > { %1398 = vmatprep.mubr.msk.bf16.mxu1 %vm1517_vm0, %v1516_v0 }
  0x6f   : > { %1381 = vmatmul.mubr.msk.bf16.gmra.mrb[40].mxu0 %vm295_vm1, %v851_v20 }
  0x70   : > { %1384 = vmatprep.mubr.msk.bf16.mxu0 %vm1517_vm0, %v1516_v0 }
  0x71   : > { %1399 = vmatmul.mubr.msk.bf16.gmra.mrb[44].mxu1 %vm295_vm1, %v951_v36 }
  0x77   : > { %1385 = vmatmul.mubr.msk.bf16.gmra.mrb[44].mxu0 %vm295_vm1, %v850_v39 }
  0xeb   : > { %v407_v40 = vpop.f32.mrb[0].mxu1 }
  0xec   : > { %v1308_v41 = vpop.f32.mrb[1].mxu1 }
  0xed   : > { %v410_v42 = vpop.f32.mrb[2].mxu1 }
  0xee   : > { %v1309_v43 = vpop.f32.mrb[3].mxu1 }
  0xf2   : > { %v339_v44 = vpop.f32.mrb[0].mxu0 }
  0xf3   : > { %v408_v45 = vadd.f32 %v407_v40, %v339_v44  ;;  %v1294_v46 = vpop.f32.mrb[1].mxu0 }
  0xf4   : > { %v342_v47 = vpop.f32.mrb[2].mxu0  ;;  %v415_v48 = vpop.f32.mrb[4].mxu1 }
  0xf5   : > { %v411_v49 = vadd.f32 %v410_v42, %v342_v47  ;;  %v1295_v50 = vpop.f32.mrb[3].mxu0  ;;  %v1312_v51 = vpop.f32.mrb[5].mxu1 }
  0xf6   : > { %v418_v52 = vpop.f32.mrb[6].mxu1 }
  0xf7   : > { %v1313_v53 = vpop.f32.mrb[7].mxu1 }
  0xfa   : > { %v347_v54 = vpop.f32.mrb[4].mxu0 }
  0xfb   : > { %v416_v0 = vadd.f32 %v415_v48, %v347_v54  ;;  %v1298_v55 = vpop.f32.mrb[5].mxu0 }
  0xfc   : > { %v350_v56 = vpop.f32.mrb[6].mxu0  ;;  %v423_v57 = vpop.f32.mrb[8].mxu1 }
  0xfd   : > { %v419_v58 = vadd.f32 %v418_v52, %v350_v56  ;;  %v1299_v59 = vpop.f32.mrb[7].mxu0  ;;  %v1316_v60 = vpop.f32.mrb[9].mxu1 }
  0xfe   : > { %v426_v61 = vpop.f32.mrb[10].mxu1 }
  0xff   : > { %v1317_v62 = vpop.f32.mrb[11].mxu1 }
 0x102   : > { %v355_v63 = vpop.f32.mrb[8].mxu0 }
 0x103   : > { %v424_v1 = vadd.f32 %v423_v57, %v355_v63  ;;  %v1302_v2 = vpop.f32.mrb[9].mxu0 }
 0x104   : > { %v358_v3 = vpop.f32.mrb[10].mxu0  ;;  %v614_v4 = vpop.f32.mrb[12].mxu1 }
 0x105   : > { %v1303_v5 = vpop.f32.mrb[11].mxu0  ;;  %v1336_v6 = vpop.f32.mrb[13].mxu1 }
 0x106   : > { %v617_v7 = vpop.f32.mrb[14].mxu1 }
 0x107   : > { %v1337_v8 = vpop.f32.mrb[15].mxu1 }
 0x10a   : > { %v508_v9 = vpop.f32.mrb[12].mxu0 }
 0x10b   : > { %v530_v10 = vadd.f32 %v508_v9, %v408_v45  ;;  %v1322_v11 = vpop.f32.mrb[13].mxu0 }
 0x10c   : > { %v511_v13 = vpop.f32.mrb[14].mxu0  ;;  %v622_v14 = vpop.f32.mrb[16].mxu1 }
 0x10d   : > { %v531_v15 = vadd.f32 %v511_v13, %v411_v49  ;;  %v1323_v16 = vpop.f32.mrb[15].mxu0  ;;  %v1340_v17 = vpop.f32.mrb[17].mxu1  ;;  %v636_v18 = vadd.f32 %v614_v4, %v530_v10 }
 0x10e   : > { %v625_v19 = vpop.f32.mrb[18].mxu1  ;;  %v1254_v17 = vld [vmem:[%s231_s5] ss:$0 sm:$0xff] }
 0x10f   : > { %v1341_v21 = vpop.f32.mrb[19].mxu1  ;;  %v637_v22 = vadd.f32 %v617_v7, %v531_v15 }
 0x112   : > { %v516_v23 = vpop.f32.mrb[16].mxu0 }
 0x113   : > { %v532_v12 = vadd.f32 %v516_v23, %v416_v0  ;;  %v1326_v24 = vpop.f32.mrb[17].mxu0 }
 0x114   : > { %v519_v28 = vpop.f32.mrb[18].mxu0  ;;  %v630_v29 = vpop.f32.mrb[20].mxu1 }
 0x115   : > { %v533_v30 = vadd.f32 %v519_v28, %v419_v58  ;;  %v1327_v31 = vpop.f32.mrb[19].mxu0  ;;  %v1344_v32 = vpop.f32.mrb[21].mxu1  ;;  %v638_v25 = vadd.f32 %v622_v14, %v532_v12 }
 0x116   : > { %v633_v33 = vpop.f32.mrb[22].mxu1 }
 0x117   : > { %v1345_v34 = vpop.f32.mrb[23].mxu1  ;;  %v639_v26 = vadd.f32 %v625_v19, %v533_v30 }
 0x11a   : > { %v524_v27 = vpop.f32.mrb[20].mxu0 }
 0x11b   : > { %v534_v35 = vadd.f32 %v524_v27, %v424_v1  ;;  %v1330_v36 = vpop.f32.mrb[21].mxu0 }
 0x11c   : > { %v527_v37 = vpop.f32.mrb[22].mxu0  ;;  %v808_v38 = vpop.f32.mrb[24].mxu1 }
 0x11d   : > { %v1331_v39 = vpop.f32.mrb[23].mxu0  ;;  %v1364_v20 = vpop.f32.mrb[25].mxu1  ;;  %v640_v40 = vadd.f32 %v630_v29, %v534_v35 }
 0x11e   : > { %v811_v41 = vpop.f32.mrb[26].mxu1 }
 0x11f   : > { %v1365_v42 = vpop.f32.mrb[27].mxu1 }
 0x122   : > { %v707_v43 = vpop.f32.mrb[24].mxu0 }
 0x123   : > { %v729_v44 = vadd.f32 %v707_v43, %v636_v18  ;;  %v1350_v45 = vpop.f32.mrb[25].mxu0 }
 0x124   : > { %v710_v46 = vpop.f32.mrb[26].mxu0  ;;  %v816_v47 = vpop.f32.mrb[28].mxu1 }
 0x125   : > { %v730_v48 = vadd.f32 %v710_v46, %v637_v22  ;;  %v1351_v49 = vpop.f32.mrb[27].mxu0  ;;  %v1368_v50 = vpop.f32.mrb[29].mxu1  ;;  %v830_v51 = vadd.f32 %v808_v38, %v729_v44 }
 0x126   : > { %v819_v52 = vpop.f32.mrb[30].mxu1 }
 0x127   : > { %v1369_v53 = vpop.f32.mrb[31].mxu1  ;;  %v831_v54 = vadd.f32 %v811_v41, %v730_v48 }
 0x12a   : > { %v715_v0 = vpop.f32.mrb[28].mxu0 }
 0x12b   : > { %v731_v55 = vadd.f32 %v715_v0, %v638_v25  ;;  %v1354_v56 = vpop.f32.mrb[29].mxu0 }
 0x12c   : > { %v718_v57 = vpop.f32.mrb[30].mxu0  ;;  %v824_v58 = vpop.f32.mrb[32].mxu1 }
 0x12d   : > { %v732_v59 = vadd.f32 %v718_v57, %v639_v26  ;;  %v1355_v60 = vpop.f32.mrb[31].mxu0  ;;  %v1372_v61 = vpop.f32.mrb[33].mxu1  ;;  %v832_v62 = vadd.f32 %v816_v47, %v731_v55 }
 0x12e   : > { %v827_v63 = vpop.f32.mrb[34].mxu1 }
 0x12f   : > { %v1373_v1 = vpop.f32.mrb[35].mxu1  ;;  %v833_v2 = vadd.f32 %v819_v52, %v732_v59 }
 0x132   : > { %v723_v3 = vpop.f32.mrb[32].mxu0 }
 0x133   : > { %v733_v4 = vadd.f32 %v723_v3, %v640_v40  ;;  %v1358_v5 = vpop.f32.mrb[33].mxu0 }
 0x134   : > { %v726_v6 = vpop.f32.mrb[34].mxu0  ;;  %v1002_v7 = vpop.f32.mrb[36].mxu1 }
 0x135   : > { %v1359_v8 = vpop.f32.mrb[35].mxu0  ;;  %v1392_v9 = vpop.f32.mrb[37].mxu1  ;;  %v834_v10 = vadd.f32 %v824_v58, %v733_v4 }
 0x136   : > { %v1005_v11 = vpop.f32.mrb[38].mxu1 }
 0x137   : > { %v1393_v13 = vpop.f32.mrb[39].mxu1 }
 0x13a   : > { %v901_v14 = vpop.f32.mrb[36].mxu0 }
 0x13b   : > { %v923_v15 = vadd.f32 %v901_v14, %v830_v51  ;;  %v1378_v16 = vpop.f32.mrb[37].mxu0 }
 0x13c   : > { %v904_v18 = vpop.f32.mrb[38].mxu0  ;;  %v1010_v19 = vpop.f32.mrb[40].mxu1 }
 0x13d   : > { %v1024_v21 = vadd.f32 %v1002_v7, %v923_v15  ;;  %v924_v22 = vadd.f32 %v904_v18, %v831_v54  ;;  %v1379_v23 = vpop.f32.mrb[39].mxu0  ;;  %v1396_v12 = vpop.f32.mrb[41].mxu1 }
 0x13e   : > { %v1013_v24 = vpop.f32.mrb[42].mxu1 }
 0x13f   : > { %v1036_v28 = vadd.f32 %v1254_v17, %v1024_v21  ;;  %v1025_v29 = vadd.f32 %v1005_v11, %v924_v22  ;;  %v1397_v30 = vpop.f32.mrb[43].mxu1 }
 0x141   : > { %v1047_v31 = vmul.f32 0.70710677, %v1036_v28  ;;  %v1037_v32 = vadd.f32 %v1254_v17, %v1025_v29  ;;  %v1041_v53 = vmul.f32 0.5, %v1036_v28 }
 0x142   : > { %v909_v25 = vpop.f32.mrb[40].mxu0 }
 0x143   : > { %1466 = verf.f32 %v1047_v31  ;;  %v1048_v33 = vmul.f32 0.70710677, %v1037_v32  ;;  %v925_v34 = vadd.f32 %v909_v25, %v832_v62  ;;  %v1382_v26 = vpop.f32.mrb[41].mxu0  ;;  %v1042_v57 = vmul.f32 0.5, %v1037_v32 }
 0x144   : > { %v912_v27 = vpop.f32.mrb[42].mxu0  ;;  %v1018_v35 = vpop.f32.mrb[44].mxu1 }
 0x145   : > { %1468 = verf.f32 %v1048_v33  ;;  %v1026_v36 = vadd.f32 %v1010_v19, %v925_v34  ;;  %v926_v37 = vadd.f32 %v912_v27, %v833_v2  ;;  %v1383_v38 = vpop.f32.mrb[43].mxu0  ;;  %v1400_v39 = vpop.f32.mrb[45].mxu1 }
 0x146   : > { %v1021_v20 = vpop.f32.mrb[46].mxu1 }
 0x147   : > { %v1038_v40 = vadd.f32 %v1254_v17, %v1026_v36  ;;  %v1027_v41 = vadd.f32 %v1013_v24, %v926_v37  ;;  %v1401_v42 = vpop.f32.mrb[47].mxu1 }
 0x149   : > { %v1049_v43 = vmul.f32 0.70710677, %v1038_v40  ;;  %v1039_v44 = vadd.f32 %v1254_v17, %v1027_v41  ;;  %v1043_v62 = vmul.f32 0.5, %v1038_v40 }
 0x14a   : > { %v917_v45 = vpop.f32.mrb[44].mxu0 }
 0x14b   : > { %1470 = verf.f32 %v1049_v43  ;;  %v1050_v46 = vmul.f32 0.70710677, %v1039_v44  ;;  %v927_v47 = vadd.f32 %v917_v45, %v834_v10  ;;  %v1386_v48 = vpop.f32.mrb[45].mxu0  ;;  %v1044_v3 = vmul.f32 0.5, %v1039_v44 }
 0x14c   : > { %v920_v49 = vpop.f32.mrb[46].mxu0 }
 0x14d   : > { %v1467_v50 = vpop.eup %1466  ;;  %1472 = verf.f32 %v1050_v46  ;;  %v1028_v51 = vadd.f32 %v1018_v35, %v927_v47  ;;  %v1387_v52 = vpop.f32.mrb[47].mxu0 }
 0x14e   : > { %v1057_v54 = vadd.f32 1.0, %v1467_v50 }
 0x14f   : > { %v1469_v0 = vpop.eup %1468  ;;  %v1040_v55 = vadd.f32 %v1254_v17, %v1028_v51 }
 0x150   : > { %v1062_v56 = vmul.f32 %v1057_v54, %v1041_v53  ;;  %v1058_v58 = vadd.f32 1.0, %v1469_v0 }
 0x151   : > { %v1051_v59 = vmul.f32 0.70710677, %v1040_v55  ;;  %v1045_v7 = vmul.f32 0.5, %v1040_v55 }
 0x152   : > { %1067 = vst.msk [vmem:[%s240_s12] sm:$0xff] %vm295_vm1, %v1062_v56  ;;  %v1063_v60 = vmul.f32 %v1058_v58, %v1042_v57 }
 0x153   : > { %1474 = verf.f32 %v1051_v59 }
 0x154   : > { %1068 = vst.msk [vmem:[%s240_s12 + $0x8] sm:$0xff] %vm295_vm1, %v1063_v60 }
 0x155   : > { %v1471_v61 = vpop.eup %1470 }
 0x156   : > { %v1059_v63 = vadd.f32 1.0, %v1471_v61 }
 0x157   : > { %v1473_v1 = vpop.eup %1472 }
 0x158   : > { %v1064_v2 = vmul.f32 %v1059_v63, %v1043_v62  ;;  %v1060_v4 = vadd.f32 1.0, %v1473_v1 }
 0x15a   : > { %1069 = vst.msk [vmem:[%s240_s12 + $0x10] sm:$0xff] %vm295_vm1, %v1064_v2  ;;  %v1065_v5 = vmul.f32 %v1060_v4, %v1044_v3 }
 0x15c   : > { %1070 = vst.msk [vmem:[%s240_s12 + $0x18] sm:$0xff] %vm295_vm1, %v1065_v5 }
 0x15d   : > { %v1475_v6 = vpop.eup %1474 }
 0x15e   : > { %v1061_v8 = vadd.f32 1.0, %v1475_v6 }
 0x160   : > { %v1066_v9 = vmul.f32 %v1061_v8, %v1045_v7 }
 0x162   : > { %1072 = vst.msk [vmem:[%s240_s12 + $0x20] sm:$0x7f] %vm1071_vm9, %v1066_v9 }
 0x163 PF: > { %s13_s16 = sadd.s32 1, %s1514_s16   ;;  %s1754_s12 = smov %s1506_s14 }
 0x164   : > { %p10_p7 = scmp.ge.s32.totalorder %s13_s16, 10   ;;  %s1755_s13 = smov %s1510_s15 }
 0x165   : > { %s1756_s14 = smov %s1759_s17  ;;  %s1757_s15 = smov %s1763_s18 }
 0x166   :  { %12 = sbr.rel (!%p10_p7) target bundleno = 3 (0x3), region = 75 }

// kernel: wav2vec2_forward.33
= control target key start
LH: loop header
LB: loop body
LE: loop exit
PB: predicated region body
PF: predicated region fallthrough
CT: control target
= control target key end

     0   :  { %v233_v0 = vmov 0.0   ;;  %vm234_vm0 = vmmov 0   ;;  %vm69_vm1 = vcmask 523264   ;;  %s350_s1 = inlined_call_operand.vmem [shape: bf16[64,64], index: 1, kind: input, shape index: {}]   ;;  %s351_s0 = inlined_call_operand.vmem [shape: f32[78,64], index: 0, kind: input, shape index: {}]   ;;  %s352_s2 = inlined_call_operand.vmem [shape: f32[1,64], index: 2, kind: input, shape index: {}]   ;;  %s353_s3 = inlined_call_operand.vmem [shape: f32[78,64], index: 3, kind: output, shape index: {}]  }
   0x1   :  { %191 = vmatprep.subr.bf16.mxu0 %v233_v0  ;;  %v229_v1 = vld [vmem:[%s350_s1] sm:$0xff]   ;;  %219 = vmatprep.subr.bf16.mxu1 %v233_v0  ;;  %v230_v2 = vld [vmem:[%s350_s1 + $0x8] sm:$0xff]   ;;  %v231_v3 = vld [vmem:[%s350_s1 + $0x10] sm:$0xff]  }
   0x2   :  { %199 = vmatprep.mubr.msk.bf16.mxu0 %vm234_vm0, %v233_v0  ;;  %211 = vmatprep.mubr.msk.bf16.mxu1 %vm234_vm0, %v233_v0  ;;  %v232_v4 = vld [vmem:[%s350_s1 + $0x18] sm:$0xff]   ;;  %v15_v5 = vld [vmem:[%s351_s0] sm:$0xff]  ;;  %v16_v6 = vld [vmem:[%s351_s0 + $0x8] sm:$0xff] }
   0x3   :  { %192 = vmatpush3.bf16.msra.mxu0 %v229_v1  ;;  %223 = vmatpush3.bf16.msra.mxu1 %v229_v1  ;;  %v21_v7 = vld [vmem:[%s351_s0 + $0x30] sm:$0xff]  ;;  %v22_v8 = vld [vmem:[%s351_s0 + $0x38] sm:$0xff]  ;;  %v25_v9 = vpack.c.bf16 %v16_v6, %v15_v5  ;;  %v23_v13 = vld [vmem:[%s351_s0 + $0x40] sm:$0xff] }
   0x4   :  { %193 = vmatprep.subr.bf16.mxu0 %v233_v0  ;;  %220 = vmatprep.subr.bf16.mxu1 %v233_v0  ;;  %v28_v10 = vpack.c.bf16 %v22_v8, %v21_v7  ;;  %v17_v11 = vld [vmem:[%s351_s0 + $0x10] sm:$0xff]  ;;  %v18_v12 = vld [vmem:[%s351_s0 + $0x18] sm:$0xff]  ;;  %v24_v14 = vld [vmem:[%s351_s0 + $0x48] sm:$0xff] }
   0x5   :  { %v26_v15 = vpack.c.bf16 %v18_v12, %v17_v11  ;;  %v29_v16 = vpack.c.bf16 %v24_v14, %v23_v13  ;;  %v19_v17 = vld [vmem:[%s351_s0 + $0x20] sm:$0xff]  ;;  %v20_v18 = vld [vmem:[%s351_s0 + $0x28] sm:$0xff] }
   0x6   :  { %v27_v19 = vpack.c.bf16 %v20_v18, %v19_v17  ;;  %v172_v20 = vld [vmem:[%s352_s2] ss:$0 sm:$0xff] }
   0x7   :  { %194 = vmatpush3.bf16.msra.mxu0 %v230_v2  ;;  %224 = vmatpush3.bf16.msra.mxu1 %v230_v2 }
   0x8   :  { %195 = vmatprep.subr.bf16.mxu0 %v233_v0  ;;  %221 = vmatprep.subr.bf16.mxu1 %v233_v0 }
   0xb   :  { %196 = vmatpush3.bf16.msra.mxu0 %v231_v3  ;;  %225 = vmatpush3.bf16.msra.mxu1 %v231_v3 }
   0xc   :  { %197 = vmatprep.subr.bf16.mxu0 %v233_v0  ;;  %222 = vmatprep.subr.bf16.mxu1 %v233_v0 }
   0xf   :  { %198 = vmatpush3.bf16.msra.mxu0 %v232_v4  ;;  %226 = vmatpush3.bf16.msra.mxu1 %v232_v4 }
  0x12   :  { %200 = vmatmul.mubr.msk.bf16.vlgmr.msra.gmra.mrb[0].mxu0 %vm69_vm1, %v25_v9  ;;  %212 = vmatmul.mubr.msk.bf16.vlgmr.msra.gmra.mrb[0].mxu1 %vm69_vm1, %v28_v10 }
  0x13   :  { %203 = vmatprep.mubr.msk.bf16.mxu0 %vm234_vm0, %v233_v0  ;;  %215 = vmatprep.mubr.msk.bf16.mxu1 %vm234_vm0, %v233_v0 }
  0x1a   :  { %204 = vmatmul.mubr.msk.bf16.gmra.mrb[4].mxu0 %vm69_vm1, %v26_v15  ;;  %216 = vmatmul.mubr.msk.bf16.gmra.mrb[4].mxu1 %vm69_vm1, %v29_v16 }
  0x1b   :  { %207 = vmatprep.mubr.msk.bf16.mxu0 %vm234_vm0, %v233_v0 }
  0x22   :  { %208 = vmatmul.mubr.msk.bf16.gmra.mrb[8].mxu0 %vm69_vm1, %v27_v19 }
  0xe5   :  { %v119_v21 = vpop.f32.mrb[0].mxu0  ;;  %v143_v22 = vpop.f32.mrb[0].mxu1 }
  0xe6   :  { %v120_v23 = vadd.f32 %v172_v20, %v119_v21  ;;  %v201_v24 = vpop.f32.mrb[1].mxu0  ;;  %v144_v25 = vadd.f32 %v172_v20, %v143_v22  ;;  %v213_v26 = vpop.f32.mrb[1].mxu1 }
  0xe7   :  { %v122_v27 = vpop.f32.mrb[2].mxu0  ;;  %v146_v28 = vpop.f32.mrb[2].mxu1 }
  0xe8   :  { %158 = vst.msk [vmem:[%s353_s3] sm:$0xff] %vm69_vm1, %v120_v23  ;;  %v123_v29 = vadd.f32 %v172_v20, %v122_v27  ;;  %v202_v30 = vpop.f32.mrb[3].mxu0  ;;  %164 = vst.msk [vmem:[%s353_s3 + $0x30] sm:$0xff] %vm69_vm1, %v144_v25  ;;  %v147_v31 = vadd.f32 %v172_v20, %v146_v28  ;;  %v214_v32 = vpop.f32.mrb[3].mxu1 }
  0xea   :  { %159 = vst.msk [vmem:[%s353_s3 + $0x8] sm:$0xff] %vm69_vm1, %v123_v29  ;;  %165 = vst.msk [vmem:[%s353_s3 + $0x38] sm:$0xff] %vm69_vm1, %v147_v31 }
  0xed   :  { %v127_v33 = vpop.f32.mrb[4].mxu0  ;;  %v151_v34 = vpop.f32.mrb[4].mxu1 }
  0xee   :  { %v128_v35 = vadd.f32 %v172_v20, %v127_v33  ;;  %v205_v36 = vpop.f32.mrb[5].mxu0  ;;  %v152_v37 = vadd.f32 %v172_v20, %v151_v34  ;;  %v217_v38 = vpop.f32.mrb[5].mxu1 }
  0xef   :  { %v130_v39 = vpop.f32.mrb[6].mxu0  ;;  %v154_v40 = vpop.f32.mrb[6].mxu1 }
  0xf0   :  { %160 = vst.msk [vmem:[%s353_s3 + $0x10] sm:$0xff] %vm69_vm1, %v128_v35  ;;  %v131_v41 = vadd.f32 %v172_v20, %v130_v39  ;;  %v206_v42 = vpop.f32.mrb[7].mxu0  ;;  %166 = vst.msk [vmem:[%s353_s3 + $0x40] sm:$0xff] %vm69_vm1, %v152_v37  ;;  %v155_v43 = vadd.f32 %v172_v20, %v154_v40  ;;  %v218_v44 = vpop.f32.mrb[7].mxu1 }
  0xf2   :  { %161 = vst.msk [vmem:[%s353_s3 + $0x18] sm:$0xff] %vm69_vm1, %v131_v41  ;;  %167 = vst.msk [vmem:[%s353_s3 + $0x48] sm:$0xff] %vm69_vm1, %v155_v43 }
  0xf5   :  { %v135_v45 = vpop.f32.mrb[8].mxu0 }
  0xf6   :  { %v136_v46 = vadd.f32 %v172_v20, %v135_v45  ;;  %v209_v47 = vpop.f32.mrb[9].mxu0 }
  0xf7   :  { %v138_v48 = vpop.f32.mrb[10].mxu0 }
  0xf8   :  { %162 = vst.msk [vmem:[%s353_s3 + $0x20] sm:$0xff] %vm69_vm1, %v136_v46  ;;  %v139_v49 = vadd.f32 %v172_v20, %v138_v48  ;;  %v210_v50 = vpop.f32.mrb[11].mxu0 }
  0xfa   :  { %163 = vst.msk [vmem:[%s353_s3 + $0x28] sm:$0xff] %vm69_vm1, %v139_v49 }

// kernel: wav2vec2_forward.32
= control target key start
LH: loop header
LB: loop body
LE: loop exit
PB: predicated region body
PF: predicated region fallthrough
CT: control target
= control target key end

     0   :  { %s1525_s6 = smov 0   ;;  %s1972_s0 = inlined_call_operand.vmem [shape: f32[2,39,192], index: 0, kind: input, shape index: {}]   ;;  %s1973_s1 = inlined_call_operand.vmem [shape: f32[2,39,64], index: 1, kind: output, shape index: {}]  }
   0x1 LB: > { %s1172_s7 = sadd.s32 4294967295, %s1503_s6   ;;  %p1176_p0 = scmp.ge.s32.totalorder %s1503_s6, 1  ;;  %s1503_s6 = sphi %s1525_s6, %s11_s6  }
   0x2   : > { %p87_p1 = scmp.lt.s32.totalorder %s1503_s6, 3 }
   0x4   : > { %p88_p2 = pnand %p1176_p0, %p87_p1 }
   0x5   : > { %p107_p3 = scmp.lt.s32.totalorder (!%p88_p2), %s1172_s7, 1  ;;  %v1505_v0 = vmov (!%p88_p2), 0.0   ;;  %s1506_s12 = smov (!%p88_p2), 64   ;;  %vm1507_vm0 = vmmov (!%p88_p2), 0   ;;  %vm143_vm1 = vcmask (!%p88_p2), 130048   ;;  %vm223_vm2 = vcmask (!%p88_p2), 318464  }
   0x6   : > { %91 = sbr.rel (%p88_p2) target bundleno = 1769 (0x6e9), region = 24  ;;  %1253 = vmatprep.subr.bf16.mxu0 (!%p88_p2), %v1505_v0  ;;  %1271 = vmatprep.subr.bf16.mxu1 (!%p88_p2), %v1505_v0  ;;  %vm236_vm3 = vcmask (!%p88_p2), 317440   ;;  %vm292_vm4 = vcmask (!%p88_p2), 1042432   ;;  %vm293_vm5 = vcmask (!%p88_p2), 1043456   ;;  %s1509_s13 = smov (!%p88_p2), 48   ;;  %vm1098_vm6 = vcmask (!%p88_p2), 261120  }
   0x7   : > { %1259 = vmatprep.mubr.msk.bf16.mxu0 (!%p88_p2), %vm1507_vm0, %v1505_v0  ;;  %1277 = vmatprep.mubr.msk.bf16.mxu1 (!%p88_p2), %vm1507_vm0, %v1505_v0  ;;  %s1510_s14 = smov (!%p88_p2), 112   ;;  %s1511_s15 = smov (!%p88_p2), 96   ;;  %vm1104_vm7 = vcmask (!%p88_p2), 392192   ;;  %vm1110_vm8 = vcmask (!%p88_p2), 523264   ;;  %vm1115_vm9 = vcmask (!%p88_p2), 522240  }
   0x8   : > { %s1512_s16 = smov (!%p88_p2), 80   ;;  %s1513_s17 = smov (!%p88_p2), 32  }
   0x9   : > { %s1514_s18 = smov (!%p88_p2), 16  }
   0xd   : > { %s1975_s7 = smov (!%p107_p3, %s1172_s7), 1 }
   0xe   : > { %s1397_s8 = smul.u32 80, %s1975_s7 }
   0xf   : > { %s1398_s19 = smul.u32 40, %s1975_s7 }
  0x10   : > { %s1541_s11 = scalar_lea.vmem %s1972_s0, %s1397_s8 }
  0x11   : > { %v118_v1 = vld [vmem:[%s1541_s11] sm:$0xff]  ;;  %v120_v2 = vld [vmem:[%s1541_s11 + $0x10] sm:$0xff]  ;;  %v119_v57 = vld [vmem:[%s1541_s11 + $0x8] sm:$0xff]  ;;  %s116_s22 = scalar_lea.vmem %s1973_s1, %s1398_s19 }
  0x12   : > { %v122_v3 = vld [vmem:[%s1541_s11 + $0x20] sm:$0xff]  ;;  %v1546_v4 = vpack.c.bf16 %v120_v2, %v118_v1  ;;  %v124_v5 = vld [vmem:[%s1541_s11 + $0x30] sm:$0xff]  ;;  %v121_v58 = vld [vmem:[%s1541_s11 + $0x18] sm:$0xff]  ;;  %v1508_v2 = vmov 65535  }
  0x13   : > { %v126_v6 = vld [vmem:[%s1541_s11 + $0x40] sm:$0x7f]  ;;  %v1553_v8 = vpack.c.bf16 %v124_v5, %v122_v3  ;;  %v1602_v59 = vpack.c.bf16 %v121_v58, %v119_v57  ;;  %v123_v60 = vld [vmem:[%s1541_s11 + $0x28] sm:$0xff]  ;;  %v125_v61 = vld [vmem:[%s1541_s11 + $0x38] sm:$0xff]  ;;  %v294_v3 = vsel %vm292_vm4, 4294967295, %v1508_v2 }
  0x14   : > { %v1550_v7 = vpack.c.bf16 %v126_v6, %v126_v6  ;;  %137 = vrot.lane.b32.xlu0 %v1546_v4, %s1506_s12  ;;  %v1608_v62 = vpack.c.bf16 %v125_v61, %v123_v60  ;;  %v127_v63 = vld [vmem:[%s1541_s11 + $0x48] sm:$0x7f]  ;;  %v1615_v5 = vsel %vm293_vm5, %v294_v3, 0 }
  0x15   : > { %1272 = vmatpush3.bf16.msra.mxu1 %v1602_v59  ;;  %v1612_v1 = vpack.c.bf16 %v127_v63, %v127_v63 }
  0x16   : > { %141 = vrot.lane.b32.xlu1 %v1550_v7, %s1506_s12  ;;  %1273 = vmatprep.subr.bf16.mxu1 %v1505_v0 }
  0x17   : > { %v297_v6 = vand.u32 %v1615_v5, %v1612_v1 }
  0x18   : > { %139 = vrot.lane.b32.xlu0 %v1553_v8, %s1506_s12 }
  0x19   : > { %1274 = vmatpush3.bf16.msra.mxu1 %v1608_v62 }
  0x1a   : > { %1275 = vmatprep.subr.bf16.mxu1 %v1505_v0 }
  0x1d   : > { %1276 = vmatpush3.bf16.msra.mxu1 %v297_v6 }
  0x1e   : > { %1289 = vmatprep.subr.bf16.mxu1 %v1505_v0 }
  0x86   : > { %v138_v9 = vpop.permute.xlu0 %137 }
  0x87   : > { %v154_v10 = vsel %vm143_vm1, %v138_v9, 0 }
  0x88   : > { %1254 = vmatpush3.bf16.xpose.msra.mxu0 %v154_v10  ;;  %v142_v13 = vpop.permute.xlu1 %141 }
  0x89   : > { %1255 = vmatprep.subr.bf16.mxu0 %v1505_v0  ;;  %v160_v14 = vsel %vm143_vm1, %v142_v13, 0 }
  0x8a   : > { %v140_v11 = vpop.permute.xlu0 %139 }
  0x8b   : > { %v157_v12 = vsel %vm143_vm1, %v140_v11, 0 }
  0x90   : > { %1256 = vmatpush3.bf16.xpose.msra.mxu0 %v157_v12 }
  0x91   : > { %1257 = vmatprep.subr.bf16.mxu0 %v1505_v0 }
  0x98   : > { %1258 = vmatpush3.bf16.xpose.msra.mxu0 %v160_v14 }
  0x99   : > { %1307 = vmatprep.subr.bf16.mxu0 %v1505_v0 }
  0x9f   : > { %1260 = vmatmul.mubr.msk.bf16.vlgmr.msra.gmra.mrb[0].mxu0 %vm143_vm1, %v1546_v4 }
  0xa0   : > { %1263 = vmatprep.mubr.msk.bf16.mxu0 %vm1507_vm0, %v1505_v0 }
  0xa7   : > { %1264 = vmatmul.mubr.msk.bf16.gmra.mrb[4].mxu0 %vm143_vm1, %v1553_v8 }
  0xa8   : > { %1267 = vmatprep.mubr.msk.bf16.mxu0 %vm1507_vm0, %v1505_v0 }
  0xaf   : > { %1268 = vmatmul.mubr.msk.bf16.gmra.mrb[8].mxu0 %vm143_vm1, %v1550_v7 }
  0xb0   : > { %1313 = vmatprep.mubr.msk.bf16.mxu0 %vm1507_vm0, %v1505_v0 }
 0x172   : > { %v196_v15 = vpop.f32.mrb[0].mxu0 }
 0x173   : > { %v218_v16 = vmul.f32 0.25, %v196_v15  ;;  %v1261_v17 = vpop.f32.mrb[1].mxu0 }
 0x174   : > { %v199_v18 = vpop.f32.mrb[2].mxu0 }
 0x175   : > { %v219_v19 = vmul.f32 0.25, %v199_v18  ;;  %v1262_v20 = vpop.f32.mrb[3].mxu0  ;;  %v224_v21 = vsel %vm223_vm2, %v218_v16, -inf }
 0x176   : > { %225 = vmax.xlane.f32.xlu1 %v224_v21 }
 0x177   : > { %v227_v22 = vsel %vm223_vm2, %v219_v19, -inf }
 0x178   : > { %228 = vmax.xlane.f32.xlu0 %v227_v22 }
 0x17a   : > { %v204_v23 = vpop.f32.mrb[4].mxu0 }
 0x17b   : > { %v220_v24 = vmul.f32 0.25, %v204_v23  ;;  %v1265_v25 = vpop.f32.mrb[5].mxu0 }
 0x17c   : > { %v207_v26 = vpop.f32.mrb[6].mxu0 }
 0x17d   : > { %v221_v27 = vmul.f32 0.25, %v207_v26  ;;  %v1266_v28 = vpop.f32.mrb[7].mxu0  ;;  %v230_v29 = vsel %vm223_vm2, %v220_v24, -inf }
 0x17e   : > { %231 = vmax.xlane.f32.xlu0 %v230_v29 }
 0x17f   : > { %v233_v30 = vsel %vm223_vm2, %v221_v27, -inf }
 0x180   : > { %234 = vmax.xlane.f32.xlu1 %v233_v30 }
 0x182   : > { %v212_v31 = vpop.f32.mrb[8].mxu0 }
 0x183   : > { %v222_v32 = vmul.f32 0.25, %v212_v31  ;;  %v1269_v33 = vpop.f32.mrb[9].mxu0 }
 0x184   : > { %v215_v34 = vpop.f32.mrb[10].mxu0 }
 0x185   : > { %v237_v35 = vsel %vm236_vm3, %v222_v32, -inf  ;;  %v1270_v36 = vpop.f32.mrb[11].mxu0 }
 0x186   : > { %238 = vmax.xlane.f32.xlu0 %v237_v35 }
 0x203   : > { %v226_v37 = vpop.xlane.xlu1 %225 }
 0x204   : > { %v240_v38 = vsub.f32 %v218_v16, %v226_v37 }
 0x205   : > { %v229_v39 = vpop.xlane.xlu0 %228 }
 0x206   : > { %v245_v40 = vmul.f32 1.442695, %v240_v38  ;;  %v241_v41 = vsub.f32 %v219_v19, %v229_v39 }
 0x208   : > { %1417 = vpow2.f32 %v245_v40  ;;  %v247_v42 = vmul.f32 1.442695, %v241_v41 }
 0x20a   : > { %1419 = vpow2.f32 %v247_v42 }
 0x20b   : > { %v232_v43 = vpop.xlane.xlu0 %231 }
 0x20c   : > { %v242_v44 = vsub.f32 %v220_v24, %v232_v43 }
 0x20d   : > { %v235_v45 = vpop.xlane.xlu1 %234 }
 0x20e   : > { %v249_v46 = vmul.f32 1.442695, %v242_v44  ;;  %v243_v47 = vsub.f32 %v221_v27, %v235_v45 }
 0x210   : > { %1421 = vpow2.f32 %v249_v46  ;;  %v251_v48 = vmul.f32 1.442695, %v243_v47 }
 0x212   : > { %v1584_v49 = vpop.eup %1417  ;;  %1423 = vpow2.f32 %v251_v48 }
 0x213   : > { %v255_v50 = vsel %vm223_vm2, %v1584_v49, 0.0  ;;  %v239_v9 = vpop.xlane.xlu0 %238 }
 0x214   : > { %v1588_v51 = vpop.eup %1419  ;;  %256 = vadd.xlane.f32.xlu1 %v255_v50  ;;  %v244_v10 = vsub.f32 %v222_v32, %v239_v9 }
 0x215   : > { %v258_v52 = vsel %vm223_vm2, %v1588_v51, 0.0 }
 0x216   : > { %259 = vadd.xlane.f32.xlu0 %v258_v52  ;;  %v253_v11 = vmul.f32 1.442695, %v244_v10 }
 0x218   : > { %1425 = vpow2.f32 %v253_v11 }
 0x21a   : > { %v1592_v53 = vpop.eup %1421 }
 0x21b   : > { %v261_v54 = vsel %vm223_vm2, %v1592_v53, 0.0 }
 0x21c   : > { %v1596_v55 = vpop.eup %1423  ;;  %262 = vadd.xlane.f32.xlu1 %v261_v54 }
 0x21d   : > { %v264_v56 = vsel %vm223_vm2, %v1596_v55, 0.0 }
 0x21e   : > { %265 = vadd.xlane.f32.xlu0 %v264_v56 }
 0x222   : > { %v1426_v12 = vpop.eup %1425 }
 0x223   : > { %v267_v13 = vsel %vm236_vm3, %v1426_v12, 0.0 }
 0x22d   : > { %363 = vrot.lane.b32.xlu1 %v1553_v8, %s1509_s13 }
 0x234   : > { %361 = vrot.lane.b32.xlu0 %v1546_v4, %s1509_s13 }
 0x238   : > { %355 = vrot.lane.b32.xlu0 %v1546_v4, %s1510_s14 }
 0x23c   : > { %357 = vrot.lane.b32.xlu0 %v1553_v8, %s1510_s14 }
 0x240   : > { %359 = vrot.lane.b32.xlu0 %v1550_v7, %s1510_s14 }
 0x244   : > { %583 = vrot.lane.b32.xlu0 %v1546_v4, %s1511_s15 }
 0x248   : > { %585 = vrot.lane.b32.xlu0 %v1553_v8, %s1511_s15 }
 0x24c   : > { %587 = vrot.lane.b32.xlu0 %v1550_v7, %s1511_s15 }
 0x250   : > { %808 = vrot.lane.b32.xlu0 %v1546_v4, %s1512_s16 }
 0x251   : > { %268 = vadd.xlane.f32.xlu1 %v267_v13 }
 0x254   : > { %812 = vrot.lane.b32.xlu0 %v1550_v7, %s1512_s16 }
 0x262   : > { %365 = vrot.lane.b32.xlu1 %v1550_v7, %s1509_s13 }
 0x266   : > { %589 = vrot.lane.b32.xlu1 %v1546_v4, %s1513_s17 }
 0x26a   : > { %591 = vrot.lane.b32.xlu1 %v1553_v8, %s1513_s17 }
 0x26e   : > { %593 = vrot.lane.b32.xlu1 %v1550_v7, %s1513_s17 }
 0x272   : > { %814 = vrot.lane.b32.xlu1 %v1546_v4, %s1514_s18 }
 0x276   : > { %816 = vrot.lane.b32.xlu1 %v1553_v8, %s1514_s18 }
 0x27a   : > { %818 = vrot.lane.b32.xlu1 %v1550_v7, %s1514_s18 }
 0x27e   : > { %810 = vrot.lane.b32.xlu1 %v1553_v8, %s1512_s16 }
 0x2a1   : > { %v257_v14 = vpop.xlane.xlu1 %256 }
 0x2a2   : > { %1427 = vrcp.f32 %v257_v14 }
 0x2a3   : > { %v260_v15 = vpop.xlane.xlu0 %259 }
 0x2a4   : > { %1429 = vrcp.f32 %v260_v15 }
 0x2a9   : > { %v263_v16 = vpop.xlane.xlu1 %262 }
 0x2aa   : > { %1431 = vrcp.f32 %v263_v16 }
 0x2ab   : > { %v266_v17 = vpop.xlane.xlu0 %265 }
 0x2ac   : > { %v1428_v18 = vpop.eup %1427  ;;  %1433 = vrcp.f32 %v266_v17 }
 0x2ad   : > { %v271_v20 = vmul.f32 %v1428_v18, %v1584_v49  ;;  %v364_v26 = vpop.permute.xlu1 %363 }
 0x2ae   : > { %v1430_v19 = vpop.eup %1429  ;;  %v380_v28 = vsel %vm143_vm1, %v364_v26, 0 }
 0x2af   : > { %v362_v4 = vpop.permute.xlu0 %361  ;;  %v273_v21 = vmul.f32 %v1430_v19, %v1588_v51 }
 0x2b0   : > { %v377_v7 = vsel %vm143_vm1, %v362_v4, 0 }
 0x2b1   : > { %v280_v22 = vpack.c.bf16 %v273_v21, %v271_v20 }
 0x2b3   : > { %1278 = vmatmul.mubr.msk.bf16.vlgmr.msra.gmra.mrb[0].mxu1 %vm223_vm2, %v280_v22  ;;  %v356_v36 = vpop.permute.xlu0 %355 }
 0x2b4   : > { %v1432_v8 = vpop.eup %1431  ;;  %1290 = vmatpush3.bf16.xpose.msra.mxu1 %v377_v7  ;;  %1281 = vmatprep.mubr.msk.bf16.mxu1 %vm1507_vm0, %v1505_v0 }
 0x2b5   : > { %1291 = vmatprep.subr.bf16.mxu1 %v1505_v0  ;;  %v275_v24 = vmul.f32 %v1432_v8, %v1592_v53 }
 0x2b6   : > { %v1434_v23 = vpop.eup %1433 }
 0x2b7   : > { %v277_v25 = vmul.f32 %v1434_v23, %v1596_v55  ;;  %v358_v39 = vpop.permute.xlu0 %357 }
 0x2b9   : > { %v281_v27 = vpack.c.bf16 %v277_v25, %v275_v24 }
 0x2bb   : > { %1282 = vmatmul.mubr.msk.bf16.gmra.mrb[4].mxu1 %vm223_vm2, %v281_v27  ;;  %v360_v42 = vpop.permute.xlu0 %359 }
 0x2bc   : > { %1292 = vmatpush3.bf16.xpose.msra.mxu1 %v380_v28  ;;  %1285 = vmatprep.mubr.msk.bf16.mxu1 %vm1507_vm0, %v1505_v0 }
 0x2bd   : > { %1293 = vmatprep.subr.bf16.mxu1 %v1505_v0 }
 0x2bf   : > { %v584_v45 = vpop.permute.xlu0 %583 }
 0x2c3   : > { %v586_v48 = vpop.permute.xlu0 %585 }
 0x2c7   : > { %v588_v51 = vpop.permute.xlu0 %587 }
 0x2cb   : > { %v809_v53 = vpop.permute.xlu0 %808 }
 0x2cf   : > { %v813_v55 = vpop.permute.xlu0 %812 }
 0x2de   : > { %v269_v29 = vpop.xlane.xlu1 %268 }
 0x2df   : > { %1435 = vrcp.f32 %v269_v29 }
 0x2e2   : > { %v366_v30 = vpop.permute.xlu1 %365 }
 0x2e3   : > { %v383_v31 = vsel %vm143_vm1, %v366_v30, 0 }
 0x2e4   : > { %1294 = vmatpush3.bf16.xpose.msra.mxu1 %v383_v31 }
 0x2e5   : > { %1325 = vmatprep.subr.bf16.mxu1 %v1505_v0 }
 0x2e6   : > { %v590_v35 = vpop.permute.xlu1 %589 }
 0x2e7   : > { %v605_v37 = vsel %vm143_vm1, %v590_v35, 0 }
 0x2e9   : > { %v1436_v32 = vpop.eup %1435 }
 0x2ea   : > { %v279_v33 = vmul.f32 %v1436_v32, %v1426_v12  ;;  %v592_v38 = vpop.permute.xlu1 %591 }
 0x2eb   : > { %v608_v40 = vsel %vm143_vm1, %v592_v38, 0 }
 0x2ec   : > { %v282_v34 = vpack.c.bf16 %v279_v33, %v279_v33 }
 0x2ee   : > { %1286 = vmatmul.mubr.msk.bf16.gmra.mrb[8].mxu1 %vm223_vm2, %v282_v34  ;;  %v594_v41 = vpop.permute.xlu1 %593 }
 0x2ef   : > { %1295 = vmatprep.mubr.msk.bf16.mxu1 %vm1507_vm0, %v1505_v0  ;;  %v611_v43 = vsel %vm143_vm1, %v594_v41, 0 }
 0x2f2   : > { %v815_v44 = vpop.permute.xlu1 %814 }
 0x2f3   : > { %v830_v46 = vsel %vm143_vm1, %v815_v44, 0 }
 0x2f6   : > { %1296 = vmatmul.mubr.msk.bf16.vlgmr.msra.gmra.mrb[12].mxu1 %vm143_vm1, %v356_v36  ;;  %v817_v47 = vpop.permute.xlu1 %816 }
 0x2f7   : > { %1326 = vmatpush3.bf16.xpose.msra.mxu1 %v605_v37  ;;  %1299 = vmatprep.mubr.msk.bf16.mxu1 %vm1507_vm0, %v1505_v0  ;;  %v833_v49 = vsel %vm143_vm1, %v817_v47, 0 }
 0x2f8   : > { %1327 = vmatprep.subr.bf16.mxu1 %v1505_v0 }
 0x2fa   : > { %v819_v50 = vpop.permute.xlu1 %818 }
 0x2fb   : > { %v836_v52 = vsel %vm143_vm1, %v819_v50, 0 }
 0x2fe   : > { %1300 = vmatmul.mubr.msk.bf16.gmra.mrb[16].mxu1 %vm143_vm1, %v358_v39  ;;  %v811_v54 = vpop.permute.xlu1 %810 }
 0x2ff   : > { %1328 = vmatpush3.bf16.xpose.msra.mxu1 %v608_v40  ;;  %1303 = vmatprep.mubr.msk.bf16.mxu1 %vm1507_vm0, %v1505_v0 }
 0x300   : > { %1329 = vmatprep.subr.bf16.mxu1 %v1505_v0 }
 0x306   : > { %1304 = vmatmul.mubr.msk.bf16.gmra.mrb[20].mxu1 %vm143_vm1, %v360_v42 }
 0x307   : > { %1330 = vmatpush3.bf16.xpose.msra.mxu1 %v611_v43  ;;  %1331 = vmatprep.mubr.msk.bf16.mxu1 %vm1507_vm0, %v1505_v0 }
 0x308   : > { %1361 = vmatprep.subr.bf16.mxu1 %v1505_v0 }
 0x30e   : > { %1332 = vmatmul.mubr.msk.bf16.vlgmr.msra.gmra.mrb[24].mxu1 %vm143_vm1, %v584_v45 }
 0x30f   : > { %1362 = vmatpush3.bf16.xpose.msra.mxu1 %v830_v46  ;;  %1335 = vmatprep.mubr.msk.bf16.mxu1 %vm1507_vm0, %v1505_v0 }
 0x310   : > { %1363 = vmatprep.subr.bf16.mxu1 %v1505_v0 }
 0x316   : > { %1336 = vmatmul.mubr.msk.bf16.gmra.mrb[28].mxu1 %vm143_vm1, %v586_v48 }
 0x317   : > { %1364 = vmatpush3.bf16.xpose.msra.mxu1 %v833_v49  ;;  %1339 = vmatprep.mubr.msk.bf16.mxu1 %vm1507_vm0, %v1505_v0 }
 0x318   : > { %1365 = vmatprep.subr.bf16.mxu1 %v1505_v0 }
 0x31e   : > { %1340 = vmatmul.mubr.msk.bf16.gmra.mrb[32].mxu1 %vm143_vm1, %v588_v51 }
 0x31f   : > { %1366 = vmatpush3.bf16.xpose.msra.mxu1 %v836_v52  ;;  %1367 = vmatprep.mubr.msk.bf16.mxu1 %vm1507_vm0, %v1505_v0 }
 0x326   : > { %1368 = vmatmul.mubr.msk.bf16.vlgmr.msra.gmra.mrb[36].mxu1 %vm143_vm1, %v809_v53 }
 0x327   : > { %1371 = vmatprep.mubr.msk.bf16.mxu1 %vm1507_vm0, %v1505_v0 }
 0x32e   : > { %1372 = vmatmul.mubr.msk.bf16.gmra.mrb[40].mxu1 %vm143_vm1, %v811_v54 }
 0x32f   : > { %1375 = vmatprep.mubr.msk.bf16.mxu1 %vm1507_vm0, %v1505_v0 }
 0x336   : > { %1376 = vmatmul.mubr.msk.bf16.gmra.mrb[44].mxu1 %vm143_vm1, %v813_v55 }
 0x386   : > { %v1712_v56 = vpop.f32.mrb[0].mxu1 }
 0x387   : > { %v1279_v57 = vpop.f32.mrb[1].mxu1 }
 0x388   : > { %v1714_v58 = vpop.f32.mrb[2].mxu1 }
 0x389   : > { %v1280_v60 = vpop.f32.mrb[3].mxu1 }
 0x38e   : > { %v1716_v61 = vpop.f32.mrb[4].mxu1 }
 0x38f   : > { %v1283_v63 = vpop.f32.mrb[5].mxu1 }
 0x390   : > { %v1718_v2 = vpop.f32.mrb[6].mxu1 }
 0x391   : > { %v1284_v3 = vpop.f32.mrb[7].mxu1 }
 0x3c1   : > { %v1720_v6 = vpop.f32.mrb[8].mxu1 }
 0x3c2   : > { %v1287_v9 = vpop.f32.mrb[9].mxu1 }
 0x3c3   : > { %v352_v10 = vpop.f32.mrb[10].mxu1 }
 0x3c4   : > { %v1288_v11 = vpop.f32.mrb[11].mxu1 }
 0x3c9   : > { %v419_v12 = vpop.f32.mrb[12].mxu1 }
 0x3ca   : > { %v1722_v13 = vmul.f32 0.25, %v419_v12  ;;  %v1297_v14 = vpop.f32.mrb[13].mxu1 }
 0x3cb   : > { %v422_v15 = vpop.f32.mrb[14].mxu1 }
 0x3cc   : > { %v1724_v16 = vmul.f32 0.25, %v422_v15  ;;  %v1298_v17 = vpop.f32.mrb[15].mxu1  ;;  %v446_v18 = vsel %vm223_vm2, %v1722_v13, -inf }
 0x3cd   : > { %447 = vmax.xlane.f32.xlu1 %v446_v18 }
 0x3ce   : > { %v449_v19 = vsel %vm223_vm2, %v1724_v16, -inf }
 0x3cf   : > { %450 = vmax.xlane.f32.xlu0 %v449_v19 }
 0x3d1   : > { %v427_v4 = vpop.f32.mrb[16].mxu1 }
 0x3d2   : > { %v1730_v20 = vmul.f32 0.25, %v427_v4  ;;  %v1301_v21 = vpop.f32.mrb[17].mxu1 }
 0x3d3   : > { %v430_v7 = vpop.f32.mrb[18].mxu1 }
 0x3d4   : > { %v1732_v22 = vmul.f32 0.25, %v430_v7  ;;  %v1302_v8 = vpop.f32.mrb[19].mxu1  ;;  %v452_v23 = vsel %vm223_vm2, %v1730_v20, -inf }
 0x3d5   : > { %453 = vmax.xlane.f32.xlu0 %v452_v23 }
 0x3d6   : > { %v455_v24 = vsel %vm223_vm2, %v1732_v22, -inf }
 0x3d7   : > { %456 = vmax.xlane.f32.xlu1 %v455_v24 }
 0x3d9   : > { %v435_v25 = vpop.f32.mrb[20].mxu1 }
 0x3da   : > { %v1738_v26 = vmul.f32 0.25, %v435_v25  ;;  %v1305_v27 = vpop.f32.mrb[21].mxu1 }
 0x3db   : > { %v438_v28 = vpop.f32.mrb[22].mxu1 }
 0x3dc   : > { %v1306_v29 = vpop.f32.mrb[23].mxu1  ;;  %v458_v30 = vsel %vm236_vm3, %v1738_v26, -inf }
 0x3dd   : > { %459 = vmax.xlane.f32.xlu0 %v458_v30 }
 0x3e1   : > { %v647_v31 = vpop.f32.mrb[24].mxu1 }
 0x3e2   : > { %v1742_v32 = vmul.f32 0.25, %v647_v31  ;;  %v1333_v33 = vpop.f32.mrb[25].mxu1 }
 0x3e3   : > { %v650_v34 = vpop.f32.mrb[26].mxu1 }
 0x3e4   : > { %v1744_v35 = vmul.f32 0.25, %v650_v34  ;;  %v1334_v36 = vpop.f32.mrb[27].mxu1  ;;  %v674_v37 = vsel %vm223_vm2, %v1742_v32, -inf }
 0x3e5   : > { %675 = vmax.xlane.f32.xlu1 %v674_v37 }
 0x3e6   : > { %v677_v38 = vsel %vm223_vm2, %v1744_v35, -inf }
 0x3e7   : > { %678 = vmax.xlane.f32.xlu0 %v677_v38 }
 0x3e9   : > { %v655_v39 = vpop.f32.mrb[28].mxu1 }
 0x3ea   : > { %v1337_v40 = vpop.f32.mrb[29].mxu1  ;;  %v1758_v9 = vmul.f32 0.25, %v655_v39 }
 0x3eb   : > { %v658_v41 = vpop.f32.mrb[30].mxu1 }
 0x3ec   : > { %v1338_v42 = vpop.f32.mrb[31].mxu1  ;;  %v1756_v3 = vmul.f32 0.25, %v658_v41  ;;  %v680_v14 = vsel %vm223_vm2, %v1758_v9, -inf }
 0x3ee   : > { %v683_v11 = vsel %vm223_vm2, %v1756_v3, -inf }
 0x3f1   : > { %v663_v43 = vpop.f32.mrb[32].mxu1 }
 0x3f2   : > { %v1341_v44 = vpop.f32.mrb[33].mxu1  ;;  %v1764_v12 = vmul.f32 0.25, %v663_v43 }
 0x3f3   : > { %v666_v45 = vpop.f32.mrb[34].mxu1 }
 0x3f4   : > { %v1342_v46 = vpop.f32.mrb[35].mxu1  ;;  %v686_v19 = vsel %vm236_vm3, %v1764_v12, -inf }
 0x3f6   : > { %509 = vrot.lane.b32.xlu1 %v1608_v62, %s1510_s14 }
 0x3f9   : > { %v872_v47 = vpop.f32.mrb[36].mxu1 }
 0x3fa   : > { %511 = vrot.lane.b32.xlu1 %v1612_v1, %s1510_s14  ;;  %v1369_v48 = vpop.f32.mrb[37].mxu1  ;;  %v1760_v10 = vmul.f32 0.25, %v872_v47 }
 0x3fb   : > { %v875_v49 = vpop.f32.mrb[38].mxu1 }
 0x3fc   : > { %v1370_v50 = vpop.f32.mrb[39].mxu1  ;;  %v899_v15 = vsel %vm223_vm2, %v1760_v10, -inf  ;;  %v1772_v18 = vmul.f32 0.25, %v875_v49 }
 0x3fd   : > { %507 = vrot.lane.b32.xlu0 %v1602_v59, %s1510_s14 }
 0x3fe   : > { %v902_v8 = vsel %vm223_vm2, %v1772_v18, -inf }
 0x401   : > { %v880_v51 = vpop.f32.mrb[40].mxu1 }
 0x402   : > { %v1373_v52 = vpop.f32.mrb[41].mxu1  ;;  %v1770_v17 = vmul.f32 0.25, %v880_v51 }
 0x403   : > { %v883_v53 = vpop.f32.mrb[42].mxu1 }
 0x404   : > { %v1374_v54 = vpop.f32.mrb[43].mxu1  ;;  %v905_v4 = vsel %vm223_vm2, %v1770_v17, -inf  ;;  %v1780_v7 = vmul.f32 0.25, %v883_v53 }
 0x406   : > { %v908_v24 = vsel %vm223_vm2, %v1780_v7, -inf }
 0x409   : > { %v888_v55 = vpop.f32.mrb[44].mxu1 }
 0x40a   : > { %v1377_v57 = vpop.f32.mrb[45].mxu1  ;;  %v1778_v21 = vmul.f32 0.25, %v888_v55 }
 0x40b   : > { %v891_v60 = vpop.f32.mrb[46].mxu1 }
 0x40c   : > { %v1378_v63 = vpop.f32.mrb[47].mxu1  ;;  %v911_v23 = vsel %vm236_vm3, %v1778_v21, -inf }
 0x41c   : > { %684 = vmax.xlane.f32.xlu0 %v683_v11 }
 0x41e   : > { %681 = vmax.xlane.f32.xlu1 %v680_v14 }
 0x420   : > { %900 = vmax.xlane.f32.xlu0 %v899_v15 }
 0x422   : > { %687 = vmax.xlane.f32.xlu1 %v686_v19 }
 0x424   : > { %906 = vmax.xlane.f32.xlu0 %v905_v4 }
 0x426   : > { %903 = vmax.xlane.f32.xlu1 %v902_v8 }
 0x428   : > { %912 = vmax.xlane.f32.xlu0 %v911_v23 }
 0x42a   : > { %909 = vmax.xlane.f32.xlu1 %v908_v24 }
 0x45a   : > { %v448_v25 = vpop.xlane.xlu1 %447 }
 0x45b   : > { %v461_v27 = vsub.f32 %v1722_v13, %v448_v25 }
 0x45c   : > { %v451_v28 = vpop.xlane.xlu0 %450 }
 0x45d   : > { %v466_v29 = vmul.f32 1.442695, %v461_v27  ;;  %v462_v30 = vsub.f32 %v1724_v16, %v451_v28 }
 0x45f   : > { %1437 = vpow2.f32 %v466_v29  ;;  %v468_v31 = vmul.f32 1.442695, %v462_v30 }
 0x461   : > { %1439 = vpow2.f32 %v468_v31 }
 0x462   : > { %v454_v33 = vpop.xlane.xlu0 %453 }
 0x463   : > { %v463_v34 = vsub.f32 %v1730_v20, %v454_v33 }
 0x464   : > { %v457_v36 = vpop.xlane.xlu1 %456 }
 0x465   : > { %v470_v37 = vmul.f32 1.442695, %v463_v34  ;;  %v464_v38 = vsub.f32 %v1732_v22, %v457_v36 }
 0x467   : > { %1441 = vpow2.f32 %v470_v37  ;;  %v472_v39 = vmul.f32 1.442695, %v464_v38 }
 0x469   : > { %v1792_v40 = vpop.eup %1437  ;;  %1443 = vpow2.f32 %v472_v39 }
 0x46a   : > { %v476_v13 = vsel %vm223_vm2, %v1792_v40, 0.0  ;;  %v460_v20 = vpop.xlane.xlu0 %459 }
 0x46b   : > { %v1796_v41 = vpop.eup %1439  ;;  %477 = vadd.xlane.f32.xlu1 %v476_v13  ;;  %v465_v52 = vsub.f32 %v1738_v26, %v460_v20 }
 0x46c   : > { %v479_v16 = vsel %vm223_vm2, %v1796_v41, 0.0 }
 0x46d   : > { %480 = vadd.xlane.f32.xlu0 %v479_v16  ;;  %v474_v54 = vmul.f32 1.442695, %v465_v52 }
 0x471   : > { %v1800_v42 = vpop.eup %1441 }
 0x472   : > { %v676_v43 = vpop.xlane.xlu1 %675  ;;  %v482_v22 = vsel %vm223_vm2, %v1800_v42, 0.0 }
 0x473   : > { %v1804_v44 = vpop.eup %1443  ;;  %483 = vadd.xlane.f32.xlu1 %v482_v22  ;;  %v689_v51 = vsub.f32 %v1742_v32, %v676_v43 }
 0x474   : > { %v679_v45 = vpop.xlane.xlu0 %678  ;;  %v485_v46 = vsel %vm223_vm2, %v1804_v44, 0.0 }
 0x475   : > { %486 = vadd.xlane.f32.xlu0 %v485_v46  ;;  %v694_v53 = vmul.f32 1.442695, %v689_v51  ;;  %v690_v55 = vsub.f32 %v1744_v35, %v679_v45 }
 0x476   : > { %v510_v47 = vpop.permute.xlu1 %509 }
 0x477   : > { %1445 = vpow2.f32 %v694_v53  ;;  %v696_v57 = vmul.f32 1.442695, %v690_v55 }
 0x478   : > { %v508_v48 = vpop.permute.xlu0 %507  ;;  %1447 = vpow2.f32 %v474_v54 }
 0x479   : > { %1308 = vmatpush3.bf16.msra.mxu0 %v508_v48  ;;  %1449 = vpow2.f32 %v696_v57 }
 0x47a   : > { %1309 = vmatprep.subr.bf16.mxu0 %v1505_v0  ;;  %v512_v49 = vpop.permute.xlu1 %511 }
 0x47b   : > { %v525_v50 = vand.u32 %v512_v49, %v1615_v5 }
 0x47d   : > { %1310 = vmatpush3.bf16.msra.mxu0 %v510_v47 }
 0x47e   : > { %1311 = vmatprep.subr.bf16.mxu0 %v1505_v0 }
 0x481   : > { %1312 = vmatpush3.bf16.msra.mxu0 %v525_v50  ;;  %v1821_v60 = vpop.eup %1445 }
 0x482   : > { %1343 = vmatprep.subr.bf16.mxu0 %v1505_v0  ;;  %v1823_v63 = vpop.eup %1447  ;;  %v704_v14 = vsel %vm223_vm2, %v1821_v60, 0.0 }
 0x483   : > { %v488_v15 = vsel %vm236_vm3, %v1823_v63, 0.0  ;;  %v1830_v35 = vpop.eup %1449 }
 0x484   : > { %734 = vrot.lane.b32.xlu1 %v1608_v62, %s1511_s15  ;;  %v707_v27 = vsel %vm223_vm2, %v1830_v35, 0.0 }
 0x488   : > { %736 = vrot.lane.b32.xlu1 %v1612_v1, %s1511_s15 }
 0x48b   : > { %732 = vrot.lane.b32.xlu0 %v1602_v59, %s1511_s15 }
 0x4a9   : > { %v685_v11 = vpop.xlane.xlu0 %684 }
 0x4aa   : > { %v692_v32 = vsub.f32 %v1756_v3, %v685_v11  ;;  %705 = vadd.xlane.f32.xlu0 %v704_v14 }
 0x4ab   : > { %v682_v26 = vpop.xlane.xlu1 %681 }
 0x4ac   : > { %v691_v19 = vsub.f32 %v1758_v9, %v682_v26  ;;  %489 = vadd.xlane.f32.xlu1 %v488_v15  ;;  %v700_v8 = vmul.f32 1.442695, %v692_v32 }
 0x4ad   : > { %v901_v4 = vpop.xlane.xlu0 %900 }
 0x4ae   : > { %v698_v23 = vmul.f32 1.442695, %v691_v19  ;;  %v914_v24 = vsub.f32 %v1760_v10, %v901_v4 }
 0x4af   : > { %v688_v25 = vpop.xlane.xlu1 %687 }
 0x4b0   : > { %1451 = vpow2.f32 %v698_v23  ;;  %v693_v3 = vsub.f32 %v1764_v12, %v688_v25  ;;  %708 = vadd.xlane.f32.xlu1 %v707_v27  ;;  %v919_v29 = vmul.f32 1.442695, %v914_v24 }
 0x4b1   : > { %v907_v28 = vpop.xlane.xlu0 %906  ;;  %1453 = vpow2.f32 %v700_v8 }
 0x4b2   : > { %v702_v30 = vmul.f32 1.442695, %v693_v3  ;;  %v916_v9 = vsub.f32 %v1770_v17, %v907_v28 }
 0x4b3   : > { %v904_v31 = vpop.xlane.xlu1 %903 }
 0x4b4   : > { %1455 = vpow2.f32 %v702_v30  ;;  %v915_v33 = vsub.f32 %v1772_v18, %v904_v31  ;;  %v923_v10 = vmul.f32 1.442695, %v916_v9 }
 0x4b5   : > { %1457 = vpow2.f32 %v919_v29  ;;  %v913_v49 = vpop.xlane.xlu0 %912 }
 0x4b6   : > { %v921_v34 = vmul.f32 1.442695, %v915_v33  ;;  %v918_v50 = vsub.f32 %v1778_v21, %v913_v49 }
 0x4b7   : > { %v910_v36 = vpop.xlane.xlu1 %909 }
 0x4b8   : > { %1459 = vpow2.f32 %v921_v34  ;;  %v917_v37 = vsub.f32 %v1780_v7, %v910_v36  ;;  %v927_v51 = vmul.f32 1.442695, %v918_v50 }
 0x4b9   : > { %1461 = vpow2.f32 %v923_v10 }
 0x4ba   : > { %v1840_v38 = vpop.eup %1451  ;;  %v925_v12 = vmul.f32 1.442695, %v917_v37 }
 0x4bb   : > { %v710_v39 = vsel %vm223_vm2, %v1840_v38, 0.0  ;;  %v1844_v13 = vpop.eup %1453 }
 0x4bc   : > { %711 = vadd.xlane.f32.xlu0 %v710_v39  ;;  %1463 = vpow2.f32 %v925_v12  ;;  %v713_v16 = vsel %vm223_vm2, %v1844_v13, 0.0 }
 0x4bd   : > { %1465 = vpow2.f32 %v927_v51 }
 0x4be   : > { %v1846_v17 = vpop.eup %1455 }
 0x4bf   : > { %v716_v18 = vsel %vm236_vm3, %v1846_v17, 0.0  ;;  %v1852_v7 = vpop.eup %1457 }
 0x4c0   : > { %717 = vadd.xlane.f32.xlu1 %v716_v18  ;;  %714 = vadd.xlane.f32.xlu0 %v713_v16  ;;  %v929_v22 = vsel %vm223_vm2, %v1852_v7, 0.0 }
 0x4c2   : > { %v1854_v20 = vpop.eup %1459 }
 0x4c3   : > { %v932_v43 = vsel %vm223_vm2, %v1854_v20, 0.0  ;;  %v1860_v45 = vpop.eup %1461 }
 0x4c4   : > { %933 = vadd.xlane.f32.xlu1 %v932_v43  ;;  %930 = vadd.xlane.f32.xlu0 %v929_v22  ;;  %v935_v46 = vsel %vm223_vm2, %v1860_v45, 0.0 }
 0x4c6   : > { %v1864_v47 = vpop.eup %1463 }
 0x4c7   : > { %v938_v48 = vsel %vm223_vm2, %v1864_v47, 0.0  ;;  %v1873_v52 = vpop.eup %1465 }
 0x4c8   : > { %936 = vadd.xlane.f32.xlu0 %v935_v46  ;;  %v941_v54 = vsel %vm236_vm3, %v1873_v52, 0.0 }
 0x4cc   : > { %939 = vadd.xlane.f32.xlu0 %v938_v48 }
 0x4d5   : > { %959 = vrot.lane.b32.xlu1 %v1608_v62, %s1512_s16 }
 0x4e2   : > { %957 = vrot.lane.b32.xlu0 %v1602_v59, %s1512_s16 }
 0x4f8   : > { %v478_v53 = vpop.xlane.xlu1 %477 }
 0x4f9   : > { %1467 = vrcp.f32 %v478_v53  ;;  %942 = vadd.xlane.f32.xlu1 %v941_v54 }
 0x4fa   : > { %v481_v55 = vpop.xlane.xlu0 %480 }
 0x4fb   : > { %1469 = vrcp.f32 %v481_v55 }
 0x500   : > { %v484_v57 = vpop.xlane.xlu1 %483 }
 0x501   : > { %1471 = vrcp.f32 %v484_v57 }
 0x502   : > { %v487_v62 = vpop.xlane.xlu0 %486 }
 0x503   : > { %v1468_v11 = vpop.eup %1467  ;;  %1473 = vrcp.f32 %v487_v62 }
 0x504   : > { %v492_v21 = vmul.f32 %v1468_v11, %v1792_v40  ;;  %v735_v26 = vpop.permute.xlu1 %734 }
 0x505   : > { %v1470_v59 = vpop.eup %1469 }
 0x506   : > { %v494_v14 = vmul.f32 %v1470_v59, %v1796_v41  ;;  %v733_v15 = vpop.permute.xlu0 %732 }
 0x508   : > { %v501_v32 = vpack.c.bf16 %v494_v14, %v492_v21  ;;  %v737_v8 = vpop.permute.xlu1 %736 }
 0x509   : > { %v750_v24 = vand.u32 %v737_v8, %v1615_v5 }
 0x50a   : > { %1314 = vmatmul.mubr.msk.bf16.vlgmr.msra.gmra.mrb[12].mxu0 %vm223_vm2, %v501_v32  ;;  %961 = vrot.lane.b32.xlu1 %v1612_v1, %s1512_s16 }
 0x50b   : > { %v1472_v19 = vpop.eup %1471  ;;  %1344 = vmatpush3.bf16.msra.mxu0 %v733_v15  ;;  %1317 = vmatprep.mubr.msk.bf16.mxu0 %vm1507_vm0, %v1505_v0 }
 0x50c   : > { %1345 = vmatprep.subr.bf16.mxu0 %v1505_v0  ;;  %v496_v40 = vmul.f32 %v1472_v19, %v1800_v42 }
 0x50d   : > { %v1474_v4 = vpop.eup %1473 }
 0x50e   : > { %v498_v41 = vmul.f32 %v1474_v4, %v1804_v44 }
 0x50f   : > { %1346 = vmatpush3.bf16.msra.mxu0 %v735_v26 }
 0x510   : > { %1347 = vmatprep.subr.bf16.mxu0 %v1505_v0  ;;  %v502_v23 = vpack.c.bf16 %v498_v41, %v496_v40 }
 0x512   : > { %1318 = vmatmul.mubr.msk.bf16.gmra.mrb[16].mxu0 %vm223_vm2, %v502_v23 }
 0x513   : > { %1348 = vmatpush3.bf16.msra.mxu0 %v750_v24  ;;  %1321 = vmatprep.mubr.msk.bf16.mxu0 %vm1507_vm0, %v1505_v0 }
 0x514   : > { %1379 = vmatprep.subr.bf16.mxu0 %v1505_v0 }
 0x537   : > { %v706_v25 = vpop.xlane.xlu0 %705 }
 0x539   : > { %v490_v1 = vpop.xlane.xlu1 %489 }
 0x53a   : > { %1475 = vrcp.f32 %v490_v1 }
 0x53d   : > { %v709_v42 = vpop.xlane.xlu1 %708 }
 0x53e   : > { %1477 = vrcp.f32 %v709_v42 }
 0x53f   : > { %1479 = vrcp.f32 %v706_v25 }
 0x544   : > { %v1476_v44 = vpop.eup %1475 }
 0x545   : > { %v500_v27 = vmul.f32 %v1476_v44, %v1823_v63 }
 0x547   : > { %v503_v3 = vpack.c.bf16 %v500_v27, %v500_v27 }
 0x548   : > { %v1478_v28 = vpop.eup %1477 }
 0x549   : > { %1322 = vmatmul.mubr.msk.bf16.gmra.mrb[20].mxu0 %vm223_vm2, %v503_v3  ;;  %v712_v29 = vpop.xlane.xlu0 %711  ;;  %v1480_v30 = vpop.eup %1479  ;;  %v722_v9 = vmul.f32 %v1478_v28, %v1830_v35 }
 0x54a   : > { %1349 = vmatprep.mubr.msk.bf16.mxu0 %vm1507_vm0, %v1505_v0  ;;  %v720_v31 = vmul.f32 %v1480_v30, %v1821_v60  ;;  %1481 = vrcp.f32 %v712_v29 }
 0x54c   : > { %v729_v10 = vpack.c.bf16 %v722_v9, %v720_v31 }
 0x54d   : > { %v715_v33 = vpop.xlane.xlu0 %714  ;;  %v718_v34 = vpop.xlane.xlu1 %717 }
 0x54e   : > { %1483 = vrcp.f32 %v715_v33 }
 0x54f   : > { %1485 = vrcp.f32 %v718_v34 }
 0x551   : > { %1350 = vmatmul.mubr.msk.bf16.vlgmr.msra.gmra.mrb[24].mxu0 %vm223_vm2, %v729_v10  ;;  %v931_v63 = vpop.xlane.xlu0 %930  ;;  %v934_v18 = vpop.xlane.xlu1 %933 }
 0x552   : > { %1353 = vmatprep.mubr.msk.bf16.mxu0 %vm1507_vm0, %v1505_v0  ;;  %1487 = vrcp.f32 %v934_v18 }
 0x553   : > { %1489 = vrcp.f32 %v931_v63 }
 0x554   : > { %v1482_v37 = vpop.eup %1481 }
 0x555   : > { %v937_v36 = vpop.xlane.xlu0 %936  ;;  %v724_v35 = vmul.f32 %v1482_v37, %v1840_v38  ;;  %v960_v48 = vpop.permute.xlu1 %959 }
 0x558   : > { %v1484_v12 = vpop.eup %1483 }
 0x559   : > { %v940_v39 = vpop.xlane.xlu0 %939  ;;  %v726_v60 = vmul.f32 %v1484_v12, %v1844_v13  ;;  %v1486_v43 = vpop.eup %1485 }
 0x55a   : > { %v728_v46 = vmul.f32 %v1486_v43, %v1846_v17  ;;  %1491 = vrcp.f32 %v940_v39 }
 0x55b   : > { %v730_v16 = vpack.c.bf16 %v726_v60, %v724_v35  ;;  %1493 = vrcp.f32 %v937_v36 }
 0x55c   : > { %v731_v49 = vpack.c.bf16 %v728_v46, %v728_v46  ;;  %v1488_v38 = vpop.eup %1487 }
 0x55d   : > { %v958_v22 = vpop.permute.xlu0 %957  ;;  %1354 = vmatmul.mubr.msk.bf16.gmra.mrb[28].mxu0 %vm223_vm2, %v730_v16  ;;  %v1490_v50 = vpop.eup %1489  ;;  %v947_v51 = vmul.f32 %v1488_v38, %v1854_v20 }
 0x55e   : > { %1380 = vmatpush3.bf16.msra.mxu0 %v958_v22  ;;  %1357 = vmatprep.mubr.msk.bf16.mxu0 %vm1507_vm0, %v1505_v0  ;;  %v945_v17 = vmul.f32 %v1490_v50, %v1852_v7 }
 0x55f   : > { %1381 = vmatprep.subr.bf16.mxu0 %v1505_v0 }
 0x560   : > { %v954_v55 = vpack.c.bf16 %v947_v51, %v945_v17 }
 0x562   : > { %1382 = vmatpush3.bf16.msra.mxu0 %v960_v48 }
 0x563   : > { %1383 = vmatprep.subr.bf16.mxu0 %v1505_v0 }
 0x564   : > { %v1492_v57 = vpop.eup %1491 }
 0x565   : > { %1358 = vmatmul.mubr.msk.bf16.gmra.mrb[32].mxu0 %vm223_vm2, %v731_v49  ;;  %v1494_v62 = vpop.eup %1493  ;;  %v951_v11 = vmul.f32 %v1492_v57, %v1864_v47 }
 0x566   : > { %1385 = vmatprep.mubr.msk.bf16.mxu0 %vm1507_vm0, %v1505_v0  ;;  %v949_v59 = vmul.f32 %v1494_v62, %v1860_v45 }
 0x568   : > { %v955_v20 = vpack.c.bf16 %v951_v11, %v949_v59 }
 0x586   : > { %v943_v13 = vpop.xlane.xlu1 %942 }
 0x587   : > { %1495 = vrcp.f32 %v943_v13 }
 0x58a   : > { %v962_v53 = vpop.permute.xlu1 %961 }
 0x58b   : > { %v975_v54 = vand.u32 %v962_v53, %v1615_v5 }
 0x58d   : > { %1384 = vmatpush3.bf16.msra.mxu0 %v975_v54 }
 0x590   : > { %1386 = vmatmul.mubr.msk.bf16.vlgmr.msra.gmra.mrb[36].mxu0 %vm223_vm2, %v954_v55 }
 0x591   : > { %1389 = vmatprep.mubr.msk.bf16.mxu0 %vm1507_vm0, %v1505_v0  ;;  %v1496_v21 = vpop.eup %1495 }
 0x592   : > { %v953_v5 = vmul.f32 %v1496_v21, %v1873_v52 }
 0x594   : > { %v956_v7 = vpack.c.bf16 %v953_v5, %v953_v5 }
 0x598   : > { %1390 = vmatmul.mubr.msk.bf16.gmra.mrb[40].mxu0 %vm223_vm2, %v955_v20 }
 0x599   : > { %1393 = vmatprep.mubr.msk.bf16.mxu0 %vm1507_vm0, %v1505_v0 }
 0x5a0   : > { %1394 = vmatmul.mubr.msk.bf16.gmra.mrb[44].mxu0 %vm223_vm2, %v956_v7 }
 0x5dd   : > { %v561_v14 = vpop.f32.mrb[12].mxu0 }
 0x5de   : > { %1038 = vrot.lane.b32.xlu0 %v561_v14, %s1514_s18  ;;  %v1315_v32 = vpop.f32.mrb[13].mxu0 }
 0x5df   : > { %v564_v26 = vpop.f32.mrb[14].mxu0 }
 0x5e0   : > { %1040 = vrot.lane.b32.xlu1 %v564_v26, %s1514_s18  ;;  %v1316_v45 = vpop.f32.mrb[15].mxu0 }
 0x5e5   : > { %v569_v47 = vpop.f32.mrb[16].mxu0 }
 0x5e6   : > { %1042 = vrot.lane.b32.xlu0 %v569_v47, %s1514_s18  ;;  %v1319_v15 = vpop.f32.mrb[17].mxu0 }
 0x5e7   : > { %v572_v19 = vpop.f32.mrb[18].mxu0 }
 0x5e8   : > { %1044 = vrot.lane.b32.xlu1 %v572_v19, %s1514_s18  ;;  %v1320_v0 = vpop.f32.mrb[19].mxu0 }
 0x61c   : > { %v577_v52 = vpop.f32.mrb[20].mxu0 }
 0x61d   : > { %1046 = vrot.lane.b32.xlu0 %v577_v52, %s1514_s18  ;;  %v1323_v4 = vpop.f32.mrb[21].mxu0 }
 0x61e   : > { %v580_v8 = vpop.f32.mrb[22].mxu0 }
 0x61f   : > { %v1324_v40 = vpop.f32.mrb[23].mxu0 }
 0x624   : > { %v786_v41 = vpop.f32.mrb[24].mxu0 }
 0x625   : > { %1058 = vrot.lane.b32.xlu1 %v786_v41, %s1513_s17  ;;  %v1351_v23 = vpop.f32.mrb[25].mxu0 }
 0x626   : > { %v789_v24 = vpop.f32.mrb[26].mxu0 }
 0x627   : > { %1060 = vrot.lane.b32.xlu0 %v789_v24, %s1513_s17  ;;  %v1352_v1 = vpop.f32.mrb[27].mxu0 }
 0x630   : > { %v794_v25 = vpop.f32.mrb[28].mxu0 }
 0x631   : > { %1062 = vrot.lane.b32.xlu1 %v794_v25, %s1513_s17  ;;  %v1355_v42 = vpop.f32.mrb[29].mxu0 }
 0x632   : > { %v797_v44 = vpop.f32.mrb[30].mxu0 }
 0x633   : > { %1064 = vrot.lane.b32.xlu0 %v797_v44, %s1513_s17  ;;  %v1356_v27 = vpop.f32.mrb[31].mxu0 }
 0x638   : > { %v802_v3 = vpop.f32.mrb[32].mxu0 }
 0x639   : > { %1066 = vrot.lane.b32.xlu1 %v802_v3, %s1513_s17  ;;  %v1359_v28 = vpop.f32.mrb[33].mxu0 }
 0x63a   : > { %v805_v29 = vpop.f32.mrb[34].mxu0 }
 0x63b   : > { %v1360_v30 = vpop.f32.mrb[35].mxu0 }
 0x650   : > { %v1039_v18 = vpop.permute.xlu0 %1038 }
 0x651   : > { %v1093_v51 = vsel %vm143_vm1, %v1712_v56, %v1039_v18 }
 0x652   : > { %v1041_v16 = vpop.permute.xlu1 %1040 }
 0x653   : > { %v1094_v54 = vsel %vm143_vm1, %v1714_v58, %v1041_v16 }
 0x658   : > { %v1043_v43 = vpop.permute.xlu0 %1042 }
 0x659   : > { %v1095_v11 = vsel %vm143_vm1, %v1716_v61, %v1043_v43 }
 0x65a   : > { %v1045_v22 = vpop.permute.xlu1 %1044 }
 0x65b   : > { %v1096_v58 = vsel %vm143_vm1, %v1718_v2, %v1045_v22 }
 0x663   : > { %v1011_v9 = vpop.f32.mrb[36].mxu0 }
 0x664   : > { %1078 = vrot.lane.b32.xlu0 %v1011_v9, %s1509_s13  ;;  %v1387_v31 = vpop.f32.mrb[37].mxu0 }
 0x665   : > { %v1014_v33 = vpop.f32.mrb[38].mxu0 }
 0x666   : > { %1080 = vrot.lane.b32.xlu1 %v1014_v33, %s1509_s13  ;;  %v1388_v10 = vpop.f32.mrb[39].mxu0 }
 0x66b   : > { %v1019_v34 = vpop.f32.mrb[40].mxu0 }
 0x66c   : > { %1082 = vrot.lane.b32.xlu0 %v1019_v34, %s1509_s13  ;;  %v1391_v63 = vpop.f32.mrb[41].mxu0 }
 0x66d   : > { %v1022_v36 = vpop.f32.mrb[42].mxu0 }
 0x66e   : > { %1084 = vrot.lane.b32.xlu1 %v1022_v36, %s1509_s13  ;;  %v1392_v37 = vpop.f32.mrb[43].mxu0 }
 0x673   : > { %v1027_v12 = vpop.f32.mrb[44].mxu0 }
 0x674   : > { %1086 = vrot.lane.b32.xlu0 %v1027_v12, %s1509_s13  ;;  %v1395_v39 = vpop.f32.mrb[45].mxu0 }
 0x675   : > { %v1030_v35 = vpop.f32.mrb[46].mxu0 }
 0x676   : > { %v1396_v60 = vpop.f32.mrb[47].mxu0 }
 0x68f   : > { %v1047_v46 = vpop.permute.xlu0 %1046 }
 0x690   : > { %v1097_v61 = vsel %vm143_vm1, %v1720_v6, %v1047_v46 }
 0x697   : > { %v1059_v48 = vpop.permute.xlu1 %1058 }
 0x698   : > { %v1099_v17 = vsel %vm1098_vm6, %v1093_v51, %v1059_v48 }
 0x699   : > { %v1061_v49 = vpop.permute.xlu0 %1060 }
 0x69a   : > { %v1100_v57 = vsel %vm1098_vm6, %v1094_v54, %v1061_v49 }
 0x6a3   : > { %v1063_v38 = vpop.permute.xlu1 %1062 }
 0x6a4   : > { %v1101_v59 = vsel %vm1098_vm6, %v1095_v11, %v1063_v38 }
 0x6a5   : > { %v1065_v13 = vpop.permute.xlu0 %1064 }
 0x6a6   : > { %v1102_v5 = vsel %vm1098_vm6, %v1096_v58, %v1065_v13 }
 0x6ab   : > { %v1067_v50 = vpop.permute.xlu1 %1066 }
 0x6ac   : > { %v1103_v32 = vsel %vm1098_vm6, %v1097_v61, %v1067_v50 }
 0x6d6   : > { %v1079_v53 = vpop.permute.xlu0 %1078 }
 0x6d7   : > { %v1105_v55 = vsel %vm1104_vm7, %v1099_v17, %v1079_v53 }
 0x6d8   : > { %1111 = vst.msk [vmem:[%s116_s22] sm:$0xff] %vm1110_vm8, %v1105_v55  ;;  %v1081_v62 = vpop.permute.xlu1 %1080 }
 0x6d9   : > { %v1106_v56 = vsel %vm1104_vm7, %v1100_v57, %v1081_v62 }
 0x6da   : > { %1112 = vst.msk [vmem:[%s116_s22 + $0x8] sm:$0xff] %vm1110_vm8, %v1106_v56 }
 0x6de   : > { %v1083_v20 = vpop.permute.xlu0 %1082 }
 0x6df   : > { %v1107_v21 = vsel %vm1104_vm7, %v1101_v59, %v1083_v20 }
 0x6e0   : > { %1113 = vst.msk [vmem:[%s116_s22 + $0x10] sm:$0xff] %vm1110_vm8, %v1107_v21  ;;  %v1085_v7 = vpop.permute.xlu1 %1084 }
 0x6e1   : > { %v1108_v14 = vsel %vm1104_vm7, %v1102_v5, %v1085_v7 }
 0x6e2   : > { %1114 = vst.msk [vmem:[%s116_s22 + $0x18] sm:$0xff] %vm1110_vm8, %v1108_v14 }
 0x6e6   : > { %v1087_v26 = vpop.permute.xlu0 %1086 }
 0x6e7   : > { %v1109_v2 = vsel %vm1104_vm7, %v1103_v32, %v1087_v26 }
 0x6e8   : > { %1116 = vst.msk [vmem:[%s116_s22 + $0x20] sm:$0x7f] %vm1115_vm9, %v1109_v2 }
 0x6e9 PF: > { %s11_s6 = sadd.s32 1, %s1503_s6  }
 0x6ea   : > { %p8_p4 = scmp.ge.s32.totalorder %s11_s6, 4  }
 0x6ec   :  { %10 = sbr.rel (!%p8_p4) target bundleno = 1 (0x1), region = 54 }

// kernel: wav2vec2_forward.45
= control target key start
LH: loop header
LB: loop body
LE: loop exit
PB: predicated region body
PF: predicated region fallthrough
CT: control target
= control target key end

     0   :  { %v234_v0 = vmov 0.0   ;;  %vm235_vm0 = vmmov 0   ;;  %vm69_vm1 = vcmask 523264   ;;  %vm158_vm2 = vcmask 261120   ;;  %s351_s1 = inlined_call_operand.vmem [shape: bf16[64,32], index: 1, kind: input, shape index: {}]   ;;  %s352_s0 = inlined_call_operand.vmem [shape: f32[78,64], index: 0, kind: input, shape index: {}]   ;;  %s353_s2 = inlined_call_operand.vmem [shape: f32[1,32], index: 2, kind: input, shape index: {}]   ;;  %s354_s3 = inlined_call_operand.vmem [shape: f32[78,32], index: 3, kind: output, shape index: {}]  }
   0x1   :  { %192 = vmatprep.subr.bf16.mxu0 %v234_v0  ;;  %v230_v1 = vld [vmem:[%s351_s1] sm:$0xff]   ;;  %220 = vmatprep.subr.bf16.mxu1 %v234_v0  ;;  %v231_v2 = vld [vmem:[%s351_s1 + $0x8] sm:$0xff]   ;;  %v232_v3 = vld [vmem:[%s351_s1 + $0x10] sm:$0xff]  }
   0x2   :  { %200 = vmatprep.mubr.msk.bf16.mxu0 %vm235_vm0, %v234_v0  ;;  %212 = vmatprep.mubr.msk.bf16.mxu1 %vm235_vm0, %v234_v0  ;;  %v233_v4 = vld [vmem:[%s351_s1 + $0x18] sm:$0xff]   ;;  %v15_v5 = vld [vmem:[%s352_s0] sm:$0xff]  ;;  %v16_v6 = vld [vmem:[%s352_s0 + $0x8] sm:$0xff] }
   0x3   :  { %193 = vmatpush3.bf16.msra.mxu0 %v230_v1  ;;  %224 = vmatpush3.bf16.msra.mxu1 %v230_v1  ;;  %v21_v7 = vld [vmem:[%s352_s0 + $0x30] sm:$0xff]  ;;  %v22_v8 = vld [vmem:[%s352_s0 + $0x38] sm:$0xff]  ;;  %v25_v9 = vpack.c.bf16 %v16_v6, %v15_v5  ;;  %v23_v13 = vld [vmem:[%s352_s0 + $0x40] sm:$0xff] }
   0x4   :  { %194 = vmatprep.subr.bf16.mxu0 %v234_v0  ;;  %221 = vmatprep.subr.bf16.mxu1 %v234_v0  ;;  %v28_v10 = vpack.c.bf16 %v22_v8, %v21_v7  ;;  %v17_v11 = vld [vmem:[%s352_s0 + $0x10] sm:$0xff]  ;;  %v18_v12 = vld [vmem:[%s352_s0 + $0x18] sm:$0xff]  ;;  %v24_v14 = vld [vmem:[%s352_s0 + $0x48] sm:$0xff] }
   0x5   :  { %v26_v15 = vpack.c.bf16 %v18_v12, %v17_v11  ;;  %v29_v16 = vpack.c.bf16 %v24_v14, %v23_v13  ;;  %v19_v17 = vld [vmem:[%s352_s0 + $0x20] sm:$0xff]  ;;  %v20_v18 = vld [vmem:[%s352_s0 + $0x28] sm:$0xff] }
   0x6   :  { %v27_v19 = vpack.c.bf16 %v20_v18, %v19_v17  ;;  %v173_v20 = vld [vmem:[%s353_s2] ss:$0 sm:$0xff] }
   0x7   :  { %195 = vmatpush3.bf16.msra.mxu0 %v231_v2  ;;  %225 = vmatpush3.bf16.msra.mxu1 %v231_v2 }
   0x8   :  { %196 = vmatprep.subr.bf16.mxu0 %v234_v0  ;;  %222 = vmatprep.subr.bf16.mxu1 %v234_v0 }
   0xb   :  { %197 = vmatpush3.bf16.msra.mxu0 %v232_v3  ;;  %226 = vmatpush3.bf16.msra.mxu1 %v232_v3 }
   0xc   :  { %198 = vmatprep.subr.bf16.mxu0 %v234_v0  ;;  %223 = vmatprep.subr.bf16.mxu1 %v234_v0 }
   0xf   :  { %199 = vmatpush3.bf16.msra.mxu0 %v233_v4  ;;  %227 = vmatpush3.bf16.msra.mxu1 %v233_v4 }
  0x12   :  { %201 = vmatmul.mubr.msk.bf16.vlgmr.msra.gmra.mrb[0].mxu0 %vm69_vm1, %v25_v9  ;;  %213 = vmatmul.mubr.msk.bf16.vlgmr.msra.gmra.mrb[0].mxu1 %vm69_vm1, %v28_v10 }
  0x13   :  { %204 = vmatprep.mubr.msk.bf16.mxu0 %vm235_vm0, %v234_v0  ;;  %216 = vmatprep.mubr.msk.bf16.mxu1 %vm235_vm0, %v234_v0 }
  0x1a   :  { %205 = vmatmul.mubr.msk.bf16.gmra.mrb[4].mxu0 %vm69_vm1, %v26_v15  ;;  %217 = vmatmul.mubr.msk.bf16.gmra.mrb[4].mxu1 %vm69_vm1, %v29_v16 }
  0x1b   :  { %208 = vmatprep.mubr.msk.bf16.mxu0 %vm235_vm0, %v234_v0 }
  0x22   :  { %209 = vmatmul.mubr.msk.bf16.gmra.mrb[8].mxu0 %vm69_vm1, %v27_v19 }
  0xe5   :  { %v119_v21 = vpop.f32.mrb[0].mxu0  ;;  %v143_v22 = vpop.f32.mrb[0].mxu1 }
  0xe6   :  { %v120_v23 = vadd.f32 %v173_v20, %v119_v21  ;;  %v202_v24 = vpop.f32.mrb[1].mxu0  ;;  %v144_v25 = vadd.f32 %v173_v20, %v143_v22  ;;  %v214_v26 = vpop.f32.mrb[1].mxu1 }
  0xe7   :  { %v122_v27 = vpop.f32.mrb[2].mxu0  ;;  %v146_v28 = vpop.f32.mrb[2].mxu1 }
  0xe8   :  { %159 = vst.msk [vmem:[%s354_s3] sm:$0xff] %vm158_vm2, %v120_v23  ;;  %v123_v29 = vadd.f32 %v173_v20, %v122_v27  ;;  %v203_v30 = vpop.f32.mrb[3].mxu0  ;;  %165 = vst.msk [vmem:[%s354_s3 + $0x30] sm:$0xff] %vm158_vm2, %v144_v25  ;;  %v147_v31 = vadd.f32 %v173_v20, %v146_v28  ;;  %v215_v32 = vpop.f32.mrb[3].mxu1 }
  0xea   :  { %160 = vst.msk [vmem:[%s354_s3 + $0x8] sm:$0xff] %vm158_vm2, %v123_v29  ;;  %166 = vst.msk [vmem:[%s354_s3 + $0x38] sm:$0xff] %vm158_vm2, %v147_v31 }
  0xed   :  { %v127_v33 = vpop.f32.mrb[4].mxu0  ;;  %v151_v34 = vpop.f32.mrb[4].mxu1 }
  0xee   :  { %v128_v35 = vadd.f32 %v173_v20, %v127_v33  ;;  %v206_v36 = vpop.f32.mrb[5].mxu0  ;;  %v152_v37 = vadd.f32 %v173_v20, %v151_v34  ;;  %v218_v38 = vpop.f32.mrb[5].mxu1 }
  0xef   :  { %v130_v39 = vpop.f32.mrb[6].mxu0  ;;  %v154_v40 = vpop.f32.mrb[6].mxu1 }
  0xf0   :  { %161 = vst.msk [vmem:[%s354_s3 + $0x10] sm:$0xff] %vm158_vm2, %v128_v35  ;;  %v131_v41 = vadd.f32 %v173_v20, %v130_v39  ;;  %v207_v42 = vpop.f32.mrb[7].mxu0  ;;  %167 = vst.msk [vmem:[%s354_s3 + $0x40] sm:$0xff] %vm158_vm2, %v152_v37  ;;  %v155_v43 = vadd.f32 %v173_v20, %v154_v40  ;;  %v219_v44 = vpop.f32.mrb[7].mxu1 }
  0xf2   :  { %162 = vst.msk [vmem:[%s354_s3 + $0x18] sm:$0xff] %vm158_vm2, %v131_v41  ;;  %168 = vst.msk [vmem:[%s354_s3 + $0x48] sm:$0xff] %vm158_vm2, %v155_v43 }
  0xf5   :  { %v135_v45 = vpop.f32.mrb[8].mxu0 }
  0xf6   :  { %v136_v46 = vadd.f32 %v173_v20, %v135_v45  ;;  %v210_v47 = vpop.f32.mrb[9].mxu0 }
  0xf7   :  { %v138_v48 = vpop.f32.mrb[10].mxu0 }
  0xf8   :  { %163 = vst.msk [vmem:[%s354_s3 + $0x20] sm:$0xff] %vm158_vm2, %v136_v46  ;;  %v139_v49 = vadd.f32 %v173_v20, %v138_v48  ;;  %v211_v50 = vpop.f32.mrb[11].mxu0 }
  0xfa   :  { %164 = vst.msk [vmem:[%s354_s3 + $0x28] sm:$0xff] %vm158_vm2, %v139_v49 }

// kernel: wav2vec2_forward.35
= control target key start
LH: loop header
LB: loop body
LE: loop exit
PB: predicated region body
PF: predicated region fallthrough
CT: control target
= control target key end

     0   :  { %v304_v0 = vmov 0.0   ;;  %vm305_vm0 = vmmov 0   ;;  %vm69_vm1 = vcmask 523264   ;;  %s423_s1 = inlined_call_operand.vmem [shape: bf16[64,128], index: 1, kind: input, shape index: {}]   ;;  %s424_s0 = inlined_call_operand.vmem [shape: f32[78,64], index: 0, kind: input, shape index: {}]   ;;  %s425_s2 = inlined_call_operand.vmem [shape: f32[1,128], index: 2, kind: input, shape index: {}]   ;;  %s426_s3 = inlined_call_operand.vmem [shape: f32[78,128], index: 3, kind: output, shape index: {}]  }
   0x1   :  { %242 = vmatprep.subr.bf16.mxu0 %v304_v0  ;;  %270 = vmatprep.subr.bf16.mxu1 %v304_v0  ;;  %v280_v1 = vld [vmem:[%s423_s1] sm:$0xff]   ;;  %v281_v2 = vld [vmem:[%s423_s1 + $0x8] sm:$0xff]   ;;  %v282_v3 = vld [vmem:[%s423_s1 + $0x10] sm:$0xff]  }
   0x2   :  { %250 = vmatprep.mubr.msk.bf16.mxu0 %vm305_vm0, %v304_v0  ;;  %262 = vmatprep.mubr.msk.bf16.mxu1 %vm305_vm0, %v304_v0  ;;  %v283_v4 = vld [vmem:[%s423_s1 + $0x18] sm:$0xff]   ;;  %v15_v5 = vld [vmem:[%s424_s0] sm:$0xff]  ;;  %v16_v6 = vld [vmem:[%s424_s0 + $0x8] sm:$0xff] }
   0x3   :  { %243 = vmatpush3.bf16.msra.mxu0 %v280_v1  ;;  %274 = vmatpush3.bf16.msra.mxu1 %v280_v1  ;;  %v21_v7 = vld [vmem:[%s424_s0 + $0x30] sm:$0xff]  ;;  %v22_v8 = vld [vmem:[%s424_s0 + $0x38] sm:$0xff]  ;;  %v25_v9 = vpack.c.bf16 %v16_v6, %v15_v5  ;;  %v23_v13 = vld [vmem:[%s424_s0 + $0x40] sm:$0xff] }
   0x4   :  { %244 = vmatprep.subr.bf16.mxu0 %v304_v0  ;;  %271 = vmatprep.subr.bf16.mxu1 %v304_v0  ;;  %v28_v10 = vpack.c.bf16 %v22_v8, %v21_v7  ;;  %v17_v11 = vld [vmem:[%s424_s0 + $0x10] sm:$0xff]  ;;  %v18_v12 = vld [vmem:[%s424_s0 + $0x18] sm:$0xff]  ;;  %v24_v14 = vld [vmem:[%s424_s0 + $0x48] sm:$0xff] }
   0x5   :  { %v26_v15 = vpack.c.bf16 %v18_v12, %v17_v11  ;;  %v29_v16 = vpack.c.bf16 %v24_v14, %v23_v13  ;;  %v19_v17 = vld [vmem:[%s424_s0 + $0x20] sm:$0xff]  ;;  %v20_v18 = vld [vmem:[%s424_s0 + $0x28] sm:$0xff] }
   0x6   :  { %v27_v19 = vpack.c.bf16 %v20_v18, %v19_v17  ;;  %v381_v20 = vld [vmem:[%s425_s2] ss:$0 sm:$0xff] }
   0x7   :  { %245 = vmatpush3.bf16.msra.mxu0 %v281_v2  ;;  %275 = vmatpush3.bf16.msra.mxu1 %v281_v2 }
   0x8   :  { %246 = vmatprep.subr.bf16.mxu0 %v304_v0  ;;  %272 = vmatprep.subr.bf16.mxu1 %v304_v0 }
   0xb   :  { %247 = vmatpush3.bf16.msra.mxu0 %v282_v3  ;;  %276 = vmatpush3.bf16.msra.mxu1 %v282_v3 }
   0xc   :  { %248 = vmatprep.subr.bf16.mxu0 %v304_v0  ;;  %273 = vmatprep.subr.bf16.mxu1 %v304_v0 }
   0xf   :  { %249 = vmatpush3.bf16.msra.mxu0 %v283_v4  ;;  %277 = vmatpush3.bf16.msra.mxu1 %v283_v4 }
  0x12   :  { %251 = vmatmul.mubr.msk.bf16.vlgmr.msra.gmra.mrb[0].mxu0 %vm69_vm1, %v25_v9  ;;  %263 = vmatmul.mubr.msk.bf16.vlgmr.msra.gmra.mrb[0].mxu1 %vm69_vm1, %v28_v10 }
  0x13   :  { %254 = vmatprep.mubr.msk.bf16.mxu0 %vm305_vm0, %v304_v0  ;;  %266 = vmatprep.mubr.msk.bf16.mxu1 %vm305_vm0, %v304_v0 }
  0x1a   :  { %255 = vmatmul.mubr.msk.bf16.gmra.mrb[4].mxu0 %vm69_vm1, %v26_v15  ;;  %267 = vmatmul.mubr.msk.bf16.gmra.mrb[4].mxu1 %vm69_vm1, %v29_v16 }
  0x1b   :  { %258 = vmatprep.mubr.msk.bf16.mxu0 %vm305_vm0, %v304_v0 }
  0x22   :  { %259 = vmatmul.mubr.msk.bf16.gmra.mrb[8].mxu0 %vm69_vm1, %v27_v19 }
  0xe5   :  { %v119_v21 = vpop.f32.mrb[0].mxu0  ;;  %v143_v22 = vpop.f32.mrb[0].mxu1 }
  0xe6   :  { %v120_v23 = vadd.f32 %v381_v20, %v119_v21  ;;  %v144_v24 = vadd.f32 %v381_v20, %v143_v22  ;;  %v252_v25 = vpop.f32.mrb[1].mxu0  ;;  %v264_v26 = vpop.f32.mrb[1].mxu1 }
  0xe7   :  { %v122_v27 = vpop.f32.mrb[2].mxu0  ;;  %v146_v28 = vpop.f32.mrb[2].mxu1 }
  0xe8   :  { %v169_v29 = vmul.f32 0.70710677, %v120_v23  ;;  %v175_v30 = vmul.f32 0.70710677, %v144_v24  ;;  %v123_v31 = vadd.f32 %v381_v20, %v122_v27  ;;  %v147_v32 = vadd.f32 %v381_v20, %v146_v28  ;;  %v253_v33 = vpop.f32.mrb[3].mxu0  ;;  %v265_v34 = vpop.f32.mrb[3].mxu1 }
  0xe9   :  { %v158_v55 = vmul.f32 0.5, %v120_v23  ;;  %v164_v58 = vmul.f32 0.5, %v144_v24 }
  0xea   :  { %284 = verf.f32 %v169_v29  ;;  %v170_v35 = vmul.f32 0.70710677, %v123_v31  ;;  %v176_v36 = vmul.f32 0.70710677, %v147_v32  ;;  %v159_v3 = vmul.f32 0.5, %v123_v31 }
  0xeb   :  { %286 = verf.f32 %v175_v30  ;;  %v165_v7 = vmul.f32 0.5, %v147_v32 }
  0xec   :  { %288 = verf.f32 %v170_v35 }
  0xed   :  { %v127_v37 = vpop.f32.mrb[4].mxu0  ;;  %v151_v38 = vpop.f32.mrb[4].mxu1  ;;  %290 = verf.f32 %v176_v36 }
  0xee   :  { %v128_v39 = vadd.f32 %v381_v20, %v127_v37  ;;  %v152_v40 = vadd.f32 %v381_v20, %v151_v38  ;;  %v256_v41 = vpop.f32.mrb[5].mxu0  ;;  %v268_v42 = vpop.f32.mrb[5].mxu1 }
  0xef   :  { %v130_v43 = vpop.f32.mrb[6].mxu0  ;;  %v154_v44 = vpop.f32.mrb[6].mxu1 }
  0xf0   :  { %v171_v45 = vmul.f32 0.70710677, %v128_v39  ;;  %v177_v46 = vmul.f32 0.70710677, %v152_v40  ;;  %v131_v47 = vadd.f32 %v381_v20, %v130_v43  ;;  %v155_v48 = vadd.f32 %v381_v20, %v154_v44  ;;  %v257_v49 = vpop.f32.mrb[7].mxu0  ;;  %v269_v50 = vpop.f32.mrb[7].mxu1 }
  0xf1   :  { %v160_v15 = vmul.f32 0.5, %v128_v39  ;;  %v166_v17 = vmul.f32 0.5, %v152_v40 }
  0xf2   :  { %292 = verf.f32 %v171_v45  ;;  %v172_v51 = vmul.f32 0.70710677, %v131_v47  ;;  %v178_v53 = vmul.f32 0.70710677, %v155_v48  ;;  %v161_v23 = vmul.f32 0.5, %v131_v47 }
  0xf3   :  { %294 = verf.f32 %v177_v46  ;;  %v167_v25 = vmul.f32 0.5, %v155_v48 }
  0xf4   :  { %v285_v52 = vpop.eup %284  ;;  %296 = verf.f32 %v172_v51 }
  0xf5   :  { %v287_v54 = vpop.eup %286  ;;  %v189_v56 = vadd.f32 1.0, %v285_v52  ;;  %v135_v57 = vpop.f32.mrb[8].mxu0  ;;  %298 = verf.f32 %v178_v53 }
  0xf6   :  { %v195_v59 = vadd.f32 1.0, %v287_v54  ;;  %v136_v60 = vadd.f32 %v381_v20, %v135_v57  ;;  %v260_v61 = vpop.f32.mrb[9].mxu0  ;;  %v289_v62 = vpop.eup %288 }
  0xf7   :  { %v199_v63 = vmul.f32 %v189_v56, %v158_v55  ;;  %v138_v0 = vpop.f32.mrb[10].mxu0  ;;  %v291_v1 = vpop.eup %290  ;;  %v190_v4 = vadd.f32 1.0, %v289_v62 }
  0xf8   :  { %v205_v2 = vmul.f32 %v195_v59, %v164_v58  ;;  %v173_v5 = vmul.f32 0.70710677, %v136_v60  ;;  %v261_v6 = vpop.f32.mrb[11].mxu0  ;;  %v196_v8 = vadd.f32 1.0, %v291_v1  ;;  %v139_v9 = vadd.f32 %v381_v20, %v138_v0 }
  0xf9   :  { %209 = vst [vmem:[%s426_s3] sm:$0xff] %v199_v63  ;;  %v200_v10 = vmul.f32 %v190_v4, %v159_v3  ;;  %v162_v30 = vmul.f32 0.5, %v136_v60 }
  0xfa   :  { %215 = vst [vmem:[%s426_s3 + $0x30] sm:$0xff] %v205_v2  ;;  %300 = verf.f32 %v173_v5  ;;  %v206_v11 = vmul.f32 %v196_v8, %v165_v7  ;;  %v174_v12 = vmul.f32 0.70710677, %v139_v9  ;;  %v163_v34 = vmul.f32 0.5, %v139_v9 }
  0xfb   :  { %210 = vst [vmem:[%s426_s3 + $0x8] sm:$0xff] %v200_v10 }
  0xfc   :  { %v293_v13 = vpop.eup %292  ;;  %216 = vst [vmem:[%s426_s3 + $0x38] sm:$0xff] %v206_v11  ;;  %302 = verf.f32 %v174_v12 }
  0xfd   :  { %v295_v14 = vpop.eup %294  ;;  %v191_v16 = vadd.f32 1.0, %v293_v13 }
  0xfe   :  { %v197_v18 = vadd.f32 1.0, %v295_v14  ;;  %v297_v19 = vpop.eup %296 }
  0xff   :  { %v201_v20 = vmul.f32 %v191_v16, %v160_v15  ;;  %v299_v21 = vpop.eup %298  ;;  %v192_v24 = vadd.f32 1.0, %v297_v19 }
 0x100   :  { %v207_v22 = vmul.f32 %v197_v18, %v166_v17  ;;  %v198_v26 = vadd.f32 1.0, %v299_v21 }
 0x101   :  { %211 = vst [vmem:[%s426_s3 + $0x10] sm:$0xff] %v201_v20  ;;  %v202_v27 = vmul.f32 %v192_v24, %v161_v23 }
 0x102   :  { %217 = vst [vmem:[%s426_s3 + $0x40] sm:$0xff] %v207_v22  ;;  %v208_v28 = vmul.f32 %v198_v26, %v167_v25 }
 0x103   :  { %212 = vst [vmem:[%s426_s3 + $0x18] sm:$0xff] %v202_v27 }
 0x104   :  { %v301_v29 = vpop.eup %300  ;;  %218 = vst [vmem:[%s426_s3 + $0x48] sm:$0xff] %v208_v28 }
 0x105   :  { %v193_v31 = vadd.f32 1.0, %v301_v29 }
 0x106   :  { %v303_v32 = vpop.eup %302 }
 0x107   :  { %v203_v33 = vmul.f32 %v193_v31, %v162_v30  ;;  %v194_v35 = vadd.f32 1.0, %v303_v32 }
 0x109   :  { %213 = vst [vmem:[%s426_s3 + $0x20] sm:$0xff] %v203_v33  ;;  %v204_v36 = vmul.f32 %v194_v35, %v163_v34 }
 0x10b   :  { %214 = vst [vmem:[%s426_s3 + $0x28] sm:$0xff] %v204_v36 }

// kernel: wav2vec2_forward.36
= control target key start
LH: loop header
LB: loop body
LE: loop exit
PB: predicated region body
PF: predicated region fallthrough
CT: control target
= control target key end

     0   :  { %v273_v0 = vmov 0.0   ;;  %vm274_vm0 = vmmov 0   ;;  %vm174_vm1 = vcmask 523264   ;;  %s418_s1 = inlined_call_operand.vmem [shape: bf16[128,64], index: 1, kind: input, shape index: {}]   ;;  %s419_s0 = inlined_call_operand.vmem [shape: f32[78,128], index: 0, kind: input, shape index: {}]   ;;  %s420_s2 = inlined_call_operand.vmem [shape: f32[1,64], index: 2, kind: input, shape index: {}]   ;;  %s421_s3 = inlined_call_operand.vmem [shape: f32[78,64], index: 3, kind: output, shape index: {}]  }
   0x1   :  { %211 = vmatprep.subr.bf16.mxu0 %v273_v0  ;;  %v265_v1 = vld [vmem:[%s418_s1] sm:$0xff]   ;;  %247 = vmatprep.subr.bf16.mxu1 %v273_v0  ;;  %v266_v2 = vld [vmem:[%s418_s1 + $0x8] sm:$0xff]   ;;  %v267_v3 = vld [vmem:[%s418_s1 + $0x10] sm:$0xff]  }
   0x2   :  { %227 = vmatprep.mubr.msk.bf16.mxu0 %vm274_vm0, %v273_v0  ;;  %239 = vmatprep.mubr.msk.bf16.mxu1 %vm274_vm0, %v273_v0  ;;  %v268_v4 = vld [vmem:[%s418_s1 + $0x18] sm:$0xff]   ;;  %v269_v5 = vld [vmem:[%s418_s1 + $0x20] sm:$0xff]   ;;  %v270_v6 = vld [vmem:[%s418_s1 + $0x28] sm:$0xff]  }
   0x3   :  { %212 = vmatpush3.bf16.msra.mxu0 %v265_v1  ;;  %255 = vmatpush3.bf16.msra.mxu1 %v265_v1  ;;  %v271_v7 = vld [vmem:[%s418_s1 + $0x30] sm:$0xff]   ;;  %v272_v8 = vld [vmem:[%s418_s1 + $0x38] sm:$0xff]   ;;  %v15_v9 = vld [vmem:[%s419_s0] sm:$0xff] }
   0x4   :  { %213 = vmatprep.subr.bf16.mxu0 %v273_v0  ;;  %248 = vmatprep.subr.bf16.mxu1 %v273_v0  ;;  %v16_v10 = vld [vmem:[%s419_s0 + $0x8] sm:$0xff]  ;;  %v21_v11 = vld [vmem:[%s419_s0 + $0x30] sm:$0xff]  ;;  %v22_v12 = vld [vmem:[%s419_s0 + $0x38] sm:$0xff] }
   0x5   :  { %v25_v13 = vpack.c.bf16 %v16_v10, %v15_v9  ;;  %v28_v14 = vpack.c.bf16 %v22_v12, %v21_v11  ;;  %v17_v15 = vld [vmem:[%s419_s0 + $0x10] sm:$0xff]  ;;  %v18_v16 = vld [vmem:[%s419_s0 + $0x18] sm:$0xff]  ;;  %v23_v17 = vld [vmem:[%s419_s0 + $0x40] sm:$0xff] }
   0x6   :  { %v24_v18 = vld [vmem:[%s419_s0 + $0x48] sm:$0xff]  ;;  %v26_v19 = vpack.c.bf16 %v18_v16, %v17_v15  ;;  %v19_v21 = vld [vmem:[%s419_s0 + $0x20] sm:$0xff] }
   0x7   :  { %214 = vmatpush3.bf16.msra.mxu0 %v266_v2  ;;  %256 = vmatpush3.bf16.msra.mxu1 %v266_v2  ;;  %v29_v20 = vpack.c.bf16 %v24_v18, %v23_v17  ;;  %v20_v22 = vld [vmem:[%s419_s0 + $0x28] sm:$0xff]  ;;  %v189_v24 = vld [vmem:[%s420_s2] ss:$0 sm:$0xff] }
   0x8   :  { %215 = vmatprep.subr.bf16.mxu0 %v273_v0  ;;  %249 = vmatprep.subr.bf16.mxu1 %v273_v0  ;;  %v27_v23 = vpack.c.bf16 %v20_v22, %v19_v21 }
   0xb   :  { %216 = vmatpush3.bf16.msra.mxu0 %v267_v3  ;;  %257 = vmatpush3.bf16.msra.mxu1 %v267_v3 }
   0xc   :  { %217 = vmatprep.subr.bf16.mxu0 %v273_v0  ;;  %250 = vmatprep.subr.bf16.mxu1 %v273_v0 }
   0xf   :  { %218 = vmatpush3.bf16.msra.mxu0 %v268_v4  ;;  %258 = vmatpush3.bf16.msra.mxu1 %v268_v4 }
  0x10   :  { %219 = vmatprep.subr.bf16.mxu0 %v273_v0  ;;  %251 = vmatprep.subr.bf16.mxu1 %v273_v0 }
  0x13   :  { %220 = vmatpush3.bf16.msra.mxu0 %v269_v5  ;;  %259 = vmatpush3.bf16.msra.mxu1 %v269_v5 }
  0x14   :  { %221 = vmatprep.subr.bf16.mxu0 %v273_v0  ;;  %252 = vmatprep.subr.bf16.mxu1 %v273_v0 }
  0x17   :  { %222 = vmatpush3.bf16.msra.mxu0 %v270_v6  ;;  %260 = vmatpush3.bf16.msra.mxu1 %v270_v6 }
  0x18   :  { %223 = vmatprep.subr.bf16.mxu0 %v273_v0  ;;  %253 = vmatprep.subr.bf16.mxu1 %v273_v0 }
  0x1b   :  { %224 = vmatpush3.bf16.msra.mxu0 %v271_v7  ;;  %261 = vmatpush3.bf16.msra.mxu1 %v271_v7 }
  0x1c   :  { %225 = vmatprep.subr.bf16.mxu0 %v273_v0  ;;  %254 = vmatprep.subr.bf16.mxu1 %v273_v0 }
  0x1f   :  { %226 = vmatpush3.bf16.msra.mxu0 %v272_v8  ;;  %262 = vmatpush3.bf16.msra.mxu1 %v272_v8 }
  0x22   :  { %228 = vmatmul.mubr.bf16.vlgmr.msra.gmra.mrb[0].mxu0 %v25_v13  ;;  %240 = vmatmul.mubr.bf16.vlgmr.msra.gmra.mrb[0].mxu1 %v28_v14 }
  0x23   :  { %231 = vmatprep.mubr.msk.bf16.mxu0 %vm274_vm0, %v273_v0  ;;  %243 = vmatprep.mubr.msk.bf16.mxu1 %vm274_vm0, %v273_v0 }
  0x2a   :  { %232 = vmatmul.mubr.bf16.gmra.mrb[4].mxu0 %v26_v19  ;;  %244 = vmatmul.mubr.bf16.gmra.mrb[4].mxu1 %v29_v20 }
  0x2b   :  { %235 = vmatprep.mubr.msk.bf16.mxu0 %vm274_vm0, %v273_v0 }
  0x32   :  { %236 = vmatmul.mubr.bf16.gmra.mrb[8].mxu0 %v27_v23 }
  0xf5   :  { %v135_v25 = vpop.f32.mrb[0].mxu0  ;;  %v159_v26 = vpop.f32.mrb[0].mxu1 }
  0xf6   :  { %v136_v27 = vadd.f32 %v189_v24, %v135_v25  ;;  %v229_v28 = vpop.f32.mrb[1].mxu0  ;;  %v160_v29 = vadd.f32 %v189_v24, %v159_v26  ;;  %v241_v30 = vpop.f32.mrb[1].mxu1 }
  0xf7   :  { %v138_v31 = vpop.f32.mrb[2].mxu0  ;;  %v162_v32 = vpop.f32.mrb[2].mxu1 }
  0xf8   :  { %175 = vst.msk [vmem:[%s421_s3] sm:$0xff] %vm174_vm1, %v136_v27  ;;  %v139_v33 = vadd.f32 %v189_v24, %v138_v31  ;;  %v230_v34 = vpop.f32.mrb[3].mxu0  ;;  %181 = vst.msk [vmem:[%s421_s3 + $0x30] sm:$0xff] %vm174_vm1, %v160_v29  ;;  %v163_v35 = vadd.f32 %v189_v24, %v162_v32  ;;  %v242_v36 = vpop.f32.mrb[3].mxu1 }
  0xfa   :  { %176 = vst.msk [vmem:[%s421_s3 + $0x8] sm:$0xff] %vm174_vm1, %v139_v33  ;;  %182 = vst.msk [vmem:[%s421_s3 + $0x38] sm:$0xff] %vm174_vm1, %v163_v35 }
  0xfd   :  { %v143_v37 = vpop.f32.mrb[4].mxu0  ;;  %v167_v38 = vpop.f32.mrb[4].mxu1 }
  0xfe   :  { %v144_v39 = vadd.f32 %v189_v24, %v143_v37  ;;  %v233_v40 = vpop.f32.mrb[5].mxu0  ;;  %v168_v41 = vadd.f32 %v189_v24, %v167_v38  ;;  %v245_v42 = vpop.f32.mrb[5].mxu1 }
  0xff   :  { %v146_v43 = vpop.f32.mrb[6].mxu0  ;;  %v170_v44 = vpop.f32.mrb[6].mxu1 }
 0x100   :  { %177 = vst.msk [vmem:[%s421_s3 + $0x10] sm:$0xff] %vm174_vm1, %v144_v39  ;;  %v147_v45 = vadd.f32 %v189_v24, %v146_v43  ;;  %v234_v46 = vpop.f32.mrb[7].mxu0  ;;  %183 = vst.msk [vmem:[%s421_s3 + $0x40] sm:$0xff] %vm174_vm1, %v168_v41  ;;  %v171_v47 = vadd.f32 %v189_v24, %v170_v44  ;;  %v246_v48 = vpop.f32.mrb[7].mxu1 }
 0x102   :  { %178 = vst.msk [vmem:[%s421_s3 + $0x18] sm:$0xff] %vm174_vm1, %v147_v45  ;;  %184 = vst.msk [vmem:[%s421_s3 + $0x48] sm:$0xff] %vm174_vm1, %v171_v47 }
 0x105   :  { %v151_v49 = vpop.f32.mrb[8].mxu0 }
 0x106   :  { %v152_v50 = vadd.f32 %v189_v24, %v151_v49  ;;  %v237_v51 = vpop.f32.mrb[9].mxu0 }
 0x107   :  { %v154_v52 = vpop.f32.mrb[10].mxu0 }
 0x108   :  { %179 = vst.msk [vmem:[%s421_s3 + $0x20] sm:$0xff] %vm174_vm1, %v152_v50  ;;  %v155_v53 = vadd.f32 %v189_v24, %v154_v52  ;;  %v238_v54 = vpop.f32.mrb[11].mxu0 }
 0x10a   :  { %180 = vst.msk [vmem:[%s421_s3 + $0x28] sm:$0xff] %vm174_vm1, %v155_v53 }

</bundles_post_ra>
